<compile_context>
chip_gen: v7x
topology: tpu7x:2x2x1
jax: 0.10.0
libtpu: 0.0.40
codegen_flags: <defaults>
</compile_context>

<pallas_src>
import math
import functools

import jax
import jax.numpy as jnp
import numpy as np
from jax.experimental import pallas as pl
from jax.experimental.pallas import tpu as pltpu

LOG2 = math.log(2.0)


def _ssp(t):
    # shifted softplus: softplus(x) - ln(2)  (numerically stable form)
    return jnp.maximum(t, 0.0) + jnp.log(1.0 + jnp.exp(-jnp.abs(t))) - LOG2


# ----------------------------------------------------------------------------
# Pallas kernel: full stack of SchNetInteraction blocks (+ residual adds).
# grid = (B // Bt,).  All layers execute in one grid step; weights resident.
# ----------------------------------------------------------------------------
def schnet_stack_kernel(x_ref, f_ref, g_ref, w_ref, b_ref, out_ref, *,
                        n_layers, n_atoms, n_nbh, gp):
    bt = x_ref.shape[0]
    c = x_ref.shape[2]
    f_dim = w_ref.shape[2]
    an = n_atoms * n_nbh
    m_atom = bt * n_atoms
    m_edge = bt * an

    x = x_ref[...].reshape(m_atom, c)                          # (Bt*A, C)  f32
    f = f_ref[...].reshape(m_edge, gp).astype(jnp.bfloat16)    # cast once
    g = g_ref[0]                                               # (Bt*AN, Bt*A) f32
    # g = block-diagonal one-hot gather, pre-scaled by cosine_cutoff * nbr_mask

    for l in range(n_layers):                                  # static unroll
        w1 = w_ref[l, 0:gp, :]                                 # b1 folded in
        w2 = w_ref[l, gp:gp + f_dim, :]
        win = w_ref[l, gp + f_dim:gp + 2 * f_dim, :]
        wf2 = w_ref[l, gp + 2 * f_dim:gp + 3 * f_dim, :]
        wd = w_ref[l, gp + 3 * f_dim:gp + 4 * f_dim, :]
        b2 = b_ref[l, 0:1, :]
        bf2 = b_ref[l, 1:2, :]
        bd = b_ref[l, 2:3, :]

        # --- filter-generating network: Dense(+folded b1) -> ssp -> Dense
        h = _ssp(jnp.dot(f, w1, preferred_element_type=jnp.float32))
        w = jnp.dot(h.astype(jnp.bfloat16), w2,
                    preferred_element_type=jnp.float32) + b2    # (Bt*AN, F)

        # --- in2f: bias-free dense on atom embeddings
        y = jnp.dot(x.astype(jnp.bfloat16), win,
                    preferred_element_type=jnp.float32)         # (Bt*A, F)

        # --- neighbor gather (cutoff*mask already folded into g, f32 exact)
        y_nbh = jnp.dot(g, y, preferred_element_type=jnp.float32)  # (Bt*AN, F)

        # --- continuous-filter conv + sum over neighbors (sublane reduce)
        prod = (y_nbh * w).reshape(m_atom, n_nbh, f_dim)        # (Bt*A, N, F)
        agg = jnp.sum(prod, axis=1)                             # (Bt*A, F)

        # --- f2out: dense + shifted softplus; then output dense (no act.)
        v = _ssp(jnp.dot(agg.astype(jnp.bfloat16), wf2,
                         preferred_element_type=jnp.float32) + bf2)
        v = jnp.dot(v.astype(jnp.bfloat16), wd,
                    preferred_element_type=jnp.float32) + bd     # (Bt*A, C)

        x = x + v                                                # residual

    out_ref[...] = x.reshape(bt, n_atoms, c)


def _pick_bt(batch, n_atoms, n_nbh):
    """Largest divisor of `batch` keeping per-step edge rows / gather modest."""
    bt = 1
    for d in range(1, batch + 1):
        if batch % d == 0 and d * n_atoms * n_nbh <= 2048 and d * n_atoms <= 256:
            bt = d
    return bt


def _build_gather(neighbors, cc, bt):
    """Block-diagonal one-hot gather matrix, scaled by cosine_cutoff * mask."""
    B, A, N = neighbors.shape
    nb = neighbors.reshape(B // bt, bt, A * N).astype(jnp.int32)
    nb = nb + (jnp.arange(bt, dtype=jnp.int32) * A)[None, :, None]
    nb = nb.reshape(B // bt, bt * A * N)                       # index into Bt*A
    col = jnp.arange(bt * A, dtype=jnp.int32)
    onehot = (nb[..., None] == col).astype(jnp.float32)        # (B/Bt, Bt*AN, Bt*A)
    return onehot * cc.reshape(B // bt, bt * A * N, 1)


def schnet_interactions_fused(x, f_flat, neighbors, cc, w_slab, b_slab, gp):
    B, A, C = x.shape
    AN = f_flat.shape[1]
    L, RW, F = w_slab.shape
    n_nbh = AN // A
    bt = _pick_bt(B, A, n_nbh)

    g = _build_gather(neighbors, cc, bt)                       # (B/Bt, Bt*AN, Bt*A)

    kernel = functools.partial(schnet_stack_kernel, n_layers=L, n_atoms=A,
                               n_nbh=n_nbh, gp=gp)

    grid_spec = pltpu.PrefetchScalarGridSpec(
        num_scalar_prefetch=0,
        grid=(B // bt,),
        in_specs=[
            pl.BlockSpec((bt, A, C), lambda b: (b, 0, 0)),           # x
            pl.BlockSpec((bt, AN, gp), lambda b: (b, 0, 0)),         # gaussians f32
            pl.BlockSpec((1, bt * AN, bt * A), lambda b: (b, 0, 0)), # gather*cc
            pl.BlockSpec((L, RW, F), lambda b: (0, 0, 0)),           # weights (resident)
            pl.BlockSpec((L, 8, F), lambda b: (0, 0, 0)),            # biases (resident)
        ],
        out_specs=pl.BlockSpec((bt, A, C), lambda b: (b, 0, 0)),
    )
    return pl.pallas_call(
        kernel,
        out_shape=jax.ShapeDtypeStruct((B, A, C), jnp.float32),
        grid_spec=grid_spec,
        compiler_params=pltpu.CompilerParams(
            dimension_semantics=("parallel",),
            vmem_limit_bytes=32 * 1024 * 1024),
    )(x, f_flat, g, w_slab, b_slab)


# ----------------------------------------------------------------------------
# Plain-JAX glue: embedding lookup, AtomDistances, GaussianSmearing
# ----------------------------------------------------------------------------
def atom_distances(positions, neighbors, cell, cell_offset, neighbor_mask):
    B = positions.shape[0]
    b_idx = jnp.arange(B)[:, None, None]
    pos_j = positions[b_idx, neighbors]                        # (B, A, N, 3)
    dist_vec = pos_j - positions[:, :, None, :]
    offsets = jnp.einsum("band,bde->bane", cell_offset, cell)
    dist_vec = dist_vec + offsets
    r_ij = jnp.sqrt(jnp.sum(dist_vec * dist_vec, axis=-1))
    return jnp.where(neighbor_mask != 0, r_ij, 0.0)


def gaussian_smearing(r_ij, start, stop, n_gaussians):
    offset = jnp.linspace(start, stop, n_gaussians).astype(jnp.float32)
    width = offset[1] - offset[0]
    coeff = -0.5 / (width ** 2)
    diff = r_ij[..., None] - offset
    return jnp.exp(coeff * diff * diff)


def stack_interaction_params(interactions, gp, n_gaussians):
    """Pack per-layer weights into one bf16 slab and biases into one f32 slab.

    Slab rows (all 128-wide): [0,gp)=w1 (b1 folded at row n_gaussians, matching
    the constant-1 column of the padded basis), then w2, win, wf2, wd.
    """
    F = interactions[0]["w2"].shape[0]
    C = interactions[0]["wd"].shape[0]
    assert C == F, "weight-slab packing assumes n_atom_basis == n_filters"
    w_layers, b_layers = [], []
    for p in interactions:
        w1p = jnp.zeros((gp, F), jnp.float32)
        w1p = w1p.at[:n_gaussians].set(p["w1"])
        w1p = w1p.at[n_gaussians].set(p["b1"][0])              # folded bias
        w_layers.append(jnp.concatenate(
            [w1p, p["w2"], p["win"], p["wf2"], p["wd"]], axis=0))
        bias = jnp.zeros((8, C), jnp.float32)
        bias = bias.at[0].set(p["b2"][0]).at[1].set(p["bf2"][0]).at[2].set(p["bd"][0])
        b_layers.append(bias)
    return (jnp.stack(w_layers).astype(jnp.bfloat16),
            jnp.stack(b_layers).astype(jnp.float32))


def schnet_forward(inputs, params, *, cutoff, environment_cutoff, n_gaussians):
    Z = inputs["Z"]
    x = params["embedding"][Z].astype(jnp.float32)             # (B, A, C)
    r_ij = atom_distances(inputs["R"], inputs["neighbors"], inputs["cell"],
                          inputs["cell_offset"], inputs["neighbor_mask"])
    f_ij = gaussian_smearing(r_ij, 0.0, environment_cutoff, n_gaussians)

    B, A, N = inputs["neighbors"].shape
    G = n_gaussians
    Gp = ((G + 1 + 7) // 8) * 8           # +1 constant-1 bias column, pad to 8

    # cosine cutoff * neighbor mask (layer-invariant, folded into gather matrix)
    cc = 0.5 * (jnp.cos(r_ij * (math.pi / cutoff)) + 1.0)
    cc = cc * (r_ij < cutoff).astype(jnp.float32)
    cc = cc * inputs["neighbor_mask"].astype(jnp.float32)

    # Gaussian features: f32 in HBM, constant-1 column at index G for b1 fold
    f_flat = f_ij.reshape(B, A * N, G).astype(jnp.float32)
    f_flat = jnp.concatenate(
        [f_flat, jnp.zeros((B, A * N, Gp - G), jnp.float32)], axis=-1)
    f_flat = f_flat.at[:, :, G].set(1.0)

    w_slab, b_slab = stack_interaction_params(params["interactions"], Gp, G)
    return schnet_interactions_fused(x, f_flat, inputs["neighbors"], cc,
                                     w_slab, b_slab, Gp)
    # TODO(synk): relprop (layer-wise relevance propagation) is analysis-only
    # and has no forward-pass Pallas equivalent; not implemented.


# ----------------------------------------------------------------------------
# Pure-JAX f32 reference (same math, gather via fancy indexing) for validation
# ----------------------------------------------------------------------------
def ref_forward(inputs, params, *, cutoff, environment_cutoff, n_gaussians):
    Z = inputs["Z"]
    x = params["embedding"][Z]
    r_ij = atom_distances(inputs["R"], inputs["neighbors"], inputs["cell"],
                          inputs["cell_offset"], inputs["neighbor_mask"])
    f_ij = gaussian_smearing(r_ij, 0.0, environment_cutoff, n_gaussians)
    B = Z.shape[0]
    b_idx = jnp.arange(B)[:, None, None]
    mask = inputs["neighbor_mask"].astype(jnp.float32)
    for p in params["interactions"]:
        W = jnp.dot(_ssp(jnp.dot(f_ij, p["w1"]) + p["b1"][0]), p["w2"]) + p["b2"][0]
        cc = 0.5 * (jnp.cos(r_ij * jnp.pi / cutoff) + 1.0)
        cc = cc * (r_ij < cutoff).astype(jnp.float32)
        W = W * cc[..., None]
        y = jnp.dot(x, p["win"])
        y_nbh = y[b_idx, inputs["neighbors"]]                  # (B, A, N, F)
        y_nbh = y_nbh * W * mask[..., None]
        agg = jnp.sum(y_nbh, axis=2)
        v = _ssp(jnp.dot(agg, p["wf2"]) + p["bf2"][0])
        v = jnp.dot(v, p["wd"]) + p["bd"][0]
        x = x + v
    return x


# ----------------------------------------------------------------------------
# Deterministic parameter init (xavier weights, small biases)
# ----------------------------------------------------------------------------
def xavier_uniform(key, shape):
    fan_in, fan_out = shape
    limit = math.sqrt(6.0 / (fan_in + fan_out))
    return jax.random.uniform(key, shape, jnp.float32, -limit, limit)


def init_interaction_params(key, n_atom_basis, n_gaussians, n_filters):
    ks = jax.random.split(key, 10)
    return {
        "w1":  xavier_uniform(ks[0], (n_gaussians, n_filters)),
        "b1":  0.1 * jax.random.normal(ks[1], (1, n_filters), jnp.float32),
        "w2":  xavier_uniform(ks[2], (n_filters, n_filters)),
        "b2":  0.1 * jax.random.normal(ks[3], (1, n_filters), jnp.float32),
        "win": xavier_uniform(ks[4], (n_atom_basis, n_filters)),   # in2f, no bias
        "wf2": xavier_uniform(ks[5], (n_filters, n_atom_basis)),
        "bf2": 0.1 * jax.random.normal(ks[6], (1, n_atom_basis), jnp.float32),
        "wd":  xavier_uniform(ks[7], (n_atom_basis, n_atom_basis)),
        "bd":  0.1 * jax.random.normal(ks[8], (1, n_atom_basis), jnp.float32),
    }


if __name__ == "__main__":
    # small batch/atom counts, module-default (lane-dense) feature widths
    B, A, NBH = 2, 8, 8
    n_atom_basis, n_filters, n_gaussians = 128, 128, 25
    n_interactions = 3
    cutoff = 5.0
    max_z = 10

    key = jax.random.PRNGKey(0)
    k = jax.random.split(key, 8 + n_interactions)

    emb = jax.random.normal(k[0], (max_z, n_atom_basis), jnp.float32)
    emb = emb.at[0].set(0.0)  # nn.Embedding(padding_idx=0)

    params = {
        "embedding": emb,
        "interactions": [init_interaction_params(k[1 + i], n_atom_basis,
                                                  n_gaussians, n_filters)
                         for i in range(n_interactions)],
    }

    Z = jax.random.randint(k[4], (B, A), 1, max_z)
    R = jax.random.uniform(k[5], (B, A, 3), jnp.float32, 0.0, 4.0)
    cell = jnp.tile(10.0 * jnp.eye(3, dtype=jnp.float32)[None], (B, 1, 1))
    cell_offset = jnp.zeros((B, A, NBH, 3), jnp.float32)
    neighbors = jax.random.randint(k[6], (B, A, NBH), 0, A)
    neighbor_mask = (jax.random.uniform(k[7], (B, A, NBH)) > 0.2).astype(jnp.float32)

    inputs = dict(Z=Z, R=R, cell=cell, cell_offset=cell_offset,
                  neighbors=neighbors, neighbor_mask=neighbor_mask)

    out = schnet_forward(inputs, params, cutoff=cutoff,
                         environment_cutoff=cutoff, n_gaussians=n_gaussians)
    out = jax.block_until_ready(out)

    ref = ref_forward(inputs, params, cutoff=cutoff,
                      environment_cutoff=cutoff, n_gaussians=n_gaussians)
    # bf16 MXU operands with f32 accumulation vs pure-f32 reference
    np.testing.assert_allclose(np.asarray(out), np.asarray(ref),
                               rtol=5e-2, atol=5e-2)
    print("KERNEL_OK")
</pallas_src>

<mosaic_0001>
module attributes {stable_mosaic.version = 11 : i64} {
  func.func @schnet_stack_kernel(%arg0: i32, %arg1: memref<2x8x128xf32, #tpu.memory_space<vmem>>, %arg2: memref<2x64x32xf32, #tpu.memory_space<vmem>>, %arg3: memref<1x128x16xf32, #tpu.memory_space<vmem>>, %arg4: memref<3x544x128xbf16, #tpu.memory_space<vmem>>, %arg5: memref<3x8x128xf32, #tpu.memory_space<vmem>>, %arg6: memref<2x8x128xf32, #tpu.memory_space<vmem>>) attributes {dimension_semantics = [#tpu.dimension_semantics<parallel>], iteration_bounds = array<i64: 1>, scalar_prefetch = 0 : i64, scratch_operands = 0 : i64, tpu.core_type = #tpu.core_type<tc>, window_params = [{transform_indices = @transform_0, window_bounds = array<i64: 2, 8, 128>}, {transform_indices = @transform_1, window_bounds = array<i64: 2, 64, 32>}, {transform_indices = @transform_2, window_bounds = array<i64: 1, 128, 16>}, {pipeline_mode = #tpu.pipeline_mode<synchronous>, transform_indices = @transform_3, window_bounds = array<i64: 3, 544, 128>}, {pipeline_mode = #tpu.pipeline_mode<synchronous>, transform_indices = @transform_4, window_bounds = array<i64: 3, 8, 128>}, {transform_indices = @transform_5, window_bounds = array<i64: 2, 8, 128>}]} {
    %c0 = arith.constant 0 : index
    %c0_0 = arith.constant 0 : index
    %c0_1 = arith.constant 0 : index
    %0 = vector.load %arg1[%c0, %c0_0, %c0_1] : memref<2x8x128xf32, #tpu.memory_space<vmem>>, vector<2x8x128xf32>
    %1 = vector.shape_cast %0 : vector<2x8x128xf32> to vector<16x128xf32>
    %c0_2 = arith.constant 0 : index
    %c0_3 = arith.constant 0 : index
    %c0_4 = arith.constant 0 : index
    %2 = vector.load %arg2[%c0_2, %c0_3, %c0_4] : memref<2x64x32xf32, #tpu.memory_space<vmem>>, vector<2x64x32xf32>
    %3 = vector.shape_cast %2 : vector<2x64x32xf32> to vector<128x32xf32>
    %4 = arith.truncf %3 : vector<128x32xf32> to vector<128x32xbf16>
    %c0_5 = arith.constant 0 : index
    %c0_6 = arith.constant 0 : index
    %c0_7 = arith.constant 0 : index
    %5 = vector.load %arg3[%c0_5, %c0_6, %c0_7] : memref<1x128x16xf32, #tpu.memory_space<vmem>>, vector<1x128x16xf32>
    %6 = vector.shape_cast %5 : vector<1x128x16xf32> to vector<128x16xf32>
    %c0_8 = arith.constant 0 : index
    %c0_9 = arith.constant 0 : index
    %c0_10 = arith.constant 0 : index
    %7 = vector.load %arg4[%c0_8, %c0_9, %c0_10] : memref<3x544x128xbf16, #tpu.memory_space<vmem>>, vector<1x32x128xbf16>
    %8 = vector.shape_cast %7 : vector<1x32x128xbf16> to vector<32x128xbf16>
    %c0_11 = arith.constant 0 : index
    %c32 = arith.constant 32 : index
    %c0_12 = arith.constant 0 : index
    %9 = vector.load %arg4[%c0_11, %c32, %c0_12] : memref<3x544x128xbf16, #tpu.memory_space<vmem>>, vector<1x128x128xbf16>
    %10 = vector.shape_cast %9 : vector<1x128x128xbf16> to vector<128x128xbf16>
    %c0_13 = arith.constant 0 : index
    %c160 = arith.constant 160 : index
    %c0_14 = arith.constant 0 : index
    %11 = vector.load %arg4[%c0_13, %c160, %c0_14] : memref<3x544x128xbf16, #tpu.memory_space<vmem>>, vector<1x128x128xbf16>
    %12 = vector.shape_cast %11 : vector<1x128x128xbf16> to vector<128x128xbf16>
    %c0_15 = arith.constant 0 : index
    %c288 = arith.constant 288 : index
    %c0_16 = arith.constant 0 : index
    %13 = vector.load %arg4[%c0_15, %c288, %c0_16] : memref<3x544x128xbf16, #tpu.memory_space<vmem>>, vector<1x128x128xbf16>
    %14 = vector.shape_cast %13 : vector<1x128x128xbf16> to vector<128x128xbf16>
    %c0_17 = arith.constant 0 : index
    %c416 = arith.constant 416 : index
    %c0_18 = arith.constant 0 : index
    %15 = vector.load %arg4[%c0_17, %c416, %c0_18] : memref<3x544x128xbf16, #tpu.memory_space<vmem>>, vector<1x128x128xbf16>
    %16 = vector.shape_cast %15 : vector<1x128x128xbf16> to vector<128x128xbf16>
    %c0_19 = arith.constant 0 : index
    %c0_20 = arith.constant 0 : index
    %c0_21 = arith.constant 0 : index
    %17 = vector.load %arg5[%c0_19, %c0_20, %c0_21] : memref<3x8x128xf32, #tpu.memory_space<vmem>>, vector<1x1x128xf32>
    %18 = vector.shape_cast %17 : vector<1x1x128xf32> to vector<1x128xf32>
    %c0_22 = arith.constant 0 : index
    %c1 = arith.constant 1 : index
    %c0_23 = arith.constant 0 : index
    %19 = vector.load %arg5[%c0_22, %c1, %c0_23] : memref<3x8x128xf32, #tpu.memory_space<vmem>>, vector<1x1x128xf32>
    %20 = vector.shape_cast %19 : vector<1x1x128xf32> to vector<1x128xf32>
    %c0_24 = arith.constant 0 : index
    %c2 = arith.constant 2 : index
    %c0_25 = arith.constant 0 : index
    %21 = vector.load %arg5[%c0_24, %c2, %c0_25] : memref<3x8x128xf32, #tpu.memory_space<vmem>>, vector<1x1x128xf32>
    %22 = vector.shape_cast %21 : vector<1x1x128xf32> to vector<1x128xf32>
    %cst = arith.constant dense<0.000000e+00> : vector<128x128xf32>
    %23 = tpu.matmul %4, %8, %cst {dimension_numbers = #tpu.dot_dimension_numbers<[1], [0], [0], [1], [0, 0, 1, 1], [], []>} : vector<128x32xbf16>, vector<32x128xbf16>, vector<128x128xf32> -> vector<128x128xf32>
    %cst_26 = arith.constant 0.000000e+00 : f32
    %24 = vector.broadcast %cst_26 : f32 to vector<128x128xf32>
    %25 = arith.maximumf %23, %24 : vector<128x128xf32>
    %26 = math.absf %23 : vector<128x128xf32>
    %cst_27 = arith.constant 0.000000e+00 : f32
    %27 = vector.broadcast %cst_27 : f32 to vector<128x128xf32>
    %28 = arith.subf %27, %26 : vector<128x128xf32>
    %29 = math.exp %28 : vector<128x128xf32>
    %cst_28 = arith.constant 1.000000e+00 : f32
    %30 = vector.broadcast %cst_28 : f32 to vector<128x128xf32>
    %31 = arith.addf %30, %29 : vector<128x128xf32>
    %32 = math.log %31 : vector<128x128xf32>
    %33 = arith.addf %25, %32 : vector<128x128xf32>
    %cst_29 = arith.constant 0.693147182 : f32
    %34 = vector.broadcast %cst_29 : f32 to vector<128x128xf32>
    %35 = arith.subf %33, %34 : vector<128x128xf32>
    %36 = arith.truncf %35 : vector<128x128xf32> to vector<128x128xbf16>
    %cst_30 = arith.constant dense<0.000000e+00> : vector<128x128xf32>
    %37 = tpu.matmul %36, %10, %cst_30 {dimension_numbers = #tpu.dot_dimension_numbers<[1], [0], [0], [1], [0, 0, 1, 1], [], []>} : vector<128x128xbf16>, vector<128x128xbf16>, vector<128x128xf32> -> vector<128x128xf32>
    %38 = vector.broadcast %18 : vector<1x128xf32> to vector<128x128xf32>
    %39 = arith.addf %37, %38 : vector<128x128xf32>
    %40 = arith.truncf %1 : vector<16x128xf32> to vector<16x128xbf16>
    %cst_31 = arith.constant dense<0.000000e+00> : vector<16x128xf32>
    %41 = tpu.matmul %40, %12, %cst_31 {dimension_numbers = #tpu.dot_dimension_numbers<[1], [0], [0], [1], [0, 0, 1, 1], [], []>} : vector<16x128xbf16>, vector<128x128xbf16>, vector<16x128xf32> -> vector<16x128xf32>
    %cst_32 = arith.constant dense<0.000000e+00> : vector<128x128xf32>
    %42 = tpu.matmul %6, %41, %cst_32 {dimension_numbers = #tpu.dot_dimension_numbers<[1], [0], [0], [1], [0, 0, 1, 1], [], []>} : vector<128x16xf32>, vector<16x128xf32>, vector<128x128xf32> -> vector<128x128xf32>
    %43 = arith.mulf %42, %39 : vector<128x128xf32>
    %44 = vector.shape_cast %43 : vector<128x128xf32> to vector<16x8x128xf32>
    %cst_33 = arith.constant dense<0.000000e+00> : vector<16x128xf32>
    %45 = vector.multi_reduction <add>, %44, %cst_33 [1] : vector<16x8x128xf32> to vector<16x128xf32>
    %46 = arith.truncf %45 : vector<16x128xf32> to vector<16x128xbf16>
    %cst_34 = arith.constant dense<0.000000e+00> : vector<16x128xf32>
    %47 = tpu.matmul %46, %14, %cst_34 {dimension_numbers = #tpu.dot_dimension_numbers<[1], [0], [0], [1], [0, 0, 1, 1], [], []>} : vector<16x128xbf16>, vector<128x128xbf16>, vector<16x128xf32> -> vector<16x128xf32>
    %48 = vector.broadcast %20 : vector<1x128xf32> to vector<16x128xf32>
    %49 = arith.addf %47, %48 : vector<16x128xf32>
    %cst_35 = arith.constant 0.000000e+00 : f32
    %50 = vector.broadcast %cst_35 : f32 to vector<16x128xf32>
    %51 = arith.maximumf %49, %50 : vector<16x128xf32>
    %52 = math.absf %49 : vector<16x128xf32>
    %cst_36 = arith.constant 0.000000e+00 : f32
    %53 = vector.broadcast %cst_36 : f32 to vector<16x128xf32>
    %54 = arith.subf %53, %52 : vector<16x128xf32>
    %55 = math.exp %54 : vector<16x128xf32>
    %cst_37 = arith.constant 1.000000e+00 : f32
    %56 = vector.broadcast %cst_37 : f32 to vector<16x128xf32>
    %57 = arith.addf %56, %55 : vector<16x128xf32>
    %58 = math.log %57 : vector<16x128xf32>
    %59 = arith.addf %51, %58 : vector<16x128xf32>
    %cst_38 = arith.constant 0.693147182 : f32
    %60 = vector.broadcast %cst_38 : f32 to vector<16x128xf32>
    %61 = arith.subf %59, %60 : vector<16x128xf32>
    %62 = arith.truncf %61 : vector<16x128xf32> to vector<16x128xbf16>
    %cst_39 = arith.constant dense<0.000000e+00> : vector<16x128xf32>
    %63 = tpu.matmul %62, %16, %cst_39 {dimension_numbers = #tpu.dot_dimension_numbers<[1], [0], [0], [1], [0, 0, 1, 1], [], []>} : vector<16x128xbf16>, vector<128x128xbf16>, vector<16x128xf32> -> vector<16x128xf32>
    %64 = vector.broadcast %22 : vector<1x128xf32> to vector<16x128xf32>
    %65 = arith.addf %63, %64 : vector<16x128xf32>
    %66 = arith.addf %1, %65 : vector<16x128xf32>
    %c1_40 = arith.constant 1 : index
    %c0_41 = arith.constant 0 : index
    %c0_42 = arith.constant 0 : index
    %67 = vector.load %arg4[%c1_40, %c0_41, %c0_42] : memref<3x544x128xbf16, #tpu.memory_space<vmem>>, vector<1x32x128xbf16>
    %68 = vector.shape_cast %67 : vector<1x32x128xbf16> to vector<32x128xbf16>
    %c1_43 = arith.constant 1 : index
    %c32_44 = arith.constant 32 : index
    %c0_45 = arith.constant 0 : index
    %69 = vector.load %arg4[%c1_43, %c32_44, %c0_45] : memref<3x544x128xbf16, #tpu.memory_space<vmem>>, vector<1x128x128xbf16>
    %70 = vector.shape_cast %69 : vector<1x128x128xbf16> to vector<128x128xbf16>
    %c1_46 = arith.constant 1 : index
    %c160_47 = arith.constant 160 : index
    %c0_48 = arith.constant 0 : index
    %71 = vector.load %arg4[%c1_46, %c160_47, %c0_48] : memref<3x544x128xbf16, #tpu.memory_space<vmem>>, vector<1x128x128xbf16>
    %72 = vector.shape_cast %71 : vector<1x128x128xbf16> to vector<128x128xbf16>
    %c1_49 = arith.constant 1 : index
    %c288_50 = arith.constant 288 : index
    %c0_51 = arith.constant 0 : index
    %73 = vector.load %arg4[%c1_49, %c288_50, %c0_51] : memref<3x544x128xbf16, #tpu.memory_space<vmem>>, vector<1x128x128xbf16>
    %74 = vector.shape_cast %73 : vector<1x128x128xbf16> to vector<128x128xbf16>
    %c1_52 = arith.constant 1 : index
    %c416_53 = arith.constant 416 : index
    %c0_54 = arith.constant 0 : index
    %75 = vector.load %arg4[%c1_52, %c416_53, %c0_54] : memref<3x544x128xbf16, #tpu.memory_space<vmem>>, vector<1x128x128xbf16>
    %76 = vector.shape_cast %75 : vector<1x128x128xbf16> to vector<128x128xbf16>
    %c1_55 = arith.constant 1 : index
    %c0_56 = arith.constant 0 : index
    %c0_57 = arith.constant 0 : index
    %77 = vector.load %arg5[%c1_55, %c0_56, %c0_57] : memref<3x8x128xf32, #tpu.memory_space<vmem>>, vector<1x1x128xf32>
    %78 = vector.shape_cast %77 : vector<1x1x128xf32> to vector<1x128xf32>
    %c1_58 = arith.constant 1 : index
    %c1_59 = arith.constant 1 : index
    %c0_60 = arith.constant 0 : index
    %79 = vector.load %arg5[%c1_58, %c1_59, %c0_60] : memref<3x8x128xf32, #tpu.memory_space<vmem>>, vector<1x1x128xf32>
    %80 = vector.shape_cast %79 : vector<1x1x128xf32> to vector<1x128xf32>
    %c1_61 = arith.constant 1 : index
    %c2_62 = arith.constant 2 : index
    %c0_63 = arith.constant 0 : index
    %81 = vector.load %arg5[%c1_61, %c2_62, %c0_63] : memref<3x8x128xf32, #tpu.memory_space<vmem>>, vector<1x1x128xf32>
    %82 = vector.shape_cast %81 : vector<1x1x128xf32> to vector<1x128xf32>
    %cst_64 = arith.constant dense<0.000000e+00> : vector<128x128xf32>
    %83 = tpu.matmul %4, %68, %cst_64 {dimension_numbers = #tpu.dot_dimension_numbers<[1], [0], [0], [1], [0, 0, 1, 1], [], []>} : vector<128x32xbf16>, vector<32x128xbf16>, vector<128x128xf32> -> vector<128x128xf32>
    %cst_65 = arith.constant 0.000000e+00 : f32
    %84 = vector.broadcast %cst_65 : f32 to vector<128x128xf32>
    %85 = arith.maximumf %83, %84 : vector<128x128xf32>
    %86 = math.absf %83 : vector<128x128xf32>
    %cst_66 = arith.constant 0.000000e+00 : f32
    %87 = vector.broadcast %cst_66 : f32 to vector<128x128xf32>
    %88 = arith.subf %87, %86 : vector<128x128xf32>
    %89 = math.exp %88 : vector<128x128xf32>
    %cst_67 = arith.constant 1.000000e+00 : f32
    %90 = vector.broadcast %cst_67 : f32 to vector<128x128xf32>
    %91 = arith.addf %90, %89 : vector<128x128xf32>
    %92 = math.log %91 : vector<128x128xf32>
    %93 = arith.addf %85, %92 : vector<128x128xf32>
    %cst_68 = arith.constant 0.693147182 : f32
    %94 = vector.broadcast %cst_68 : f32 to vector<128x128xf32>
    %95 = arith.subf %93, %94 : vector<128x128xf32>
    %96 = arith.truncf %95 : vector<128x128xf32> to vector<128x128xbf16>
    %cst_69 = arith.constant dense<0.000000e+00> : vector<128x128xf32>
    %97 = tpu.matmul %96, %70, %cst_69 {dimension_numbers = #tpu.dot_dimension_numbers<[1], [0], [0], [1], [0, 0, 1, 1], [], []>} : vector<128x128xbf16>, vector<128x128xbf16>, vector<128x128xf32> -> vector<128x128xf32>
    %98 = vector.broadcast %78 : vector<1x128xf32> to vector<128x128xf32>
    %99 = arith.addf %97, %98 : vector<128x128xf32>
    %100 = arith.truncf %66 : vector<16x128xf32> to vector<16x128xbf16>
    %cst_70 = arith.constant dense<0.000000e+00> : vector<16x128xf32>
    %101 = tpu.matmul %100, %72, %cst_70 {dimension_numbers = #tpu.dot_dimension_numbers<[1], [0], [0], [1], [0, 0, 1, 1], [], []>} : vector<16x128xbf16>, vector<128x128xbf16>, vector<16x128xf32> -> vector<16x128xf32>
    %cst_71 = arith.constant dense<0.000000e+00> : vector<128x128xf32>
    %102 = tpu.matmul %6, %101, %cst_71 {dimension_numbers = #tpu.dot_dimension_numbers<[1], [0], [0], [1], [0, 0, 1, 1], [], []>} : vector<128x16xf32>, vector<16x128xf32>, vector<128x128xf32> -> vector<128x128xf32>
    %103 = arith.mulf %102, %99 : vector<128x128xf32>
    %104 = vector.shape_cast %103 : vector<128x128xf32> to vector<16x8x128xf32>
    %cst_72 = arith.constant dense<0.000000e+00> : vector<16x128xf32>
    %105 = vector.multi_reduction <add>, %104, %cst_72 [1] : vector<16x8x128xf32> to vector<16x128xf32>
    %106 = arith.truncf %105 : vector<16x128xf32> to vector<16x128xbf16>
    %cst_73 = arith.constant dense<0.000000e+00> : vector<16x128xf32>
    %107 = tpu.matmul %106, %74, %cst_73 {dimension_numbers = #tpu.dot_dimension_numbers<[1], [0], [0], [1], [0, 0, 1, 1], [], []>} : vector<16x128xbf16>, vector<128x128xbf16>, vector<16x128xf32> -> vector<16x128xf32>
    %108 = vector.broadcast %80 : vector<1x128xf32> to vector<16x128xf32>
    %109 = arith.addf %107, %108 : vector<16x128xf32>
    %cst_74 = arith.constant 0.000000e+00 : f32
    %110 = vector.broadcast %cst_74 : f32 to vector<16x128xf32>
    %111 = arith.maximumf %109, %110 : vector<16x128xf32>
    %112 = math.absf %109 : vector<16x128xf32>
    %cst_75 = arith.constant 0.000000e+00 : f32
    %113 = vector.broadcast %cst_75 : f32 to vector<16x128xf32>
    %114 = arith.subf %113, %112 : vector<16x128xf32>
    %115 = math.exp %114 : vector<16x128xf32>
    %cst_76 = arith.constant 1.000000e+00 : f32
    %116 = vector.broadcast %cst_76 : f32 to vector<16x128xf32>
    %117 = arith.addf %116, %115 : vector<16x128xf32>
    %118 = math.log %117 : vector<16x128xf32>
    %119 = arith.addf %111, %118 : vector<16x128xf32>
    %cst_77 = arith.constant 0.693147182 : f32
    %120 = vector.broadcast %cst_77 : f32 to vector<16x128xf32>
    %121 = arith.subf %119, %120 : vector<16x128xf32>
    %122 = arith.truncf %121 : vector<16x128xf32> to vector<16x128xbf16>
    %cst_78 = arith.constant dense<0.000000e+00> : vector<16x128xf32>
    %123 = tpu.matmul %122, %76, %cst_78 {dimension_numbers = #tpu.dot_dimension_numbers<[1], [0], [0], [1], [0, 0, 1, 1], [], []>} : vector<16x128xbf16>, vector<128x128xbf16>, vector<16x128xf32> -> vector<16x128xf32>
    %124 = vector.broadcast %82 : vector<1x128xf32> to vector<16x128xf32>
    %125 = arith.addf %123, %124 : vector<16x128xf32>
    %126 = arith.addf %66, %125 : vector<16x128xf32>
    %c2_79 = arith.constant 2 : index
    %c0_80 = arith.constant 0 : index
    %c0_81 = arith.constant 0 : index
    %127 = vector.load %arg4[%c2_79, %c0_80, %c0_81] : memref<3x544x128xbf16, #tpu.memory_space<vmem>>, vector<1x32x128xbf16>
    %128 = vector.shape_cast %127 : vector<1x32x128xbf16> to vector<32x128xbf16>
    %c2_82 = arith.constant 2 : index
    %c32_83 = arith.constant 32 : index
    %c0_84 = arith.constant 0 : index
    %129 = vector.load %arg4[%c2_82, %c32_83, %c0_84] : memref<3x544x128xbf16, #tpu.memory_space<vmem>>, vector<1x128x128xbf16>
    %130 = vector.shape_cast %129 : vector<1x128x128xbf16> to vector<128x128xbf16>
    %c2_85 = arith.constant 2 : index
    %c160_86 = arith.constant 160 : index
    %c0_87 = arith.constant 0 : index
    %131 = vector.load %arg4[%c2_85, %c160_86, %c0_87] : memref<3x544x128xbf16, #tpu.memory_space<vmem>>, vector<1x128x128xbf16>
    %132 = vector.shape_cast %131 : vector<1x128x128xbf16> to vector<128x128xbf16>
    %c2_88 = arith.constant 2 : index
    %c288_89 = arith.constant 288 : index
    %c0_90 = arith.constant 0 : index
    %133 = vector.load %arg4[%c2_88, %c288_89, %c0_90] : memref<3x544x128xbf16, #tpu.memory_space<vmem>>, vector<1x128x128xbf16>
    %134 = vector.shape_cast %133 : vector<1x128x128xbf16> to vector<128x128xbf16>
    %c2_91 = arith.constant 2 : index
    %c416_92 = arith.constant 416 : index
    %c0_93 = arith.constant 0 : index
    %135 = vector.load %arg4[%c2_91, %c416_92, %c0_93] : memref<3x544x128xbf16, #tpu.memory_space<vmem>>, vector<1x128x128xbf16>
    %136 = vector.shape_cast %135 : vector<1x128x128xbf16> to vector<128x128xbf16>
    %c2_94 = arith.constant 2 : index
    %c0_95 = arith.constant 0 : index
    %c0_96 = arith.constant 0 : index
    %137 = vector.load %arg5[%c2_94, %c0_95, %c0_96] : memref<3x8x128xf32, #tpu.memory_space<vmem>>, vector<1x1x128xf32>
    %138 = vector.shape_cast %137 : vector<1x1x128xf32> to vector<1x128xf32>
    %c2_97 = arith.constant 2 : index
    %c1_98 = arith.constant 1 : index
    %c0_99 = arith.constant 0 : index
    %139 = vector.load %arg5[%c2_97, %c1_98, %c0_99] : memref<3x8x128xf32, #tpu.memory_space<vmem>>, vector<1x1x128xf32>
    %140 = vector.shape_cast %139 : vector<1x1x128xf32> to vector<1x128xf32>
    %c2_100 = arith.constant 2 : index
    %c2_101 = arith.constant 2 : index
    %c0_102 = arith.constant 0 : index
    %141 = vector.load %arg5[%c2_100, %c2_101, %c0_102] : memref<3x8x128xf32, #tpu.memory_space<vmem>>, vector<1x1x128xf32>
    %142 = vector.shape_cast %141 : vector<1x1x128xf32> to vector<1x128xf32>
    %cst_103 = arith.constant dense<0.000000e+00> : vector<128x128xf32>
    %143 = tpu.matmul %4, %128, %cst_103 {dimension_numbers = #tpu.dot_dimension_numbers<[1], [0], [0], [1], [0, 0, 1, 1], [], []>} : vector<128x32xbf16>, vector<32x128xbf16>, vector<128x128xf32> -> vector<128x128xf32>
    %cst_104 = arith.constant 0.000000e+00 : f32
    %144 = vector.broadcast %cst_104 : f32 to vector<128x128xf32>
    %145 = arith.maximumf %143, %144 : vector<128x128xf32>
    %146 = math.absf %143 : vector<128x128xf32>
    %cst_105 = arith.constant 0.000000e+00 : f32
    %147 = vector.broadcast %cst_105 : f32 to vector<128x128xf32>
    %148 = arith.subf %147, %146 : vector<128x128xf32>
    %149 = math.exp %148 : vector<128x128xf32>
    %cst_106 = arith.constant 1.000000e+00 : f32
    %150 = vector.broadcast %cst_106 : f32 to vector<128x128xf32>
    %151 = arith.addf %150, %149 : vector<128x128xf32>
    %152 = math.log %151 : vector<128x128xf32>
    %153 = arith.addf %145, %152 : vector<128x128xf32>
    %cst_107 = arith.constant 0.693147182 : f32
    %154 = vector.broadcast %cst_107 : f32 to vector<128x128xf32>
    %155 = arith.subf %153, %154 : vector<128x128xf32>
    %156 = arith.truncf %155 : vector<128x128xf32> to vector<128x128xbf16>
    %cst_108 = arith.constant dense<0.000000e+00> : vector<128x128xf32>
    %157 = tpu.matmul %156, %130, %cst_108 {dimension_numbers = #tpu.dot_dimension_numbers<[1], [0], [0], [1], [0, 0, 1, 1], [], []>} : vector<128x128xbf16>, vector<128x128xbf16>, vector<128x128xf32> -> vector<128x128xf32>
    %158 = vector.broadcast %138 : vector<1x128xf32> to vector<128x128xf32>
    %159 = arith.addf %157, %158 : vector<128x128xf32>
    %160 = arith.truncf %126 : vector<16x128xf32> to vector<16x128xbf16>
    %cst_109 = arith.constant dense<0.000000e+00> : vector<16x128xf32>
    %161 = tpu.matmul %160, %132, %cst_109 {dimension_numbers = #tpu.dot_dimension_numbers<[1], [0], [0], [1], [0, 0, 1, 1], [], []>} : vector<16x128xbf16>, vector<128x128xbf16>, vector<16x128xf32> -> vector<16x128xf32>
    %cst_110 = arith.constant dense<0.000000e+00> : vector<128x128xf32>
    %162 = tpu.matmul %6, %161, %cst_110 {dimension_numbers = #tpu.dot_dimension_numbers<[1], [0], [0], [1], [0, 0, 1, 1], [], []>} : vector<128x16xf32>, vector<16x128xf32>, vector<128x128xf32> -> vector<128x128xf32>
    %163 = arith.mulf %162, %159 : vector<128x128xf32>
    %164 = vector.shape_cast %163 : vector<128x128xf32> to vector<16x8x128xf32>
    %cst_111 = arith.constant dense<0.000000e+00> : vector<16x128xf32>
    %165 = vector.multi_reduction <add>, %164, %cst_111 [1] : vector<16x8x128xf32> to vector<16x128xf32>
    %166 = arith.truncf %165 : vector<16x128xf32> to vector<16x128xbf16>
    %cst_112 = arith.constant dense<0.000000e+00> : vector<16x128xf32>
    %167 = tpu.matmul %166, %134, %cst_112 {dimension_numbers = #tpu.dot_dimension_numbers<[1], [0], [0], [1], [0, 0, 1, 1], [], []>} : vector<16x128xbf16>, vector<128x128xbf16>, vector<16x128xf32> -> vector<16x128xf32>
    %168 = vector.broadcast %140 : vector<1x128xf32> to vector<16x128xf32>
    %169 = arith.addf %167, %168 : vector<16x128xf32>
    %cst_113 = arith.constant 0.000000e+00 : f32
    %170 = vector.broadcast %cst_113 : f32 to vector<16x128xf32>
    %171 = arith.maximumf %169, %170 : vector<16x128xf32>
    %172 = math.absf %169 : vector<16x128xf32>
    %cst_114 = arith.constant 0.000000e+00 : f32
    %173 = vector.broadcast %cst_114 : f32 to vector<16x128xf32>
    %174 = arith.subf %173, %172 : vector<16x128xf32>
    %175 = math.exp %174 : vector<16x128xf32>
    %cst_115 = arith.constant 1.000000e+00 : f32
    %176 = vector.broadcast %cst_115 : f32 to vector<16x128xf32>
    %177 = arith.addf %176, %175 : vector<16x128xf32>
    %178 = math.log %177 : vector<16x128xf32>
    %179 = arith.addf %171, %178 : vector<16x128xf32>
    %cst_116 = arith.constant 0.693147182 : f32
    %180 = vector.broadcast %cst_116 : f32 to vector<16x128xf32>
    %181 = arith.subf %179, %180 : vector<16x128xf32>
    %182 = arith.truncf %181 : vector<16x128xf32> to vector<16x128xbf16>
    %cst_117 = arith.constant dense<0.000000e+00> : vector<16x128xf32>
    %183 = tpu.matmul %182, %136, %cst_117 {dimension_numbers = #tpu.dot_dimension_numbers<[1], [0], [0], [1], [0, 0, 1, 1], [], []>} : vector<16x128xbf16>, vector<128x128xbf16>, vector<16x128xf32> -> vector<16x128xf32>
    %184 = vector.broadcast %142 : vector<1x128xf32> to vector<16x128xf32>
    %185 = arith.addf %183, %184 : vector<16x128xf32>
    %186 = arith.addf %126, %185 : vector<16x128xf32>
    %187 = vector.shape_cast %186 : vector<16x128xf32> to vector<2x8x128xf32>
    %c0_118 = arith.constant 0 : index
    %c0_119 = arith.constant 0 : index
    %c0_120 = arith.constant 0 : index
    %188 = vector.load %arg6[%c0_118, %c0_119, %c0_120] : memref<2x8x128xf32, #tpu.memory_space<vmem>>, vector<2x8x128xf32>
    tpu.vector_store %arg6[%c0_118, %c0_119, %c0_120], %187 {strides = array<i32>} : memref<2x8x128xf32, #tpu.memory_space<vmem>>, vector<2x8x128xf32>,
    return
  }
  func.func @transform_0(%arg0: i32) -> (i32, i32, i32) {
    %c0_i32 = arith.constant 0 : i32
    %c0_i32_0 = arith.constant 0 : i32
    %c0_i32_1 = arith.constant 0 : i32
    return %arg0, %c0_i32, %c0_i32_0 : i32, i32, i32
  }
  func.func @transform_1(%arg0: i32) -> (i32, i32, i32) {
    %c0_i32 = arith.constant 0 : i32
    %c0_i32_0 = arith.constant 0 : i32
    %c0_i32_1 = arith.constant 0 : i32
    return %arg0, %c0_i32, %c0_i32_0 : i32, i32, i32
  }
  func.func @transform_2(%arg0: i32) -> (i32, i32, i32) {
    %c0_i32 = arith.constant 0 : i32
    %c0_i32_0 = arith.constant 0 : i32
    %c0_i32_1 = arith.constant 0 : i32
    return %arg0, %c0_i32, %c0_i32_0 : i32, i32, i32
  }
  func.func @transform_3(%arg0: i32) -> (i32, i32, i32) {
    %c0_i32 = arith.constant 0 : i32
    %c0_i32_0 = arith.constant 0 : i32
    %c0_i32_1 = arith.constant 0 : i32
    %c0_i32_2 = arith.constant 0 : i32
    return %c0_i32, %c0_i32_0, %c0_i32_1 : i32, i32, i32
  }
  func.func @transform_4(%arg0: i32) -> (i32, i32, i32) {
    %c0_i32 = arith.constant 0 : i32
    %c0_i32_0 = arith.constant 0 : i32
    %c0_i32_1 = arith.constant 0 : i32
    %c0_i32_2 = arith.constant 0 : i32
    return %c0_i32, %c0_i32_0, %c0_i32_1 : i32, i32, i32
  }
  func.func @transform_5(%arg0: i32) -> (i32, i32, i32) {
    %c0_i32 = arith.constant 0 : i32
    %c0_i32_0 = arith.constant 0 : i32
    %c0_i32_1 = arith.constant 0 : i32
    return %arg0, %c0_i32, %c0_i32_0 : i32, i32, i32
  }
}

</mosaic_0001>

<bundles_post_ra>
// kernel: tpu_custom_call.1
= control target key start
LH: loop header
LB: loop body
LE: loop exit
PB: predicated region body
PF: predicated region fallthrough
CT: control target
= control target key end

     0   :  { %10 = vsyncpa [#allocation3], 0  ;;  %s5746_s0 = inlined_call_operand.vmem [shape: f32[2,8,128], index: 0, kind: input, shape index: {}]   ;;  %s5747_s1 = inlined_call_operand.vmem [shape: f32[2,64,32], index: 1, kind: input, shape index: {}]   ;;  %s5748_s2 = inlined_call_operand.vmem [shape: f32[1,128,16], index: 2, kind: input, shape index: {}]   ;;  %s5749_s3 = inlined_call_operand.hbm [shape: bf16[3,544,128], index: 3, kind: input, shape index: {}]   ;;  %s5750_s4 = inlined_call_operand.vmem [shape: f32[3,8,128], index: 4, kind: input, shape index: {}]   ;;  %s5751_s5 = inlined_call_operand.hbm [shape: f32[2,8,128], index: 5, kind: output, shape index: {}]  }
   0x1   :  { %11 = vsyncpa [#allocation4], 0  ;;  %s4829_s18 = smov [#allocation2]   ;;  %s4781_s22 = scalar_lea.hbm %s5749_s3, 13056 }
   0x2   :  { %s23_s19 = sshll.u32 %s4829_s18, 4  ;;  %p4782_p0 = scmp.ne.s32.totalorder %s5749_s3, %s4781_s22  ;;  %s24_s19 = int_to_ptr.vmem [resolvable:$true] %s23_s19 }
   0x3   :  { %p4785_p1 = scmp.lt.u32.totalorder %s4781_s22, %s5749_s3 }
   0x5   :  { %p4787_p2 = pnand %p4785_p1, %p4782_p0 }
   0x7   :  { %4790 = shalt.err (!%p4787_p2)
}
   0x8   :  { %s4791_s27 = scalar_lea.vmem %s24_s19, 13056  ;;  %p4796_p4 = scmp.lt.s32.totalorder %s24_s19, %s24_s19 }
   0x9   :  { %p4792_p3 = scmp.ne.s32.totalorder %s24_s19, %s4791_s27  ;;  %p4797_p5 = scmp.lt.s32.totalorder %s4791_s27, %s4791_s27 }
   0xb   :  { %p4798_p6 = por %p4797_p5, %p4796_p4 }
   0xd   :  { %p4799_p7 = pnand %p4798_p6, %p4792_p3 }
   0xf   :  { %4802 = shalt.err (!%p4799_p7)
}
  0x10   :  { %s4830_s28 = smov 64   ;;  %s4831_s29 = smov 4  }
  0x11   :  { %29 = dma.hbm_to_vmem [thread:$0]  %s5749_s3, 13056, %s24_s19, [#allocation3], %s4830_s28, %s4830_s28, %s4831_s29  }
  0x12   :  { %4825 = dma.done.wait [#allocation3], 13056  }
  0x13   :  { %4826 = vsyncadd [#allocation3], 4294954240  ;;  %v4832_v0 = vmov 0.0   ;;  %vm4833_vm0 = vmmov 0   ;;  %v4429_v1 = vld [vmem:[#allocation2] sm:$0xff]   ;;  %v4430_v2 = vld [vmem:[#allocation2 + $0x8] sm:$0xff]  }
  0x14   :  { %4041 = vmatprep.subr.bf16.mxu0 %v4832_v0  ;;  %4057 = vmatprep.mubr.msk.bf16.mxu0 %vm4833_vm0, %v4832_v0  ;;  %v38_v3 = vld [vmem:[%s5747_s1] sm:$0xff]  ;;  %v39_v4 = vld [vmem:[%s5747_s1 + $0x8] sm:$0xff]  ;;  %vm161_vm1 = vcmask 261120   ;;  %v40_v5 = vld [vmem:[%s5747_s1 + $0x10] sm:$0xff]  ;;  %vm690_vm2 = vcmask 130048   ;;  %vm1048_vm3 = vcmask 1041409  }
  0x15   :  { %3989 = vmatprep.subr.bf16.mxu1 %v4429_v1  ;;  %v4891_v6 = vpack.c.bf16 %v39_v4, %v38_v3  ;;  %v41_v7 = vld [vmem:[%s5747_s1 + $0x18] sm:$0xff]  ;;  %v4431_v8 = vld [vmem:[#allocation2 + $0x50] sm:$0xff]   ;;  %v42_v9 = vld [vmem:[%s5747_s1 + $0x20] sm:$0xff]  ;;  %vm1050_vm4 = vcmask 1042434   ;;  %vm1052_vm5 = vcmask 1043459   ;;  %vm1054_vm6 = vcmask 1044484  }
  0x16   :  { %3990 = vmatpush3.bf16.msra.mxu1 %v4429_v1  ;;  %v43_v10 = vld [vmem:[%s5747_s1 + $0x28] sm:$0xff]  ;;  %v4904_v11 = vpack.c.bf16 %v41_v7, %v40_v5  ;;  %4042 = vmatpush3.bf16.msra.mxu0 %v4431_v8  ;;  %v4432_v12 = vld [vmem:[#allocation2 + $0x58] sm:$0xff]   ;;  %v44_v14 = vld [vmem:[%s5747_s1 + $0x30] sm:$0xff]  ;;  %vm1056_vm7 = vcmask 1045509   ;;  %vm1058_vm8 = vcmask 1046534   ;;  %vm1060_vm9 = vcmask 1047559  }
  0x17   :  { %3991 = vmatprep.subr.bf16.mxu1 %v4430_v2  ;;  %3993 = vmatprep.mubr.msk.bf16.mxu1 %vm161_vm1, %v4891_v6  ;;  %v4907_v13 = vpack.c.bf16 %v43_v10, %v42_v9  ;;  %v4433_v15 = vld [vmem:[#allocation2 + $0x60] sm:$0xff]   ;;  %v45_v16 = vld [vmem:[%s5747_s1 + $0x38] sm:$0xff]  ;;  %v47_v18 = vld [vmem:[%s5747_s1 + $0x48] sm:$0xff]  ;;  %s4834_s21 = smov [#allocation5]  }
  0x18   :  { %4043 = vmatprep.subr.bf16.mxu0 %v4832_v0  ;;  %v46_v17 = vld [vmem:[%s5747_s1 + $0x40] sm:$0xff]  ;;  %v4926_v19 = vpack.c.bf16 %v45_v16, %v44_v14  ;;  %v4434_v20 = vld [vmem:[#allocation2 + $0x68] sm:$0xff]   ;;  %v4435_v22 = vld [vmem:[#allocation2 + $0x70] sm:$0xff]   ;;  %s3521_s22 = sshll.u32 %s4834_s21, 4  ;;  %s3522_s22 = int_to_ptr.vmem [resolvable:$true] %s3521_s22 }
  0x19   :  { %v4929_v21 = vpack.c.bf16 %v47_v18, %v46_v17  ;;  %v48_v23 = vld [vmem:[%s5747_s1 + $0x50] sm:$0xff]  ;;  %v49_v24 = vld [vmem:[%s5747_s1 + $0x58] sm:$0xff]  ;;  %v50_v25 = vld [vmem:[%s5747_s1 + $0x60] sm:$0xff]  ;;  %s4803_s23 = scalar_lea.vmem %s3522_s22, 256  ;;  %p4808_p9 = scmp.lt.s32.totalorder %s3522_s22, %s3522_s22 }
  0x1a   :  { %3992 = vmatpush3.bf16.msra.mxu1 %v4430_v2  ;;  %4044 = vmatpush3.bf16.msra.mxu0 %v4432_v12  ;;  %v51_v26 = vld [vmem:[%s5747_s1 + $0x68] sm:$0xff]  ;;  %v4436_v27 = vld [vmem:[#allocation2 + $0x78] sm:$0xff]   ;;  %v4948_v28 = vpack.c.bf16 %v49_v24, %v48_v23  ;;  %v4437_v30 = vld [vmem:[#allocation2 + $0x80] sm:$0xff]   ;;  %p4804_p8 = scmp.ne.s32.totalorder %s3522_s22, %s4803_s23  ;;  %p4809_p10 = scmp.lt.s32.totalorder %s4803_s23, %s4803_s23 }
  0x1b   :  { %4045 = vmatprep.subr.bf16.mxu0 %v4832_v0  ;;  %v4951_v29 = vpack.c.bf16 %v51_v26, %v50_v25  ;;  %v52_v31 = vld [vmem:[%s5747_s1 + $0x70] sm:$0xff]  ;;  %v53_v32 = vld [vmem:[%s5747_s1 + $0x78] sm:$0xff]  ;;  %v4438_v33 = vld [vmem:[#allocation2 + $0x88] sm:$0xff]  }
  0x1c   :  { %v36_v34 = vld [vmem:[%s5746_s0] sm:$0xff]  ;;  %v37_v35 = vld [vmem:[%s5746_s0 + $0x8] sm:$0xff]  ;;  %v4970_v36 = vpack.c.bf16 %v53_v32, %v52_v31  ;;  %v4439_v38 = vld [vmem:[#allocation2 + $0x10] sm:$0xff]   ;;  %p4810_p11 = por %p4809_p10, %p4808_p9 }
  0x1d   :  { %3994 = vmatmul.mubr.msk.bf16.vlgmr.msra.gmra.mrb[0].mxu1 %vm161_vm1, %v4904_v11  ;;  %v600_v37 = vpack.c.bf16 %v37_v35, %v36_v34  ;;  %4009 = vmatprep.subr.bf16.mxu1 %v4439_v38  ;;  %v4440_v39 = vld [vmem:[#allocation2 + $0x18] sm:$0xff]   ;;  %v4441_v40 = vld [vmem:[#allocation2 + $0x20] sm:$0xff]   ;;  %v4442_v41 = vld [vmem:[#allocation2 + $0x28] sm:$0xff]  }
  0x1e   :  { %3997 = vmatprep.mubr.msk.bf16.mxu1 %vm161_vm1, %v4907_v13  ;;  %4046 = vmatpush3.bf16.msra.mxu0 %v4433_v15  ;;  %v4443_v42 = vld [vmem:[#allocation2 + $0x30] sm:$0xff]   ;;  %v4444_v43 = vld [vmem:[#allocation2 + $0x38] sm:$0xff]   ;;  %v4445_v44 = vld [vmem:[#allocation2 + $0x40] sm:$0xff]   ;;  %p4811_p12 = pnand %p4810_p11, %p4804_p8 }
  0x1f   :  { %4047 = vmatprep.subr.bf16.mxu0 %v4832_v0  ;;  %4010 = vmatpush3.bf16.msra.mxu1 %v4439_v38  ;;  %v4446_v45 = vld [vmem:[#allocation2 + $0x48] sm:$0xff]   ;;  %v62_v46 = vld [vmem:[%s5748_s2] sm:$0xff] }
  0x20   :  { %4011 = vmatprep.subr.bf16.mxu1 %v4440_v39 }
  0x22   :  { %4048 = vmatpush3.bf16.msra.mxu0 %v4434_v20 }
  0x23   :  { %4049 = vmatprep.subr.bf16.mxu0 %v4832_v0  ;;  %4012 = vmatpush3.bf16.msra.mxu1 %v4440_v39 }
  0x24   :  { %4013 = vmatprep.subr.bf16.mxu1 %v4441_v40 }
  0x25   :  { %3998 = vmatmul.mubr.msk.bf16.gmra.mrb[4].mxu1 %vm161_vm1, %v4926_v19 }
  0x26   :  { %4001 = vmatprep.mubr.msk.bf16.mxu1 %vm161_vm1, %v4929_v21  ;;  %4050 = vmatpush3.bf16.msra.mxu0 %v4435_v22 }
  0x27   :  { %4051 = vmatprep.subr.bf16.mxu0 %v4832_v0  ;;  %4014 = vmatpush3.bf16.msra.mxu1 %v4441_v40 }
  0x28   :  { %4015 = vmatprep.subr.bf16.mxu1 %v4442_v41 }
  0x2a   :  { %4052 = vmatpush3.bf16.msra.mxu0 %v4436_v27 }
  0x2b   :  { %4053 = vmatprep.subr.bf16.mxu0 %v4832_v0  ;;  %4016 = vmatpush3.bf16.msra.mxu1 %v4442_v41 }
  0x2c   :  { %4017 = vmatprep.subr.bf16.mxu1 %v4443_v42 }
  0x2d   :  { %4002 = vmatmul.mubr.msk.bf16.gmra.mrb[8].mxu1 %vm161_vm1, %v4948_v28 }
  0x2e   :  { %4005 = vmatprep.mubr.msk.bf16.mxu1 %vm161_vm1, %v4951_v29  ;;  %4054 = vmatpush3.bf16.msra.mxu0 %v4437_v30 }
  0x2f   :  { %4055 = vmatprep.subr.bf16.mxu0 %v4832_v0  ;;  %4018 = vmatpush3.bf16.msra.mxu1 %v4443_v42 }
  0x30   :  { %4019 = vmatprep.subr.bf16.mxu1 %v4444_v43 }
  0x32   :  { %4056 = vmatpush3.bf16.msra.mxu0 %v4438_v33 }
  0x33   :  { %4020 = vmatpush3.bf16.msra.mxu1 %v4444_v43 }
  0x34   :  { %4021 = vmatprep.subr.bf16.mxu1 %v4445_v44 }
  0x35   :  { %4006 = vmatmul.mubr.msk.bf16.gmra.mrb[12].mxu1 %vm161_vm1, %v4970_v36  ;;  %4058 = vmatmul.mubr.bf16.vlgmr.msra.gmra.mrb[0].mxu0 %v600_v37 }
  0x36   :  { %4065 = vmatprep.mubr.msk.f32.mxu0 %vm690_vm2, %v62_v46 }
  0x37   :  { %4022 = vmatpush3.bf16.msra.mxu1 %v4445_v44 }
  0x38   :  { %4023 = vmatprep.subr.bf16.mxu1 %v4446_v45 }
  0x3b   :  { %4024 = vmatpush3.bf16.msra.mxu1 %v4446_v45 }
  0x3c   :  { %4089 = vmatprep.subr.bf16.mxu1 %v4832_v0 }
  0xf0   :  { %v4980_v47 = vpop.f32.mrb[0].mxu1 }
  0xf1   :  { %v301_v48 = vand.u32 2147483647, %v4980_v47  ;;  %v4983_v49 = vpop.f32.mrb[1].mxu1 }
  0xf2   :  { %v299_v50 = vand.u32 2147483647, %v4983_v49  ;;  %v4986_v51 = vpop.f32.mrb[2].mxu1 }
  0xf3   :  { %v317_v52 = vsub.f32 0.0, %v301_v48  ;;  %v302_v53 = vand.u32 2147483647, %v4986_v51  ;;  %v4989_v54 = vpop.f32.mrb[3].mxu1 }
  0xf4   :  { %v315_v55 = vsub.f32 0.0, %v299_v50  ;;  %v300_v56 = vand.u32 2147483647, %v4989_v54 }
  0xf5   :  { %v335_v57 = vmul.f32 1.442695, %v317_v52  ;;  %v318_v58 = vsub.f32 0.0, %v302_v53 }
  0xf6   :  { %v331_v59 = vmul.f32 1.442695, %v315_v55  ;;  %v316_v60 = vsub.f32 0.0, %v300_v56  ;;  %v285_v56 = vmax.f32 %v4980_v47, 0.0 }
  0xf7   :  { %4531 = vpow2.f32 %v335_v57  ;;  %v337_v61 = vmul.f32 1.442695, %v318_v58 }
  0xf8   :  { %4533 = vpow2.f32 %v331_v59  ;;  %v333_v62 = vmul.f32 1.442695, %v316_v60  ;;  %v4992_v63 = vpop.f32.mrb[4].mxu1  ;;  %v283_v60 = vmax.f32 %v4983_v49, 0.0  ;;  %v286_v49 = vmax.f32 %v4986_v51, 0.0 }
  0xf9   :  { %4535 = vpow2.f32 %v337_v61  ;;  %v305_v1 = vand.u32 2147483647, %v4992_v63  ;;  %v4995_v2 = vpop.f32.mrb[5].mxu1  ;;  %v284_v51 = vmax.f32 %v4989_v54, 0.0  ;;  %v64_v54 = vld [vmem:[%s5748_s2 + $0x10] sm:$0xff] }
  0xfa   :  { %4537 = vpow2.f32 %v333_v62  ;;  %v303_v3 = vand.u32 2147483647, %v4995_v2  ;;  %v4998_v4 = vpop.f32.mrb[6].mxu1 }
  0xfb   :  { %v321_v5 = vsub.f32 0.0, %v305_v1  ;;  %v306_v7 = vand.u32 2147483647, %v4998_v4  ;;  %v5001_v8 = vpop.f32.mrb[7].mxu1 }
  0xfc   :  { %v319_v9 = vsub.f32 0.0, %v303_v3  ;;  %v304_v10 = vand.u32 2147483647, %v5001_v8 }
  0xfd   :  { %v343_v12 = vmul.f32 1.442695, %v321_v5  ;;  %v322_v14 = vsub.f32 0.0, %v306_v7 }
  0xfe   :  { %v339_v15 = vmul.f32 1.442695, %v319_v9  ;;  %v320_v16 = vsub.f32 0.0, %v304_v10 }
  0xff   :  { %4539 = vpow2.f32 %v343_v12  ;;  %v345_v17 = vmul.f32 1.442695, %v322_v14 }
 0x100   :  { %4541 = vpow2.f32 %v339_v15  ;;  %v341_v18 = vmul.f32 1.442695, %v320_v16  ;;  %v5004_v20 = vpop.f32.mrb[8].mxu1 }
 0x101   :  { %v4532_v22 = vpop.eup %4531  ;;  %4543 = vpow2.f32 %v345_v17  ;;  %v309_v23 = vand.u32 2147483647, %v5004_v20  ;;  %v5007_v24 = vpop.f32.mrb[9].mxu1 }
 0x102   :  { %v4534_v25 = vpop.eup %4533  ;;  %v365_v26 = vadd.f32 1.0, %v4532_v22  ;;  %4545 = vpow2.f32 %v341_v18  ;;  %v307_v27 = vand.u32 2147483647, %v5007_v24  ;;  %v5010_v30 = vpop.f32.mrb[10].mxu1 }
 0x103   :  { %v4536_v31 = vpop.eup %4535  ;;  %v363_v32 = vadd.f32 1.0, %v4534_v25  ;;  %v325_v33 = vsub.f32 0.0, %v309_v23  ;;  %v310_v34 = vand.u32 2147483647, %v5010_v30  ;;  %v5013_v35 = vpop.f32.mrb[11].mxu1 }
 0x104   :  { %v4538_v37 = vpop.eup %4537  ;;  %4547 = vlog2.f32 %v365_v26  ;;  %v366_v38 = vadd.f32 1.0, %v4536_v31  ;;  %v323_v39 = vsub.f32 0.0, %v307_v27  ;;  %v308_v44 = vand.u32 2147483647, %v5013_v35 }
 0x105   :  { %4549 = vlog2.f32 %v363_v32  ;;  %v364_v40 = vadd.f32 1.0, %v4538_v37  ;;  %v351_v41 = vmul.f32 1.442695, %v325_v33  ;;  %v326_v42 = vsub.f32 0.0, %v310_v34 }
 0x106   :  { %4551 = vlog2.f32 %v366_v38  ;;  %v347_v43 = vmul.f32 1.442695, %v323_v39  ;;  %v324_v46 = vsub.f32 0.0, %v308_v44 }
 0x107   :  { %4553 = vlog2.f32 %v364_v40  ;;  %v353_v45 = vmul.f32 1.442695, %v326_v42 }
 0x108   :  { %4555 = vpow2.f32 %v351_v41  ;;  %v5016_v48 = vpop.f32.mrb[12].mxu1  ;;  %v349_v9 = vmul.f32 1.442695, %v324_v46  ;;  %v683_v47 = vpop.f32.mrb[0].mxu0  ;;  %v63_v46 = vld [vmem:[%s5748_s2 + $0x8] sm:$0xff] }
 0x109   :  { %v4540_v50 = vpop.eup %4539  ;;  %4557 = vpow2.f32 %v347_v43  ;;  %v313_v52 = vand.u32 2147483647, %v5016_v48  ;;  %v5019_v53 = vpop.f32.mrb[13].mxu1 }
 0x10a   :  { %v4542_v55 = vpop.eup %4541  ;;  %v369_v57 = vadd.f32 1.0, %v4540_v50  ;;  %4559 = vpow2.f32 %v353_v45  ;;  %v5022_v58 = vpop.f32.mrb[14].mxu1  ;;  %v311_v1 = vand.u32 2147483647, %v5019_v53 }
 0x10b   :  { %v4544_v59 = vpop.eup %4543  ;;  %v367_v61 = vadd.f32 1.0, %v4542_v55  ;;  %v329_v62 = vsub.f32 0.0, %v313_v52  ;;  %v5026_v3 = vpop.f32.mrb[15].mxu1  ;;  %v314_v10 = vand.u32 2147483647, %v5022_v58 }
 0x10c   :  { %v4546_v5 = vpop.eup %4545  ;;  %4561 = vlog2.f32 %v369_v57  ;;  %v370_v7 = vadd.f32 1.0, %v4544_v59  ;;  %v327_v15 = vsub.f32 0.0, %v311_v1  ;;  %v4059_v16 = vpop.f32.mrb[1].mxu0  ;;  %v312_v22 = vand.u32 2147483647, %v5026_v3 }
 0x10d   :  { %4563 = vlog2.f32 %v367_v61  ;;  %v368_v12 = vadd.f32 1.0, %v4546_v5  ;;  %v359_v14 = vmul.f32 1.442695, %v329_v62  ;;  %v330_v18 = vsub.f32 0.0, %v314_v10  ;;  %v686_v23 = vpop.f32.mrb[2].mxu0 }
 0x10e   :  { %v4548_v17 = vpop.eup %4547  ;;  %4565 = vlog2.f32 %v370_v7  ;;  %v355_v27 = vmul.f32 1.442695, %v327_v15  ;;  %v4409_v31 = vpack.c.bf16 %v686_v23, %v683_v47  ;;  %v4060_v32 = vpop.f32.mrb[3].mxu0  ;;  %v328_v38 = vsub.f32 0.0, %v312_v22  ;;  %v66_v15 = vld [vmem:[%s5748_s2 + $0x20] sm:$0xff] }
 0x10f   :  { %v4550_v25 = vpop.eup %4549  ;;  %v384_v26 = vmul.f32 0.6931472, %v4548_v17  ;;  %4567 = vlog2.f32 %v368_v12  ;;  %v361_v37 = vmul.f32 1.442695, %v330_v18  ;;  %v289_v12 = vmax.f32 %v4992_v63, 0.0 }
 0x110   :  { %v4552_v33 = vpop.eup %4551  ;;  %v380_v34 = vmul.f32 0.6931472, %v4550_v25  ;;  %4569 = vpow2.f32 %v349_v9  ;;  %4410 = vmatprep.subr.bf16.mxu0 %v4409_v31  ;;  %v357_v45 = vmul.f32 1.442695, %v328_v38  ;;  %v65_v9 = vld [vmem:[%s5748_s2 + $0x18] sm:$0xff]  ;;  %v287_v17 = vmax.f32 %v4995_v2, 0.0 }
 0x111   :  { %v4554_v39 = vpop.eup %4553  ;;  %v413_v40 = vadd.f32 %v384_v26, %v285_v56  ;;  %v386_v41 = vmul.f32 0.6931472, %v4552_v33  ;;  %4571 = vpow2.f32 %v359_v14  ;;  %4412 = vmatpush3.bf16.msra.mxu0 %v4409_v31  ;;  %v290_v25 = vmax.f32 %v4998_v4, 0.0  ;;  %v67_v2 = vld [vmem:[%s5748_s2 + $0x28] sm:$0xff]  ;;  %v68_v4 = vld [vmem:[%s5748_s2 + $0x30] sm:$0xff] }
 0x112   :  { %v4556_v42 = vpop.eup %4555  ;;  %v411_v43 = vadd.f32 %v380_v34, %v283_v60  ;;  %v382_v44 = vmul.f32 0.6931472, %v4554_v39  ;;  %4573 = vpow2.f32 %v355_v27  ;;  %4109 = vmatprep.subr.bf16.mxu0 %v4832_v0  ;;  %v288_v31 = vmax.f32 %v5001_v8, 0.0 }
 0x113   :  { %v4558_v50 = vpop.eup %4557  ;;  %v414_v52 = vadd.f32 %v386_v41, %v286_v49  ;;  %v373_v55 = vadd.f32 1.0, %v4556_v42  ;;  %4575 = vpow2.f32 %v361_v37  ;;  %v3545_v60 = vadd.f32 -0.6931472, %v413_v40 }
 0x114   :  { %v4560_v56 = vpop.eup %4559  ;;  %v412_v57 = vadd.f32 %v382_v44, %v284_v51  ;;  %v371_v59 = vadd.f32 1.0, %v4558_v50  ;;  %4577 = vpow2.f32 %v357_v45  ;;  %4066 = vmatmul.mubr.msk.f32.vlgmr.msra.gmra.mrb[4].mxu0 %vm690_vm2, %v63_v46  ;;  %v3543_v5 = vadd.f32 -0.6931472, %v411_v43  ;;  %v69_v50 = vld [vmem:[%s5748_s2 + $0x38] sm:$0xff] }
 0x115   :  { %v3546_v61 = vadd.f32 -0.6931472, %v414_v52  ;;  %4579 = vlog2.f32 %v373_v55  ;;  %v374_v62 = vadd.f32 1.0, %v4560_v56  ;;  %4068 = vmatprep.mubr.msk.f32.mxu0 %vm690_vm2, %v64_v54  ;;  %v70_v56 = vld [vmem:[%s5748_s2 + $0x40] sm:$0xff] }
 0x116   :  { %v4562_v1 = vpop.eup %4561  ;;  %v3544_v7 = vadd.f32 -0.6931472, %v412_v57  ;;  %4581 = vlog2.f32 %v371_v59  ;;  %v293_v59 = vmax.f32 %v5004_v20, 0.0  ;;  %v72_v20 = vld [vmem:[%s5748_s2 + $0x50] sm:$0xff] }
 0x117   :  { %v4564_v10 = vpop.eup %4563  ;;  %v444_v47 = vpack.c.bf16 %v3546_v61, %v3545_v60  ;;  %v392_v14 = vmul.f32 0.6931472, %v4562_v1  ;;  %4583 = vlog2.f32 %v374_v62 }
 0x118   :  { %v4566_v16 = vpop.eup %4565  ;;  %v388_v49 = vmul.f32 0.6931472, %v4564_v10  ;;  %v443_v18 = vpack.c.bf16 %v3544_v7, %v3543_v5  ;;  %4069 = vmatmul.mubr.msk.f32.gmra.mrb[6].mxu0 %vm690_vm2, %v65_v9  ;;  %v294_v5 = vmax.f32 %v5010_v30, 0.0  ;;  %v71_v9 = vld [vmem:[%s5748_s2 + $0x48] sm:$0xff]  ;;  %v291_v30 = vmax.f32 %v5007_v24, 0.0 }
 0x119   :  { %v4568_v22 = vpop.eup %4567  ;;  %v417_v23 = vadd.f32 %v392_v14, %v289_v12  ;;  %v394_v26 = vmul.f32 0.6931472, %v4566_v16  ;;  %4071 = vmatprep.mubr.msk.f32.mxu0 %vm690_vm2, %v66_v15  ;;  %v73_v15 = vld [vmem:[%s5748_s2 + $0x58] sm:$0xff]  ;;  %v297_v24 = vmax.f32 %v5016_v48, 0.0  ;;  %v296_v48 = vmax.f32 %v5026_v3, 0.0 }
 0x11a   :  { %v4570_v27 = vpop.eup %4569  ;;  %v415_v63 = vadd.f32 %v388_v49, %v287_v17  ;;  %v390_v32 = vmul.f32 0.6931472, %v4568_v22  ;;  %4025 = vmatprep.mubr.bf16.mxu1 %v443_v18  ;;  %v74_v17 = vld [vmem:[%s5748_s2 + $0x60] sm:$0xff]  ;;  %v292_v22 = vmax.f32 %v5013_v35, 0.0 }
 0x11b   :  { %v4572_v33 = vpop.eup %4571  ;;  %v418_v34 = vadd.f32 %v394_v26, %v290_v25  ;;  %v372_v37 = vadd.f32 1.0, %v4570_v27  ;;  %4026 = vmatmul.mubr.bf16.vlgmr.msra.gmra.mrb[16].mxu1 %v444_v47  ;;  %v3549_v41 = vadd.f32 -0.6931472, %v417_v23 }
 0x11c   :  { %v4574_v38 = vpop.eup %4573  ;;  %v416_v39 = vadd.f32 %v390_v32, %v288_v31  ;;  %v377_v40 = vadd.f32 1.0, %v4572_v33  ;;  %4072 = vmatmul.mubr.msk.f32.gmra.mrb[8].mxu0 %vm690_vm2, %v67_v2  ;;  %v3547_v44 = vadd.f32 -0.6931472, %v415_v63  ;;  %v295_v32 = vmax.f32 %v5019_v53, 0.0  ;;  %v75_v33 = vld [vmem:[%s5748_s2 + $0x68] sm:$0xff] }
 0x11d   :  { %v4576_v8 = vpop.eup %4575  ;;  %v3550_v51 = vadd.f32 -0.6931472, %v418_v34  ;;  %4585 = vlog2.f32 %v372_v37  ;;  %v375_v42 = vadd.f32 1.0, %v4574_v38  ;;  %4074 = vmatprep.mubr.msk.f32.mxu0 %vm690_vm2, %v68_v4  ;;  %v298_v37 = vmax.f32 %v5022_v58, 0.0  ;;  %v76_v38 = vld [vmem:[%s5748_s2 + $0x70] sm:$0xff]  ;;  %v77_v58 = vld [vmem:[%s5748_s2 + $0x78] sm:$0xff] }
 0x11e   :  { %v4578_v43 = vpop.eup %4577  ;;  %v3548_v45 = vadd.f32 -0.6931472, %v416_v39  ;;  %4587 = vlog2.f32 %v377_v40  ;;  %v378_v46 = vadd.f32 1.0, %v4576_v8 }
 0x11f   :  { %v4580_v52 = vpop.eup %4579  ;;  %4589 = vlog2.f32 %v375_v42  ;;  %v376_v55 = vadd.f32 1.0, %v4578_v43  ;;  %v446_v54 = vpack.c.bf16 %v3550_v51, %v3549_v41 }
 0x120   :  { %v4582_v57 = vpop.eup %4581  ;;  %v400_v60 = vmul.f32 0.6931472, %v4580_v52  ;;  %4591 = vlog2.f32 %v378_v46  ;;  %v445_v61 = vpack.c.bf16 %v3548_v45, %v3547_v44  ;;  %4075 = vmatmul.mubr.msk.f32.gmra.mrb[10].mxu0 %vm690_vm2, %v69_v50  ;;  %v4447_v52 = vld [vmem:[#allocation2 + $0x90] sm:$0xff]  }
 0x121   :  { %v4584_v62 = vpop.eup %4583  ;;  %4593 = vlog2.f32 %v376_v55  ;;  %4077 = vmatprep.mubr.msk.f32.mxu0 %vm690_vm2, %v70_v56  ;;  %v396_v10 = vmul.f32 0.6931472, %v4582_v57  ;;  %4090 = vmatpush3.bf16.msra.mxu1 %v4447_v52  ;;  %v4448_v55 = vld [vmem:[#allocation2 + $0x98] sm:$0xff]   ;;  %v4450_v56 = vld [vmem:[#allocation2 + $0xa8] sm:$0xff]   ;;  %v4451_v57 = vld [vmem:[#allocation2 + $0xb0] sm:$0xff]  }
 0x122   :  { %v421_v1 = vadd.f32 %v400_v60, %v293_v59  ;;  %v402_v7 = vmul.f32 0.6931472, %v4584_v62  ;;  %4029 = vmatprep.mubr.bf16.mxu1 %v445_v61  ;;  %4091 = vmatprep.subr.bf16.mxu1 %v4832_v0  ;;  %v4452_v59 = vld [vmem:[#allocation2 + $0xb8] sm:$0xff]   ;;  %v4453_v60 = vld [vmem:[#allocation2 + $0xc0] sm:$0xff]   ;;  %v4454_v61 = vld [vmem:[#allocation2 + $0xc8] sm:$0xff]  }
 0x123   :  { %4030 = vmatmul.mubr.bf16.gmra.mrb[20].mxu1 %v446_v54  ;;  %v419_v18 = vadd.f32 %v396_v10, %v291_v30  ;;  %v4449_v54 = vld [vmem:[#allocation2 + $0xa0] sm:$0xff]  }
 0x124   :  { %v422_v47 = vadd.f32 %v402_v7, %v294_v5  ;;  %4078 = vmatmul.mubr.msk.f32.gmra.mrb[12].mxu0 %vm690_vm2, %v71_v9  ;;  %v3553_v12 = vadd.f32 -0.6931472, %v421_v1  ;;  %v5119_v5 = vld [vmem:[%s5750_s4] ss:$0 sm:$0xff] }
 0x125   :  { %4080 = vmatprep.mubr.msk.f32.mxu0 %vm690_vm2, %v72_v20  ;;  %v3551_v39 = vadd.f32 -0.6931472, %v419_v18  ;;  %4092 = vmatpush3.bf16.msra.mxu1 %v4448_v55 }
 0x126   :  { %v3554_v14 = vadd.f32 -0.6931472, %v422_v47  ;;  %4093 = vmatprep.subr.bf16.mxu1 %v4832_v0 }
 0x127   :  { %v4586_v16 = vpop.eup %4585 }
 0x128   :  { %v4588_v49 = vpop.eup %4587  ;;  %v398_v23 = vmul.f32 0.6931472, %v4586_v16  ;;  %v448_v25 = vpack.c.bf16 %v3554_v14, %v3553_v12  ;;  %4081 = vmatmul.mubr.msk.f32.gmra.mrb[14].mxu0 %vm690_vm2, %v73_v15 }
 0x129   :  { %v4590_v26 = vpop.eup %4589  ;;  %v408_v27 = vmul.f32 0.6931472, %v4588_v49  ;;  %4083 = vmatprep.mubr.msk.f32.mxu0 %vm690_vm2, %v74_v17  ;;  %4094 = vmatpush3.bf16.msra.mxu1 %v4449_v54 }
 0x12a   :  { %v4592_v63 = vpop.eup %4591  ;;  %v420_v31 = vadd.f32 %v398_v23, %v292_v22  ;;  %v404_v2 = vmul.f32 0.6931472, %v4590_v26  ;;  %4095 = vmatprep.subr.bf16.mxu1 %v4832_v0 }
 0x12b   :  { %v4594_v35 = vpop.eup %4593  ;;  %v425_v34 = vadd.f32 %v408_v27, %v297_v24  ;;  %v410_v4 = vmul.f32 0.6931472, %v4592_v63 }
 0x12c   :  { %v3552_v53 = vadd.f32 -0.6931472, %v420_v31  ;;  %v423_v40 = vadd.f32 %v404_v2, %v295_v32  ;;  %v406_v8 = vmul.f32 0.6931472, %v4594_v35  ;;  %4084 = vmatmul.mubr.msk.f32.gmra.mrb[16].mxu0 %vm690_vm2, %v75_v33 }
 0x12d   :  { %v426_v41 = vadd.f32 %v410_v4, %v298_v37  ;;  %4086 = vmatprep.mubr.msk.f32.mxu0 %vm690_vm2, %v76_v38  ;;  %v3557_v3 = vadd.f32 -0.6931472, %v425_v34  ;;  %4096 = vmatpush3.bf16.msra.mxu1 %v4450_v56 }
 0x12e   :  { %v424_v51 = vadd.f32 %v406_v8, %v296_v48  ;;  %v447_v42 = vpack.c.bf16 %v3552_v53, %v3551_v39  ;;  %v3555_v44 = vadd.f32 -0.6931472, %v423_v40  ;;  %4097 = vmatprep.subr.bf16.mxu1 %v4832_v0 }
 0x12f   :  { %v3558_v43 = vadd.f32 -0.6931472, %v426_v41 }
 0x130   :  { %v3556_v45 = vadd.f32 -0.6931472, %v424_v51  ;;  %4033 = vmatprep.mubr.bf16.mxu1 %v447_v42  ;;  %4087 = vmatmul.mubr.msk.f32.gmra.mrb[18].mxu0 %vm690_vm2, %v77_v58 }
 0x131   :  { %4034 = vmatmul.mubr.bf16.gmra.mrb[24].mxu1 %v448_v25  ;;  %v450_v46 = vpack.c.bf16 %v3558_v43, %v3557_v3  ;;  %4125 = vmatprep.mubr.msk.bf16.mxu0 %vm4833_vm0, %v4832_v0 }
 0x132   :  { %v449_v50 = vpack.c.bf16 %v3556_v45, %v3555_v44  ;;  %4098 = vmatpush3.bf16.msra.mxu1 %v4451_v57 }
 0x133   :  { %4099 = vmatprep.subr.bf16.mxu1 %v4832_v0 }
 0x134   :  { %4037 = vmatprep.mubr.bf16.mxu1 %v449_v50 }
 0x136   :  { %4100 = vmatpush3.bf16.msra.mxu1 %v4452_v59 }
 0x137   :  { %4101 = vmatprep.subr.bf16.mxu1 %v4832_v0 }
 0x139   :  { %4038 = vmatmul.mubr.bf16.gmra.mrb[28].mxu1 %v450_v46 }
 0x13a   :  { %4105 = vmatprep.mubr.msk.bf16.mxu1 %vm4833_vm0, %v4832_v0  ;;  %4102 = vmatpush3.bf16.msra.mxu1 %v4453_v60 }
 0x13b   :  { %4103 = vmatprep.subr.bf16.mxu1 %v4832_v0 }
 0x13e   :  { %4104 = vmatpush3.bf16.msra.mxu1 %v4454_v61 }
 0x1e7   :  { %v4067_v62 = vpop.f32.mrb[4].mxu0 }
 0x1e8   :  { %v805_v1 = vpop.f32.mrb[5].mxu0 }
 0x1eb   :  { %v4070_v7 = vpop.f32.mrb[6].mxu0 }
 0x1ec   :  { %v815_v9 = vpop.f32.mrb[7].mxu0 }
 0x1ee   :  { %v4027_v20 = vpop.f32.mrb[16].mxu1 }
 0x1ef   :  { %v546_v10 = vadd.f32 %v4027_v20, %v5119_v5  ;;  %v537_v47 = vpop.f32.mrb[17].mxu1  ;;  %v4073_v14 = vpop.f32.mrb[8].mxu0 }
 0x1f0   :  { %v538_v12 = vadd.f32 %v5119_v5, %v537_v47  ;;  %v4028_v30 = vpop.f32.mrb[18].mxu1  ;;  %v825_v49 = vpop.f32.mrb[9].mxu0 }
 0x1f1   :  { %v549_v15 = vadd.f32 %v4028_v30, %v5119_v5  ;;  %v886_v16 = vmul.f32 %v815_v9, %v546_v10  ;;  %v540_v17 = vpop.f32.mrb[19].mxu1 }
 0x1f2   :  { %v884_v18 = vmul.f32 %v805_v1, %v538_v12  ;;  %v541_v22 = vadd.f32 %v5119_v5, %v540_v17 }
 0x1f3   :  { %v887_v23 = vmul.f32 %v4070_v7, %v549_v15  ;;  %v912_v25 = vrot.slane %v886_v16, 4  ;;  %v4076_v27 = vpop.f32.mrb[10].mxu0 }
 0x1f4   :  { %v900_v26 = vrot.slane %v884_v18, 4  ;;  %v885_v24 = vmul.f32 %v4067_v62, %v541_v22  ;;  %v835_v32 = vpop.f32.mrb[11].mxu0 }
 0x1f5   :  { %v918_v63 = vrot.slane %v887_v23, 4  ;;  %v913_v31 = vadd.f32 %v912_v25, %v886_v16 }
 0x1f6   :  { %v901_v2 = vadd.f32 %v900_v26, %v884_v18  ;;  %v906_v33 = vrot.slane %v885_v24, 4  ;;  %v4031_v35 = vpop.f32.mrb[20].mxu1 }
 0x1f7   :  { %v919_v34 = vadd.f32 %v918_v63, %v887_v23  ;;  %v914_v37 = vrot.slane %v913_v31, 2  ;;  %v562_v4 = vadd.f32 %v4031_v35, %v5119_v5  ;;  %v553_v48 = vpop.f32.mrb[21].mxu1  ;;  %v5127_v8 = vpop.f32.mrb[12].mxu0 }
 0x1f8   :  { %v902_v38 = vrot.slane %v901_v2, 2  ;;  %v907_v39 = vadd.f32 %v906_v33, %v885_v24  ;;  %v554_v53 = vadd.f32 %v5119_v5, %v553_v48  ;;  %v4032_v40 = vpop.f32.mrb[22].mxu1  ;;  %v5130_v43 = vpop.f32.mrb[13].mxu0 }
 0x1f9   :  { %v920_v41 = vrot.slane %v919_v34, 2  ;;  %v915_v51 = vadd.f32 %v914_v37, %v913_v31  ;;  %v565_v42 = vadd.f32 %v4032_v40, %v5119_v5  ;;  %v890_v58 = vmul.f32 %v835_v32, %v562_v4  ;;  %v556_v3 = vpop.f32.mrb[23].mxu1 }
 0x1fa   :  { %v903_v44 = vadd.f32 %v902_v38, %v901_v2  ;;  %v908_v45 = vrot.slane %v907_v39, 2  ;;  %v888_v46 = vmul.f32 %v825_v49, %v554_v53  ;;  %v557_v50 = vadd.f32 %v5119_v5, %v556_v3 }
 0x1fb   :  { %v921_v52 = vadd.f32 %v920_v41, %v919_v34  ;;  %v916_v55 = vrot.slane %v915_v51, 1  ;;  %v891_v54 = vmul.f32 %v4076_v27, %v565_v42  ;;  %v936_v56 = vrot.slane %v890_v58, 4  ;;  %v4082_v62 = vpop.f32.mrb[14].mxu0 }
 0x1fc   :  { %v904_v57 = vrot.slane %v903_v44, 1  ;;  %v909_v59 = vadd.f32 %v908_v45, %v907_v39  ;;  %v924_v60 = vrot.slane %v888_v46, 4  ;;  %v889_v61 = vmul.f32 %v4073_v14, %v557_v50  ;;  %v855_v10 = vpop.f32.mrb[15].mxu0 }
 0x1fd   :  { %v922_v1 = vrot.slane %v921_v52, 1  ;;  %v917_v7 = vadd.f32 %v916_v55, %v915_v51  ;;  %v942_v9 = vrot.slane %v891_v54, 4  ;;  %v937_v20 = vadd.f32 %v936_v56, %v890_v58 }
 0x1fe   :  { %v905_v47 = vadd.f32 %v904_v57, %v903_v44  ;;  %v910_v12 = vrot.slane %v909_v59, 1  ;;  %v925_v30 = vadd.f32 %v924_v60, %v888_v46  ;;  %v930_v15 = vrot.slane %v889_v61, 4 }
 0x1ff   :  { %v923_v16 = vadd.f32 %v922_v1, %v921_v52  ;;  %v943_v17 = vadd.f32 %v942_v9, %v891_v54  ;;  %v938_v49 = vrot.slane %v937_v20, 2  ;;  %v5133_v26 = vpop.f32.mrb[16].mxu0  ;;  %v998_v24 = vpack.c.bf16 %v917_v7, %v917_v7 }
 0x200   :  { %v996_v18 = vpack.c.bf16 %v905_v47, %v905_v47  ;;  %v911_v22 = vadd.f32 %v910_v12, %v909_v59  ;;  %v926_v23 = vrot.slane %v925_v30, 2  ;;  %v931_v25 = vadd.f32 %v930_v15, %v889_v61  ;;  %v5135_v31 = vpop.f32.mrb[17].mxu0 }
 0x201   :  { %v999_v14 = vpack.c.bf16 %v923_v16, %v923_v16  ;;  %v944_v27 = vrot.slane %v943_v17, 2  ;;  %v939_v63 = vadd.f32 %v938_v49, %v937_v20  ;;  %v1034_v41 = vunpack.c.l.b16 %v998_v24 }
 0x202   :  { %v997_v32 = vpack.c.bf16 %v911_v22, %v911_v22  ;;  %v927_v2 = vadd.f32 %v926_v23, %v925_v30  ;;  %v932_v33 = vrot.slane %v931_v25, 2  ;;  %v1032_v37 = vunpack.c.l.b16 %v996_v18 }
 0x203   :  { %v945_v35 = vadd.f32 %v944_v27, %v943_v17  ;;  %v940_v34 = vrot.slane %v939_v63, 1  ;;  %v4088_v53 = vpop.f32.mrb[18].mxu0  ;;  %v1035_v40 = vunpack.c.l.b16 %v999_v14 }
 0x204   :  { %v1033_v4 = vunpack.c.l.b16 %v997_v32  ;;  %v928_v48 = vrot.slane %v927_v2, 1  ;;  %v933_v38 = vadd.f32 %v932_v33, %v931_v25  ;;  %v4035_v39 = vpop.f32.mrb[24].mxu1  ;;  %v875_v3 = vpop.f32.mrb[19].mxu0 }
 0x205   :  { %v946_v51 = vrot.slane %v945_v35, 1  ;;  %v578_v42 = vadd.f32 %v4035_v39, %v5119_v5  ;;  %v569_v58 = vpop.f32.mrb[25].mxu1  ;;  %v5141_v54 = vadd.f32 %v940_v34, %v939_v63 }
 0x206   :  { %v1049_v44 = vsel %vm1048_vm3, %v1033_v4, %v1032_v37  ;;  %v929_v45 = vadd.f32 %v928_v48, %v927_v2  ;;  %v934_v46 = vrot.slane %v933_v38, 1  ;;  %v570_v50 = vadd.f32 %v5119_v5, %v569_v58  ;;  %v4036_v52 = vpop.f32.mrb[26].mxu1 }
 0x207   :  { %v1051_v55 = vsel %vm1050_vm4, %v1034_v41, %v1049_v44  ;;  %v581_v56 = vadd.f32 %v4036_v52, %v5119_v5  ;;  %v572_v57 = vpop.f32.mrb[27].mxu1  ;;  %v947_v7 = vadd.f32 %v946_v51, %v945_v35  ;;  %v894_v20 = vmul.f32 %v855_v10, %v578_v42 }
 0x208   :  { %v1000_v59 = vpack.c.bf16 %v929_v45, %v929_v45  ;;  %v1053_v60 = vsel %vm1052_vm5, %v1035_v40, %v1051_v55  ;;  %v935_v61 = vadd.f32 %v934_v46, %v933_v38  ;;  %v892_v1 = vmul.f32 %v5130_v43, %v570_v50 }
 0x209   :  { %v895_v9 = vmul.f32 %v4082_v62, %v581_v56  ;;  %v573_v15 = vadd.f32 %v5119_v5, %v572_v57  ;;  %v1002_v16 = vpack.c.bf16 %v5141_v54, %v5141_v54  ;;  %v960_v49 = vrot.slane %v894_v20, 4 }
 0x20a   :  { %v1036_v47 = vunpack.c.l.b16 %v1000_v59  ;;  %v1001_v12 = vpack.c.bf16 %v935_v61, %v935_v61  ;;  %v948_v30 = vrot.slane %v892_v1, 4  ;;  %v1003_v62 = vpack.c.bf16 %v947_v7, %v947_v7 }
 0x20b   :  { %v966_v17 = vrot.slane %v895_v9, 4  ;;  %v893_v43 = vmul.f32 %v5127_v8, %v573_v15  ;;  %v961_v14 = vadd.f32 %v960_v49, %v894_v20 }
 0x20c   :  { %v1055_v18 = vsel %vm1054_vm6, %v1036_v47, %v1053_v60  ;;  %v1037_v22 = vunpack.c.l.b16 %v1001_v12  ;;  %v949_v23 = vadd.f32 %v948_v30, %v892_v1  ;;  %v4039_v25 = vpop.f32.mrb[28].mxu1  ;;  %v1039_v47 = vunpack.c.l.b16 %v1003_v62 }
 0x20d   :  { %v967_v10 = vadd.f32 %v966_v17, %v895_v9  ;;  %v594_v24 = vadd.f32 %v4039_v25, %v5119_v5  ;;  %v585_v27 = vpop.f32.mrb[29].mxu1  ;;  %v954_v2 = vrot.slane %v893_v43, 4  ;;  %v962_v37 = vrot.slane %v961_v14, 2 }
 0x20e   :  { %v1057_v63 = vsel %vm1056_vm7, %v1037_v22, %v1055_v18  ;;  %v950_v32 = vrot.slane %v949_v23, 2  ;;  %v586_v33 = vadd.f32 %v5119_v5, %v585_v27  ;;  %v4040_v35 = vpop.f32.mrb[30].mxu1  ;;  %v1038_v12 = vunpack.c.l.b16 %v1002_v16 }
 0x20f   :  { %v968_v34 = vrot.slane %v967_v10, 2  ;;  %v597_v4 = vadd.f32 %v4040_v35, %v5119_v5  ;;  %v898_v48 = vmul.f32 %v875_v3, %v594_v24  ;;  %v588_v8 = vpop.f32.mrb[31].mxu1  ;;  %v955_v39 = vadd.f32 %v954_v2, %v893_v43 }
 0x210   :  { %v951_v38 = vadd.f32 %v950_v32, %v949_v23  ;;  %v896_v40 = vmul.f32 %v5135_v31, %v586_v33  ;;  %v589_v41 = vadd.f32 %v5119_v5, %v588_v8  ;;  %v963_v42 = vadd.f32 %v962_v37, %v961_v14 }
 0x211   :  { %v969_v51 = vadd.f32 %v968_v34, %v967_v10  ;;  %v899_v58 = vmul.f32 %v4088_v53, %v597_v4  ;;  %v984_v44 = vrot.slane %v898_v48, 4  ;;  %v956_v46 = vrot.slane %v955_v39, 2 }
 0x212   :  { %v952_v45 = vrot.slane %v951_v38, 1  ;;  %v972_v50 = vrot.slane %v896_v40, 4  ;;  %v897_v52 = vmul.f32 %v5133_v26, %v589_v41  ;;  %v964_v54 = vrot.slane %v963_v42, 1 }
 0x213   :  { %v970_v55 = vrot.slane %v969_v51, 1  ;;  %v990_v3 = vrot.slane %v899_v58, 4  ;;  %v985_v56 = vadd.f32 %v984_v44, %v898_v48  ;;  %v957_v59 = vadd.f32 %v956_v46, %v955_v39 }
 0x214   :  { %v953_v57 = vadd.f32 %v952_v45, %v951_v38  ;;  %v973_v60 = vadd.f32 %v972_v50, %v896_v40  ;;  %v978_v61 = vrot.slane %v897_v52, 4  ;;  %v965_v1 = vadd.f32 %v964_v54, %v963_v42 }
 0x215   :  { %v971_v31 = vadd.f32 %v970_v55, %v969_v51  ;;  %v991_v5 = vadd.f32 %v990_v3, %v899_v58  ;;  %v986_v7 = vrot.slane %v985_v56, 2  ;;  %v958_v9 = vrot.slane %v957_v59, 1 }
 0x216   :  { %v974_v53 = vrot.slane %v973_v60, 2  ;;  %v979_v20 = vadd.f32 %v978_v61, %v897_v52  ;;  %v1004_v15 = vpack.c.bf16 %v953_v57, %v953_v57  ;;  %v1006_v23 = vpack.c.bf16 %v965_v1, %v965_v1  ;;  %v4456_v57 = vld [vmem:[#allocation2 + $0xd8] sm:$0xff]   ;;  %v4459_v61 = vld [vmem:[#allocation2 + $0xf0] sm:$0xff]   ;;  %v4461_v1 = vld [vmem:[#allocation2 + $0x100] sm:$0xff]  }
 0x217   :  { %v992_v30 = vrot.slane %v991_v5, 2  ;;  %v987_v26 = vadd.f32 %v986_v7, %v985_v56  ;;  %v959_v17 = vadd.f32 %v958_v9, %v957_v59  ;;  %v1007_v22 = vpack.c.bf16 %v971_v31, %v971_v31  ;;  %v4455_v56 = vld [vmem:[#allocation2 + $0xd0] sm:$0xff]   ;;  %v4457_v59 = vld [vmem:[#allocation2 + $0xe0] sm:$0xff]   ;;  %v4460_v31 = vld [vmem:[#allocation2 + $0xf8] sm:$0xff]  }
 0x218   :  { %v975_v49 = vadd.f32 %v974_v53, %v973_v60  ;;  %v980_v18 = vrot.slane %v979_v20, 2  ;;  %v1059_v27 = vsel %vm1058_vm8, %v1038_v12, %v1057_v63  ;;  %v1040_v16 = vunpack.c.l.b16 %v1004_v15  ;;  %4110 = vmatpush3.bf16.msra.mxu0 %v4455_v56  ;;  %v4458_v60 = vld [vmem:[#allocation2 + $0xe8] sm:$0xff]   ;;  %v4463_v7 = vld [vmem:[#allocation2 + $0x110] sm:$0xff]   ;;  %v4464_v9 = vld [vmem:[#allocation2 + $0x118] sm:$0xff]  }
 0x219   :  { %v993_v43 = vadd.f32 %v992_v30, %v991_v5  ;;  %v988_v25 = vrot.slane %v987_v26, 1  ;;  %v1005_v10 = vpack.c.bf16 %v959_v17, %v959_v17  ;;  %v1061_v62 = vsel %vm1060_vm9, %v1039_v47, %v1059_v27  ;;  %4111 = vmatprep.subr.bf16.mxu0 %v4832_v0  ;;  %v4462_v5 = vld [vmem:[#allocation2 + $0x108] sm:$0xff]   ;;  %4129 = vmatprep.subr.bf16.mxu1 %v4463_v7  ;;  %v3592_v53 = vld [vmem:[%s5750_s4 + $0x1] ss:$0 sm:$0xff] }
 0x21a   :  { %v976_v14 = vrot.slane %v975_v49, 1  ;;  %v981_v24 = vadd.f32 %v980_v18, %v979_v20  ;;  %v1042_v37 = vunpack.c.l.b16 %v1006_v23  ;;  %v1043_v48 = vunpack.c.l.b16 %v1007_v22 }
 0x21b   :  { %v994_v32 = vrot.slane %v993_v43, 1  ;;  %v989_v2 = vadd.f32 %v988_v25, %v987_v26  ;;  %v1041_v33 = vunpack.c.l.b16 %v1005_v10 }
 0x21c   :  { %v977_v35 = vadd.f32 %v976_v14, %v975_v49  ;;  %v982_v34 = vrot.slane %v981_v24, 1  ;;  %4112 = vmatpush3.bf16.msra.mxu0 %v4456_v57  ;;  %v4475_v57 = vld [vmem:[#allocation2 + $0x130] sm:$0xff]  }
 0x21d   :  { %v995_v4 = vadd.f32 %v994_v32, %v993_v43  ;;  %v1062_v8 = vsel %vm1048_vm3, %v1041_v33, %v1040_v16  ;;  %v1010_v41 = vpack.c.bf16 %v989_v2, %v989_v2  ;;  %4113 = vmatprep.subr.bf16.mxu0 %v4832_v0 }
 0x21e   :  { %v1008_v38 = vpack.c.bf16 %v977_v35, %v977_v35  ;;  %v983_v39 = vadd.f32 %v982_v34, %v981_v24  ;;  %v1063_v40 = vsel %vm1050_vm4, %v1042_v37, %v1062_v8 }
 0x21f   :  { %v1064_v63 = vsel %vm1052_vm5, %v1043_v48, %v1063_v40  ;;  %v1011_v42 = vpack.c.bf16 %v995_v4, %v995_v4  ;;  %v1046_v46 = vunpack.c.l.b16 %v1010_v41  ;;  %v4465_v48 = vld [vmem:[#allocation2 + $0x160] sm:$0xff]   ;;  %v4468_v40 = vld [vmem:[#allocation2 + $0x178] sm:$0xff]  }
 0x220   :  { %v1044_v51 = vunpack.c.l.b16 %v1008_v38  ;;  %v1009_v58 = vpack.c.bf16 %v983_v39, %v983_v39  ;;  %4114 = vmatpush3.bf16.msra.mxu0 %v4457_v59  ;;  %v4466_v38 = vld [vmem:[#allocation2 + $0x168] sm:$0xff]   ;;  %v4467_v39 = vld [vmem:[#allocation2 + $0x170] sm:$0xff]   ;;  %v4469_v41 = vld [vmem:[#allocation2 + $0x180] sm:$0xff]  }
 0x221   :  { %v1047_v50 = vunpack.c.l.b16 %v1011_v42  ;;  %4115 = vmatprep.subr.bf16.mxu0 %v4832_v0  ;;  %v4472_v42 = vld [vmem:[#allocation2 + $0x198] sm:$0xff]  }
 0x222   :  { %v1065_v44 = vsel %vm1054_vm6, %v1044_v51, %v1064_v63  ;;  %v1045_v45 = vunpack.c.l.b16 %v1009_v58  ;;  %v4470_v51 = vld [vmem:[#allocation2 + $0x188] sm:$0xff]   ;;  %v4471_v63 = vld [vmem:[#allocation2 + $0x190] sm:$0xff]   ;;  %v4473_v58 = vld [vmem:[#allocation2 + $0x120] sm:$0xff]  }
 0x224   :  { %v1066_v52 = vsel %vm1056_vm7, %v1045_v45, %v1065_v44  ;;  %4116 = vmatpush3.bf16.msra.mxu0 %v4458_v60  ;;  %v4474_v44 = vld [vmem:[#allocation2 + $0x128] sm:$0xff]  }
 0x225   :  { %v1067_v55 = vsel %vm1058_vm8, %v1046_v46, %v1066_v52  ;;  %4117 = vmatprep.subr.bf16.mxu0 %v4832_v0 }
 0x226   :  { %v1068_v54 = vsel %vm1060_vm9, %v1047_v50, %v1067_v55 }
 0x227   :  { %v1069_v3 = vpack.c.b16 %v1068_v54, %v1061_v62 }
 0x228   :  { %4118 = vmatpush3.bf16.msra.mxu0 %v4459_v61 }
 0x229   :  { %4106 = vmatmul.mubr.bf16.vlgmr.msra.gmra.mrb[32].mxu1 %v1069_v3  ;;  %4119 = vmatprep.subr.bf16.mxu0 %v4832_v0 }
 0x22a   :  { %4133 = vmatprep.mubr.msk.bf16.mxu1 %vm161_vm1, %v4891_v6  ;;  %4130 = vmatpush3.bf16.msra.mxu1 %v4463_v7 }
 0x22b   :  { %4131 = vmatprep.subr.bf16.mxu1 %v4464_v9 }
 0x22c   :  { %4120 = vmatpush3.bf16.msra.mxu0 %v4460_v31 }
 0x22d   :  { %4121 = vmatprep.subr.bf16.mxu0 %v4832_v0 }
 0x22e   :  { %4132 = vmatpush3.bf16.msra.mxu1 %v4464_v9  ;;  %v4476_v9 = vld [vmem:[#allocation2 + $0x138] sm:$0xff]  }
 0x22f   :  { %4149 = vmatprep.subr.bf16.mxu1 %v4473_v58 }
 0x230   :  { %4122 = vmatpush3.bf16.msra.mxu0 %v4461_v1 }
 0x231   :  { %4123 = vmatprep.subr.bf16.mxu0 %v4832_v0  ;;  %4134 = vmatmul.mubr.msk.bf16.vlgmr.msra.gmra.mrb[36].mxu1 %vm161_vm1, %v4904_v11 }
 0x232   :  { %4137 = vmatprep.mubr.msk.bf16.mxu1 %vm161_vm1, %v4907_v13  ;;  %4150 = vmatpush3.bf16.msra.mxu1 %v4473_v58 }
 0x233   :  { %4151 = vmatprep.subr.bf16.mxu1 %v4474_v44 }
 0x234   :  { %4124 = vmatpush3.bf16.msra.mxu0 %v4462_v5 }
 0x235   :  { %4181 = vmatprep.subr.bf16.mxu0 %v4832_v0 }
 0x236   :  { %4152 = vmatpush3.bf16.msra.mxu1 %v4474_v44 }
 0x237   :  { %4153 = vmatprep.subr.bf16.mxu1 %v4475_v57 }
 0x239   :  { %4138 = vmatmul.mubr.msk.bf16.gmra.mrb[40].mxu1 %vm161_vm1, %v4926_v19 }
 0x23a   :  { %4141 = vmatprep.mubr.msk.bf16.mxu1 %vm161_vm1, %v4929_v21  ;;  %4154 = vmatpush3.bf16.msra.mxu1 %v4475_v57  ;;  %v4480_v57 = vld [vmem:[#allocation2 + $0x158] sm:$0xff]  }
 0x23b   :  { %4155 = vmatprep.subr.bf16.mxu1 %v4476_v9 }
 0x23e   :  { %4156 = vmatpush3.bf16.msra.mxu1 %v4476_v9 }
 0x241   :  { %4142 = vmatmul.mubr.msk.bf16.gmra.mrb[44].mxu1 %vm161_vm1, %v4948_v28 }
 0x242   :  { %4145 = vmatprep.mubr.msk.bf16.mxu1 %vm161_vm1, %v4951_v29 }
 0x249   :  { %4146 = vmatmul.mubr.msk.bf16.gmra.mrb[48].mxu1 %vm161_vm1, %v4970_v36 }
 0x2fc   :  { %v1153_v20 = vpop.f32.mrb[32].mxu1 }
 0x2fd   :  { %v1154_v47 = vadd.f32 %v3592_v53, %v1153_v20  ;;  %v4107_v12 = vpop.f32.mrb[33].mxu1 }
 0x2fe   :  { %v1156_v30 = vpop.f32.mrb[34].mxu1 }
 0x2ff   :  { %v1162_v26 = vand.u32 2147483647, %v1154_v47  ;;  %v1157_v15 = vadd.f32 %v3592_v53, %v1156_v30  ;;  %v4108_v17 = vpop.f32.mrb[35].mxu1  ;;  %v1160_v32 = vmax.f32 %v1154_v47, 0.0 }
 0x301   :  { %v1164_v49 = vsub.f32 0.0, %v1162_v26  ;;  %v1163_v18 = vand.u32 2147483647, %v1157_v15  ;;  %v1161_v33 = vmax.f32 %v1157_v15, 0.0 }
 0x303   :  { %v1166_v22 = vmul.f32 1.442695, %v1164_v49  ;;  %v1165_v23 = vsub.f32 0.0, %v1163_v18  ;;  %v4477_v18 = vld [vmem:[#allocation2 + $0x140] sm:$0xff]  }
 0x304   :  { %v5203_v45 = vpop.f32.mrb[36].mxu1  ;;  %4157 = vmatprep.subr.bf16.mxu1 %v4477_v18 }
 0x305   :  { %4595 = vpow2.f32 %v1166_v22  ;;  %v1168_v43 = vmul.f32 1.442695, %v1165_v23  ;;  %v1476_v46 = vand.u32 2147483647, %v5203_v45  ;;  %v5206_v50 = vpop.f32.mrb[37].mxu1  ;;  %4158 = vmatpush3.bf16.msra.mxu1 %v4477_v18 }
 0x306   :  { %v1474_v52 = vand.u32 2147483647, %v5206_v50  ;;  %v5209_v55 = vpop.f32.mrb[38].mxu1 }
 0x307   :  { %4597 = vpow2.f32 %v1168_v43  ;;  %v1492_v54 = vsub.f32 0.0, %v1476_v46  ;;  %v1477_v3 = vand.u32 2147483647, %v5209_v55  ;;  %v5212_v56 = vpop.f32.mrb[39].mxu1 }
 0x308   :  { %v1490_v59 = vsub.f32 0.0, %v1474_v52  ;;  %v1475_v60 = vand.u32 2147483647, %v5212_v56 }
 0x309   :  { %v1510_v61 = vmul.f32 1.442695, %v1492_v54  ;;  %v1493_v31 = vsub.f32 0.0, %v1477_v3 }
 0x30a   :  { %v1506_v1 = vmul.f32 1.442695, %v1490_v59  ;;  %v1491_v5 = vsub.f32 0.0, %v1475_v60 }
 0x30b   :  { %v1512_v7 = vmul.f32 1.442695, %v1493_v31 }
 0x30c   :  { %v1508_v53 = vmul.f32 1.442695, %v1491_v5  ;;  %v5215_v20 = vpop.f32.mrb[40].mxu1 }
 0x30d   :  { %v1480_v47 = vand.u32 2147483647, %v5215_v20  ;;  %v5218_v12 = vpop.f32.mrb[41].mxu1 }
 0x30e   :  { %v1478_v30 = vand.u32 2147483647, %v5218_v12  ;;  %v5221_v26 = vpop.f32.mrb[42].mxu1 }
 0x30f   :  { %v4596_v25 = vpop.eup %4595  ;;  %v1496_v15 = vsub.f32 0.0, %v1480_v47  ;;  %v1481_v17 = vand.u32 2147483647, %v5221_v26  ;;  %v5224_v49 = vpop.f32.mrb[43].mxu1 }
 0x310   :  { %v1170_v10 = vadd.f32 1.0, %v4596_v25  ;;  %v1494_v22 = vsub.f32 0.0, %v1478_v30  ;;  %v1479_v23 = vand.u32 2147483647, %v5224_v49  ;;  %v1458_v30 = vmax.f32 %v5206_v50, 0.0 }
 0x311   :  { %v4598_v14 = vpop.eup %4597  ;;  %v1518_v43 = vmul.f32 1.442695, %v1496_v15  ;;  %v1497_v25 = vsub.f32 0.0, %v1481_v17  ;;  %v1461_v50 = vmax.f32 %v5209_v55, 0.0 }
 0x312   :  { %4599 = vlog2.f32 %v1170_v10  ;;  %v1171_v24 = vadd.f32 1.0, %v4598_v14  ;;  %v1514_v10 = vmul.f32 1.442695, %v1494_v22  ;;  %v1495_v14 = vsub.f32 0.0, %v1479_v23 }
 0x314   :  { %4601 = vlog2.f32 %v1171_v24  ;;  %v1520_v24 = vmul.f32 1.442695, %v1497_v25 }
 0x315   :  { %4603 = vpow2.f32 %v1510_v61 }
 0x316   :  { %4605 = vpow2.f32 %v1506_v1 }
 0x317   :  { %4607 = vpow2.f32 %v1512_v7  ;;  %v1460_v7 = vmax.f32 %v5203_v45, 0.0 }
 0x318   :  { %4609 = vpow2.f32 %v1508_v53 }
 0x319   :  { %4611 = vpow2.f32 %v1518_v43 }
 0x31a   :  { %4613 = vpow2.f32 %v1514_v10 }
 0x31b   :  { %4615 = vpow2.f32 %v1520_v24 }
 0x31c   :  { %v4600_v27 = vpop.eup %4599 }
 0x31d   :  { %v1173_v2 = vmul.f32 0.6931472, %v4600_v27  ;;  %v4478_v27 = vld [vmem:[#allocation2 + $0x148] sm:$0xff]  }
 0x31e   :  { %v4602_v62 = vpop.eup %4601  ;;  %4159 = vmatprep.subr.bf16.mxu1 %v4478_v27 }
 0x31f   :  { %v1176_v16 = vadd.f32 %v1173_v2, %v1160_v32  ;;  %v1175_v35 = vmul.f32 0.6931472, %v4602_v62  ;;  %v1516_v32 = vmul.f32 1.442695, %v1495_v14  ;;  %v5227_v2 = vpop.f32.mrb[44].mxu1  ;;  %v4604_v62 = vpop.eup %4603  ;;  %4160 = vmatpush3.bf16.msra.mxu1 %v4478_v27 }
 0x321   :  { %v1177_v34 = vadd.f32 %v1175_v35, %v1161_v33  ;;  %v3601_v37 = vadd.f32 -0.6931472, %v1176_v16  ;;  %v1484_v16 = vand.u32 2147483647, %v5227_v2  ;;  %v5230_v33 = vpop.f32.mrb[45].mxu1  ;;  %v4606_v35 = vpop.eup %4605  ;;  %4617 = vpow2.f32 %v1516_v32 }
 0x323   :  { %v3602_v4 = vadd.f32 -0.6931472, %v1177_v34  ;;  %v1540_v34 = vadd.f32 1.0, %v4604_v62 }
 0x325   :  { %v1180_v8 = vpack.c.bf16 %v3602_v4, %v3601_v37  ;;  %v1482_v37 = vand.u32 2147483647, %v5230_v33  ;;  %v5233_v4 = vpop.f32.mrb[46].mxu1  ;;  %4619 = vlog2.f32 %v1540_v34  ;;  %v1459_v34 = vmax.f32 %v5212_v56, 0.0 }
 0x327   :  { %4126 = vmatmul.mubr.bf16.vlgmr.msra.gmra.mrb[20].mxu0 %v1180_v8  ;;  %v1538_v8 = vadd.f32 1.0, %v4606_v35 }
 0x328   :  { %4182 = vmatpush3.bf16.msra.mxu0 %v4465_v48  ;;  %4197 = vmatprep.mubr.msk.bf16.mxu0 %vm4833_vm0, %v4832_v0  ;;  %v4608_v48 = vpop.eup %4607 }
 0x329   :  { %4183 = vmatprep.subr.bf16.mxu0 %v4832_v0  ;;  %4621 = vlog2.f32 %v1538_v8 }
 0x32c   :  { %4184 = vmatpush3.bf16.msra.mxu0 %v4466_v38  ;;  %v1500_v38 = vsub.f32 0.0, %v1484_v16 }
 0x32d   :  { %4185 = vmatprep.subr.bf16.mxu0 %v4832_v0 }
 0x32e   :  { %v1526_v44 = vmul.f32 1.442695, %v1500_v38 }
 0x330   :  { %4186 = vmatpush3.bf16.msra.mxu0 %v4467_v39  ;;  %v1485_v39 = vand.u32 2147483647, %v5233_v4 }
 0x331   :  { %4187 = vmatprep.subr.bf16.mxu0 %v4832_v0 }
 0x332   :  { %v1501_v46 = vsub.f32 0.0, %v1485_v39 }
 0x334   :  { %4188 = vmatpush3.bf16.msra.mxu0 %v4468_v40  ;;  %v5236_v40 = vpop.f32.mrb[47].mxu1  ;;  %v1528_v3 = vmul.f32 1.442695, %v1501_v46 }
 0x335   :  { %4189 = vmatprep.subr.bf16.mxu0 %v4832_v0  ;;  %v1483_v54 = vand.u32 2147483647, %v5236_v40  ;;  %v5239_v60 = vpop.f32.mrb[48].mxu1 }
 0x336   :  { %v1488_v31 = vand.u32 2147483647, %v5239_v60  ;;  %v5242_v1 = vpop.f32.mrb[49].mxu1 }
 0x337   :  { %v1499_v59 = vsub.f32 0.0, %v1483_v54  ;;  %v5245_v53 = vpop.f32.mrb[50].mxu1  ;;  %v1486_v18 = vand.u32 2147483647, %v5242_v1 }
 0x338   :  { %4190 = vmatpush3.bf16.msra.mxu0 %v4469_v41  ;;  %v4479_v41 = vld [vmem:[#allocation2 + $0x150] sm:$0xff]   ;;  %v1504_v17 = vsub.f32 0.0, %v1488_v31  ;;  %v5249_v22 = vpop.f32.mrb[51].mxu1  ;;  %v1489_v45 = vand.u32 2147483647, %v5245_v53 }
 0x339   :  { %4191 = vmatprep.subr.bf16.mxu0 %v4832_v0  ;;  %4161 = vmatprep.subr.bf16.mxu1 %v4479_v41  ;;  %v1524_v25 = vmul.f32 1.442695, %v1499_v59  ;;  %v1502_v24 = vsub.f32 0.0, %v1486_v18  ;;  %v1487_v62 = vand.u32 2147483647, %v5249_v22 }
 0x33a   :  { %4162 = vmatpush3.bf16.msra.mxu1 %v4479_v41  ;;  %v1534_v14 = vmul.f32 1.442695, %v1504_v17  ;;  %v1505_v32 = vsub.f32 0.0, %v1489_v45  ;;  %v1463_v45 = vmax.f32 %v5224_v49, 0.0 }
 0x33b   :  { %4163 = vmatprep.subr.bf16.mxu1 %v4480_v57  ;;  %v1503_v39 = vsub.f32 0.0, %v1487_v62 }
 0x33c   :  { %4192 = vmatpush3.bf16.msra.mxu0 %v4470_v51  ;;  %v4610_v51 = vpop.eup %4609  ;;  %v1536_v38 = vmul.f32 1.442695, %v1505_v32 }
 0x33d   :  { %4193 = vmatprep.subr.bf16.mxu0 %v4832_v0  ;;  %v1539_v58 = vadd.f32 1.0, %v4610_v51  ;;  %v4612_v61 = vpop.eup %4611 }
 0x33e   :  { %v4614_v5 = vpop.eup %4613  ;;  %v1544_v9 = vadd.f32 1.0, %v4612_v61  ;;  %4164 = vmatpush3.bf16.msra.mxu1 %v4480_v57 }
 0x33f   :  { %v4616_v47 = vpop.eup %4615  ;;  %v1542_v15 = vadd.f32 1.0, %v4614_v5  ;;  %4229 = vmatprep.subr.bf16.mxu1 %v4832_v0  ;;  %v1464_v5 = vmax.f32 %v5215_v20, 0.0 }
 0x340   :  { %4194 = vmatpush3.bf16.msra.mxu0 %v4471_v63  ;;  %v1541_v63 = vadd.f32 1.0, %v4608_v48  ;;  %v4618_v23 = vpop.eup %4617  ;;  %v1545_v43 = vadd.f32 1.0, %v4616_v47 }
 0x341   :  { %4195 = vmatprep.subr.bf16.mxu0 %v4832_v0  ;;  %v1543_v10 = vadd.f32 1.0, %v4618_v23  ;;  %v4620_v27 = vpop.eup %4619  ;;  %v1465_v23 = vmax.f32 %v5221_v26, 0.0 }
 0x342   :  { %4623 = vlog2.f32 %v1541_v63  ;;  %v4622_v16 = vpop.eup %4621  ;;  %v1559_v35 = vmul.f32 0.6931472, %v4620_v27 }
 0x343   :  { %4625 = vlog2.f32 %v1539_v58  ;;  %v1555_v8 = vmul.f32 0.6931472, %v4622_v16 }
 0x344   :  { %4196 = vmatpush3.bf16.msra.mxu0 %v4472_v42  ;;  %v1498_v42 = vsub.f32 0.0, %v1482_v37  ;;  %4627 = vpow2.f32 %v1526_v44  ;;  %v1530_v37 = vmul.f32 1.442695, %v1502_v24  ;;  %v1588_v55 = vadd.f32 %v1559_v35, %v1460_v7 }
 0x345   :  { %v1532_v44 = vmul.f32 1.442695, %v1503_v39 }
 0x346   :  { %v1522_v52 = vmul.f32 1.442695, %v1498_v42  ;;  %v1586_v42 = vadd.f32 %v1555_v8, %v1458_v30  ;;  %v3627_v56 = vadd.f32 -0.6931472, %v1588_v55  ;;  %v1462_v30 = vmax.f32 %v5218_v12, 0.0 }
 0x347   :  { %v1468_v55 = vmax.f32 %v5227_v2, 0.0 }
 0x348   :  { %4629 = vpow2.f32 %v1522_v52  ;;  %v3625_v57 = vadd.f32 -0.6931472, %v1586_v42 }
 0x349   :  { %4631 = vpow2.f32 %v1528_v3 }
 0x34a   :  { %4633 = vlog2.f32 %v1544_v9 }
 0x34b   :  { %4635 = vlog2.f32 %v1542_v15 }
 0x34c   :  { %4637 = vlog2.f32 %v1545_v43  ;;  %v4624_v48 = vpop.eup %4623 }
 0x34d   :  { %4639 = vlog2.f32 %v1543_v10  ;;  %v4626_v41 = vpop.eup %4625  ;;  %v1561_v51 = vmul.f32 0.6931472, %v4624_v48 }
 0x34e   :  { %4641 = vpow2.f32 %v1524_v25  ;;  %v4628_v63 = vpop.eup %4627  ;;  %v1557_v58 = vmul.f32 0.6931472, %v4626_v41 }
 0x34f   :  { %4643 = vpow2.f32 %v1534_v14  ;;  %v1589_v52 = vadd.f32 %v1561_v51, %v1461_v50  ;;  %v1548_v54 = vadd.f32 1.0, %v4628_v63 }
 0x350   :  { %4645 = vpow2.f32 %v1530_v37  ;;  %v1587_v59 = vadd.f32 %v1557_v58, %v1459_v34 }
 0x351   :  { %4647 = vpow2.f32 %v1536_v38  ;;  %v3628_v31 = vadd.f32 -0.6931472, %v1589_v52 }
 0x352   :  { %v4630_v46 = vpop.eup %4629  ;;  %4649 = vpow2.f32 %v1532_v44  ;;  %v3626_v47 = vadd.f32 -0.6931472, %v1587_v59 }
 0x353   :  { %v4632_v3 = vpop.eup %4631  ;;  %v1546_v61 = vadd.f32 1.0, %v4630_v46  ;;  %4651 = vlog2.f32 %v1548_v54  ;;  %v1619_v17 = vpack.c.bf16 %v3628_v31, %v3627_v56  ;;  %v1469_v56 = vmax.f32 %v5233_v4, 0.0 }
 0x354   :  { %v1549_v7 = vadd.f32 1.0, %v4632_v3  ;;  %v4634_v9 = vpop.eup %4633  ;;  %v1618_v10 = vpack.c.bf16 %v3626_v47, %v3625_v57  ;;  %v1466_v57 = vmax.f32 %v5230_v33, 0.0  ;;  %v1472_v4 = vmax.f32 %v5239_v60, 0.0 }
 0x355   :  { %4653 = vlog2.f32 %v1546_v61  ;;  %v4636_v15 = vpop.eup %4635  ;;  %v1567_v18 = vmul.f32 0.6931472, %v4634_v9  ;;  %v1467_v9 = vmax.f32 %v5236_v40, 0.0 }
 0x356   :  { %4655 = vlog2.f32 %v1549_v7  ;;  %v4638_v43 = vpop.eup %4637  ;;  %v1563_v25 = vmul.f32 0.6931472, %v4636_v15  ;;  %4165 = vmatprep.mubr.bf16.mxu1 %v1618_v10 }
 0x357   :  { %v4640_v14 = vpop.eup %4639  ;;  %v1592_v20 = vadd.f32 %v1567_v18, %v1464_v5  ;;  %v1569_v24 = vmul.f32 0.6931472, %v4638_v43  ;;  %4166 = vmatmul.mubr.bf16.vlgmr.msra.gmra.mrb[52].mxu1 %v1619_v17  ;;  %v1470_v17 = vmax.f32 %v5242_v1, 0.0  ;;  %v1473_v43 = vmax.f32 %v5245_v53, 0.0 }
 0x358   :  { %v4642_v27 = vpop.eup %4641  ;;  %v1590_v50 = vadd.f32 %v1563_v25, %v1462_v30  ;;  %v1565_v32 = vmul.f32 0.6931472, %v4640_v14 }
 0x359   :  { %v4644_v12 = vpop.eup %4643  ;;  %v3631_v62 = vadd.f32 -0.6931472, %v1592_v20  ;;  %v1593_v16 = vadd.f32 %v1569_v24, %v1465_v23  ;;  %v1547_v35 = vadd.f32 1.0, %v4642_v27  ;;  %v1471_v20 = vmax.f32 %v5249_v22, 0.0  ;;  %v3603_v22 = vld [vmem:[%s5750_s4 + $0x2] ss:$0 sm:$0xff] }
 0x35a   :  { %v4646_v34 = vpop.eup %4645  ;;  %v3629_v26 = vadd.f32 -0.6931472, %v1590_v50  ;;  %v1591_v37 = vadd.f32 %v1565_v32, %v1463_v45  ;;  %v1552_v48 = vadd.f32 1.0, %v4644_v12 }
 0x35b   :  { %v4648_v8 = vpop.eup %4647  ;;  %v3632_v38 = vadd.f32 -0.6931472, %v1593_v16  ;;  %4657 = vlog2.f32 %v1547_v35  ;;  %v1550_v49 = vadd.f32 1.0, %v4646_v34 }
 0x35c   :  { %v4650_v39 = vpop.eup %4649  ;;  %v3630_v41 = vadd.f32 -0.6931472, %v1591_v37  ;;  %4659 = vlog2.f32 %v1552_v48  ;;  %v1553_v51 = vadd.f32 1.0, %v4648_v8 }
 0x35d   :  { %v4652_v63 = vpop.eup %4651  ;;  %4661 = vlog2.f32 %v1550_v49  ;;  %v1551_v42 = vadd.f32 1.0, %v4650_v39  ;;  %v1621_v58 = vpack.c.bf16 %v3632_v38, %v3631_v62 }
 0x35e   :  { %v1575_v46 = vmul.f32 0.6931472, %v4652_v63  ;;  %4663 = vlog2.f32 %v1553_v51  ;;  %v1620_v52 = vpack.c.bf16 %v3630_v41, %v3629_v26  ;;  %v4748_v63 = vld [vmem:[%s5746_s0 + $0x8] sm:$0xff] }
 0x35f   :  { %v4654_v44 = vpop.eup %4653  ;;  %4665 = vlog2.f32 %v1551_v42 }
 0x360   :  { %v4656_v54 = vpop.eup %4655  ;;  %v1596_v3 = vadd.f32 %v1575_v46, %v1468_v55  ;;  %v1571_v59 = vmul.f32 0.6931472, %v4654_v44  ;;  %4169 = vmatprep.mubr.bf16.mxu1 %v1620_v52  ;;  %v4747_v55 = vld [vmem:[%s5746_s0] sm:$0xff] }
 0x361   :  { %v1577_v61 = vmul.f32 0.6931472, %v4656_v54  ;;  %4170 = vmatmul.mubr.bf16.gmra.mrb[56].mxu1 %v1621_v58  ;;  %v4749_v44 = vld [vmem:[%s5748_s2] sm:$0xff] }
 0x362   :  { %v3635_v2 = vadd.f32 -0.6931472, %v1596_v3  ;;  %v1594_v5 = vadd.f32 %v1571_v59, %v1466_v57 }
 0x363   :  { %v1597_v31 = vadd.f32 %v1577_v61, %v1469_v56 }
 0x364   :  { %v3633_v45 = vadd.f32 -0.6931472, %v1594_v5 }
 0x365   :  { %v3636_v7 = vadd.f32 -0.6931472, %v1597_v31  ;;  %v4658_v47 = vpop.eup %4657 }
 0x366   :  { %v4660_v30 = vpop.eup %4659  ;;  %v1573_v15 = vmul.f32 0.6931472, %v4658_v47 }
 0x367   :  { %v1623_v18 = vpack.c.bf16 %v3636_v7, %v3635_v2  ;;  %v4662_v23 = vpop.eup %4661  ;;  %v1583_v33 = vmul.f32 0.6931472, %v4660_v30 }
 0x368   :  { %v4664_v25 = vpop.eup %4663  ;;  %v1595_v10 = vadd.f32 %v1573_v15, %v1467_v9  ;;  %v1579_v14 = vmul.f32 0.6931472, %v4662_v23 }
 0x369   :  { %v4666_v24 = vpop.eup %4665  ;;  %v1600_v40 = vadd.f32 %v1583_v33, %v1472_v4  ;;  %v1585_v27 = vmul.f32 0.6931472, %v4664_v25  ;;  %v4751_v25 = vld [vmem:[%s5748_s2 + $0x10] sm:$0xff] }
 0x36a   :  { %v3634_v50 = vadd.f32 -0.6931472, %v1595_v10  ;;  %v1598_v60 = vadd.f32 %v1579_v14, %v1470_v17  ;;  %v1581_v32 = vmul.f32 0.6931472, %v4666_v24  ;;  %v4753_v10 = vld [vmem:[%s5748_s2 + $0x20] sm:$0xff]  ;;  %v4754_v14 = vld [vmem:[%s5748_s2 + $0x28] sm:$0xff] }
 0x36b   :  { %v3639_v12 = vadd.f32 -0.6931472, %v1600_v40  ;;  %v1601_v62 = vadd.f32 %v1585_v27, %v1473_v43  ;;  %v4750_v43 = vld [vmem:[%s5748_s2 + $0x8] sm:$0xff]  ;;  %v4756_v24 = vld [vmem:[%s5748_s2 + $0x38] sm:$0xff]  ;;  %v4757_v40 = vld [vmem:[%s5748_s2 + $0x40] sm:$0xff] }
 0x36c   :  { %v3637_v1 = vadd.f32 -0.6931472, %v1598_v60  ;;  %v1599_v16 = vadd.f32 %v1581_v32, %v1471_v20  ;;  %v1622_v35 = vpack.c.bf16 %v3634_v50, %v3633_v45  ;;  %v4752_v45 = vld [vmem:[%s5748_s2 + $0x18] sm:$0xff]  ;;  %v4755_v20 = vld [vmem:[%s5748_s2 + $0x30] sm:$0xff]  ;;  %v4758_v27 = vld [vmem:[%s5748_s2 + $0x48] sm:$0xff] }
 0x36d   :  { %v3640_v34 = vadd.f32 -0.6931472, %v1601_v62  ;;  %v4759_v50 = vld [vmem:[%s5748_s2 + $0x50] sm:$0xff]  ;;  %v4760_v60 = vld [vmem:[%s5748_s2 + $0x58] sm:$0xff]  ;;  %v4761_v32 = vld [vmem:[%s5748_s2 + $0x60] sm:$0xff] }
 0x36e   :  { %v3638_v26 = vadd.f32 -0.6931472, %v1599_v16  ;;  %4173 = vmatprep.mubr.bf16.mxu1 %v1622_v35  ;;  %v4763_v62 = vld [vmem:[%s5748_s2 + $0x70] sm:$0xff]  ;;  %v4481_v16 = vld [vmem:[#allocation2 + $0x1a0] sm:$0xff]   ;;  %v4482_v35 = vld [vmem:[#allocation2 + $0x1a8] sm:$0xff]  }
 0x36f   :  { %4174 = vmatmul.mubr.bf16.gmra.mrb[60].mxu1 %v1623_v18  ;;  %v1625_v53 = vpack.c.bf16 %v3640_v34, %v3639_v12  ;;  %v4762_v12 = vld [vmem:[%s5748_s2 + $0x68] sm:$0xff]  ;;  %v4483_v34 = vld [vmem:[#allocation2 + $0x1b0] sm:$0xff]  }
 0x370   :  { %v1624_v37 = vpack.c.bf16 %v3638_v26, %v3637_v1  ;;  %v4764_v1 = vld [vmem:[%s5748_s2 + $0x78] sm:$0xff]  ;;  %4230 = vmatpush3.bf16.msra.mxu1 %v4481_v16 }
 0x371   :  { %4231 = vmatprep.subr.bf16.mxu1 %v4832_v0  ;;  %v4484_v26 = vld [vmem:[#allocation2 + $0x1b8] sm:$0xff]  }
 0x372   :  { %4177 = vmatprep.mubr.bf16.mxu1 %v1624_v37  ;;  %v4486_v37 = vld [vmem:[#allocation2 + $0x1c8] sm:$0xff]  }
 0x374   :  { %4232 = vmatpush3.bf16.msra.mxu1 %v4482_v35 }
 0x375   :  { %4233 = vmatprep.subr.bf16.mxu1 %v4832_v0 }
 0x377   :  { %4178 = vmatmul.mubr.bf16.gmra.mrb[64].mxu1 %v1625_v53  ;;  %v4485_v53 = vld [vmem:[#allocation2 + $0x1c0] sm:$0xff]  }
 0x378   :  { %4245 = vmatprep.mubr.msk.bf16.mxu1 %vm4833_vm0, %v4832_v0  ;;  %4234 = vmatpush3.bf16.msra.mxu1 %v4483_v34 }
 0x379   :  { %4235 = vmatprep.subr.bf16.mxu1 %v4832_v0 }
 0x37c   :  { %4236 = vmatpush3.bf16.msra.mxu1 %v4484_v26 }
 0x37d   :  { %4237 = vmatprep.subr.bf16.mxu1 %v4832_v0 }
 0x380   :  { %4238 = vmatpush3.bf16.msra.mxu1 %v4485_v53 }
 0x381   :  { %4239 = vmatprep.subr.bf16.mxu1 %v4832_v0 }
 0x384   :  { %4240 = vmatpush3.bf16.msra.mxu1 %v4486_v37 }
 0x385   :  { %4241 = vmatprep.subr.bf16.mxu1 %v4832_v0 }
 0x3fa   :  { %v1267_v48 = vpop.f32.mrb[20].mxu0 }
 0x3fb   :  { %v1268_v8 = vadd.f32 %v3603_v22, %v1267_v48  ;;  %v4127_v38 = vpop.f32.mrb[21].mxu0  ;;  %v4488_v48 = vld [vmem:[#allocation2 + $0x1d8] sm:$0xff]  }
 0x3fc   :  { %v1270_v49 = vpop.f32.mrb[22].mxu0 }
 0x3fd   :  { %v1271_v39 = vadd.f32 %v3603_v22, %v1270_v49  ;;  %v4128_v41 = vpop.f32.mrb[23].mxu0  ;;  %v5276_v51 = vadd.f32 %v4747_v55, %v1268_v8  ;;  %v4487_v22 = vld [vmem:[#allocation2 + $0x1d0] sm:$0xff]   ;;  %v3641_v8 = vld [vmem:[%s5750_s4 + $0x8] ss:$0 sm:$0xff] }
 0x3fe   :  { %4242 = vmatpush3.bf16.msra.mxu1 %v4487_v22 }
 0x3ff   :  { %v5281_v42 = vadd.f32 %v4748_v63, %v1271_v39  ;;  %4243 = vmatprep.subr.bf16.mxu1 %v4832_v0 }
 0x401   :  { %v1775_v58 = vpack.c.bf16 %v5281_v42, %v5276_v51 }
 0x402   :  { %4244 = vmatpush3.bf16.msra.mxu1 %v4488_v48 }
 0x403   :  { %4198 = vmatmul.mubr.bf16.vlgmr.msra.gmra.mrb[24].mxu0 %v1775_v58 }
 0x404   :  { %4205 = vmatprep.mubr.msk.f32.mxu0 %vm690_vm2, %v4749_v44 }
 0x42a   :  { %v5289_v46 = vpop.f32.mrb[52].mxu1 }
 0x42b   :  { %v5291_v56 = vpop.f32.mrb[53].mxu1 }
 0x42c   :  { %v5293_v52 = vpop.f32.mrb[54].mxu1  ;;  %v1713_v49 = vadd.f32 %v3641_v8, %v5291_v56 }
 0x42d   :  { %v5295_v54 = vpop.f32.mrb[55].mxu1  ;;  %v1724_v58 = vadd.f32 %v5293_v52, %v3641_v8 }
 0x42e   :  { %v1716_v38 = vadd.f32 %v3641_v8, %v5295_v54 }
 0x434   :  { %v5297_v3 = vpop.f32.mrb[56].mxu1 }
 0x435   :  { %v5299_v57 = vpop.f32.mrb[57].mxu1 }
 0x436   :  { %v5301_v59 = vpop.f32.mrb[58].mxu1 }
 0x437   :  { %v5303_v61 = vpop.f32.mrb[59].mxu1  ;;  %v1740_v56 = vadd.f32 %v5301_v59, %v3641_v8 }
 0x442   :  { %v5305_v2 = vpop.f32.mrb[60].mxu1 }
 0x443   :  { %v5307_v31 = vpop.f32.mrb[61].mxu1  ;;  %v5403_v52 = vadd.f32 %v5305_v2, %v3641_v8 }
 0x444   :  { %v5309_v5 = vpop.f32.mrb[62].mxu1 }
 0x445   :  { %v5311_v7 = vpop.f32.mrb[63].mxu1 }
 0x44a   :  { %v5313_v9 = vpop.f32.mrb[64].mxu1 }
 0x44b   :  { %v5315_v47 = vpop.f32.mrb[65].mxu1 }
 0x44c   :  { %v5317_v4 = vpop.f32.mrb[66].mxu1 }
 0x44d   :  { %v5319_v30 = vpop.f32.mrb[67].mxu1 }
 0x44e   :  { %v5422_v34 = vadd.f32 %v3641_v8, %v5319_v30 }
 0x4d6   :  { %v1858_v15 = vpop.f32.mrb[24].mxu0 }
 0x4d7   :  { %v4199_v17 = vpop.f32.mrb[25].mxu0 }
 0x4d8   :  { %v1861_v18 = vpop.f32.mrb[26].mxu0 }
 0x4d9   :  { %v4413_v23 = vpack.c.bf16 %v1861_v18, %v1858_v15  ;;  %v4200_v33 = vpop.f32.mrb[27].mxu0  ;;  %v1721_v15 = vadd.f32 %v5289_v46, %v3641_v8  ;;  %v5406_v46 = vadd.f32 %v3641_v8, %v5307_v31  ;;  %v5416_v31 = vadd.f32 %v3641_v8, %v5315_v47 }
 0x4da   :  { %v1729_v33 = vadd.f32 %v3641_v8, %v5299_v57  ;;  %v1748_v57 = vadd.f32 %v3641_v8, %v5311_v7 }
 0x4db   :  { %4414 = vmatprep.subr.bf16.mxu0 %v4413_v23 }
 0x4dc   :  { %4416 = vmatpush3.bf16.msra.mxu0 %v4413_v23  ;;  %v1737_v23 = vadd.f32 %v5297_v3, %v3641_v8  ;;  %v5409_v3 = vadd.f32 %v5309_v5, %v3641_v8  ;;  %v5419_v5 = vadd.f32 %v5317_v4, %v3641_v8 }
 0x4dd   :  { %4249 = vmatprep.subr.bf16.mxu0 %v4832_v0 }
 0x4df   :  { %4206 = vmatmul.mubr.msk.f32.vlgmr.msra.gmra.mrb[28].mxu0 %vm690_vm2, %v4750_v43 }
 0x4e0   :  { %4208 = vmatprep.mubr.msk.f32.mxu0 %vm690_vm2, %v4751_v25 }
 0x4e3   :  { %4209 = vmatmul.mubr.msk.f32.gmra.mrb[30].mxu0 %vm690_vm2, %v4752_v45  ;;  %v1732_v45 = vadd.f32 %v3641_v8, %v5303_v61  ;;  %v5413_v61 = vadd.f32 %v5313_v9, %v3641_v8 }
 0x4e4   :  { %4211 = vmatprep.mubr.msk.f32.mxu0 %vm690_vm2, %v4753_v10 }
 0x4e7   :  { %4212 = vmatmul.mubr.msk.f32.gmra.mrb[32].mxu0 %vm690_vm2, %v4754_v14 }
 0x4e8   :  { %4214 = vmatprep.mubr.msk.f32.mxu0 %vm690_vm2, %v4755_v20 }
 0x4eb   :  { %4215 = vmatmul.mubr.msk.f32.gmra.mrb[34].mxu0 %vm690_vm2, %v4756_v24 }
 0x4ec   :  { %4217 = vmatprep.mubr.msk.f32.mxu0 %vm690_vm2, %v4757_v40 }
 0x4ef   :  { %4218 = vmatmul.mubr.msk.f32.gmra.mrb[36].mxu0 %vm690_vm2, %v4758_v27 }
 0x4f0   :  { %4220 = vmatprep.mubr.msk.f32.mxu0 %vm690_vm2, %v4759_v50 }
 0x4f3   :  { %4221 = vmatmul.mubr.msk.f32.gmra.mrb[38].mxu0 %vm690_vm2, %v4760_v60 }
 0x4f4   :  { %4223 = vmatprep.mubr.msk.f32.mxu0 %vm690_vm2, %v4761_v32 }
 0x4f7   :  { %4224 = vmatmul.mubr.msk.f32.gmra.mrb[40].mxu0 %vm690_vm2, %v4762_v12 }
 0x4f8   :  { %4226 = vmatprep.mubr.msk.f32.mxu0 %vm690_vm2, %v4763_v62 }
 0x4fb   :  { %4227 = vmatmul.mubr.msk.f32.gmra.mrb[42].mxu0 %vm690_vm2, %v4764_v1 }
 0x4fc   :  { %4265 = vmatprep.mubr.msk.bf16.mxu0 %vm4833_vm0, %v4832_v0 }
 0x5b2   :  { %v4207_v39 = vpop.f32.mrb[28].mxu0 }
 0x5b3   :  { %v2011_v41 = vmul.f32 %v4207_v39, %v1716_v38  ;;  %v1931_v55 = vpop.f32.mrb[29].mxu0 }
 0x5b4   :  { %v2010_v63 = vmul.f32 %v1931_v55, %v1713_v49 }
 0x5b5   :  { %v2032_v44 = vrot.slane %v2011_v41, 4 }
 0x5b6   :  { %v2026_v17 = vrot.slane %v2010_v63, 4  ;;  %v4210_v18 = vpop.f32.mrb[30].mxu0 }
 0x5b7   :  { %v2033_v43 = vadd.f32 %v2032_v44, %v2011_v41  ;;  %v2013_v25 = vmul.f32 %v4210_v18, %v1724_v58  ;;  %v1941_v54 = vpop.f32.mrb[31].mxu0 }
 0x5b8   :  { %v2027_v10 = vadd.f32 %v2026_v17, %v2010_v63  ;;  %v2012_v14 = vmul.f32 %v1941_v54, %v1721_v15 }
 0x5b9   :  { %v2034_v20 = vrot.slane %v2033_v43, 2  ;;  %v2044_v24 = vrot.slane %v2013_v25, 4 }
 0x5ba   :  { %v2028_v40 = vrot.slane %v2027_v10, 2  ;;  %v2038_v27 = vrot.slane %v2012_v14, 4  ;;  %v4213_v59 = vpop.f32.mrb[32].mxu0 }
 0x5bb   :  { %v2035_v50 = vadd.f32 %v2034_v20, %v2033_v43  ;;  %v2045_v60 = vadd.f32 %v2044_v24, %v2013_v25  ;;  %v2015_v2 = vmul.f32 %v4213_v59, %v1732_v45  ;;  %v1951_v32 = vpop.f32.mrb[33].mxu0 }
 0x5bc   :  { %v2029_v12 = vadd.f32 %v2028_v40, %v2027_v10  ;;  %v2039_v62 = vadd.f32 %v2038_v27, %v2012_v14  ;;  %v2014_v1 = vmul.f32 %v1951_v32, %v1729_v33 }
 0x5bd   :  { %v2036_v7 = vrot.slane %v2035_v50, 1  ;;  %v2046_v16 = vrot.slane %v2045_v60, 2  ;;  %v2056_v35 = vrot.slane %v2015_v2, 4 }
 0x5be   :  { %v2030_v9 = vrot.slane %v2029_v12, 1  ;;  %v2040_v26 = vrot.slane %v2039_v62, 2  ;;  %v2050_v53 = vrot.slane %v2014_v1, 4  ;;  %v4216_v37 = vpop.f32.mrb[34].mxu0 }
 0x5bf   :  { %v2037_v22 = vadd.f32 %v2036_v7, %v2035_v50  ;;  %v2047_v48 = vadd.f32 %v2046_v16, %v2045_v60  ;;  %v2057_v47 = vadd.f32 %v2056_v35, %v2015_v2  ;;  %v2017_v38 = vmul.f32 %v4216_v37, %v1740_v56  ;;  %v1961_v49 = vpop.f32.mrb[35].mxu0 }
 0x5c0   :  { %v2031_v39 = vadd.f32 %v2030_v9, %v2029_v12  ;;  %v2041_v41 = vadd.f32 %v2040_v26, %v2039_v62  ;;  %v2051_v55 = vadd.f32 %v2050_v53, %v2014_v1  ;;  %v2016_v4 = vmul.f32 %v1961_v49, %v1737_v23 }
 0x5c1   :  { %v2123_v63 = vpack.c.bf16 %v2037_v22, %v2037_v22  ;;  %v2048_v58 = vrot.slane %v2047_v48, 1  ;;  %v2058_v44 = vrot.slane %v2057_v47, 2  ;;  %v2068_v15 = vrot.slane %v2017_v38, 4 }
 0x5c2   :  { %v2122_v17 = vpack.c.bf16 %v2031_v39, %v2031_v39  ;;  %v2042_v30 = vrot.slane %v2041_v41, 1  ;;  %v2052_v8 = vrot.slane %v2051_v55, 2  ;;  %v2062_v18 = vrot.slane %v2016_v4, 4  ;;  %v4219_v33 = vpop.f32.mrb[36].mxu0 }
 0x5c3   :  { %v2159_v43 = vunpack.c.l.b16 %v2123_v63  ;;  %v2049_v25 = vadd.f32 %v2048_v58, %v2047_v48  ;;  %v2059_v54 = vadd.f32 %v2058_v44, %v2057_v47  ;;  %v2069_v45 = vadd.f32 %v2068_v15, %v2017_v38  ;;  %v1971_v10 = vpop.f32.mrb[37].mxu0 }
 0x5c4   :  { %v2158_v56 = vunpack.c.l.b16 %v2122_v17  ;;  %v2043_v14 = vadd.f32 %v2042_v30, %v2041_v41  ;;  %v2053_v20 = vadd.f32 %v2052_v8, %v2051_v55  ;;  %v2063_v24 = vadd.f32 %v2062_v18, %v2016_v4 }
 0x5c5   :  { %v2125_v40 = vpack.c.bf16 %v2049_v25, %v2049_v25  ;;  %v2060_v23 = vrot.slane %v2059_v54, 1  ;;  %v2070_v27 = vrot.slane %v2069_v45, 2  ;;  %v2019_v59 = vmul.f32 %v4219_v33, %v1748_v57 }
 0x5c6   :  { %v2174_v50 = vsel %vm1048_vm3, %v2159_v43, %v2158_v56  ;;  %v2124_v60 = vpack.c.bf16 %v2043_v14, %v2043_v14  ;;  %v2054_v2 = vrot.slane %v2053_v20, 1  ;;  %v2064_v32 = vrot.slane %v2063_v24, 2  ;;  %v4222_v12 = vpop.f32.mrb[38].mxu0 }
 0x5c7   :  { %v2161_v62 = vunpack.c.l.b16 %v2125_v40  ;;  %v2061_v1 = vadd.f32 %v2060_v23, %v2059_v54  ;;  %v2071_v7 = vadd.f32 %v2070_v27, %v2069_v45  ;;  %v2080_v16 = vrot.slane %v2019_v59, 4  ;;  %v1981_v35 = vpop.f32.mrb[39].mxu0 }
 0x5c8   :  { %v2160_v9 = vunpack.c.l.b16 %v2124_v60  ;;  %v2055_v26 = vadd.f32 %v2054_v2, %v2053_v20  ;;  %v2065_v53 = vadd.f32 %v2064_v32, %v2063_v24  ;;  %v2018_v37 = vmul.f32 %v1971_v10, %v5406_v46 }
 0x5c9   :  { %v2127_v22 = vpack.c.bf16 %v2061_v1, %v2061_v1  ;;  %v2072_v48 = vrot.slane %v2071_v7, 1  ;;  %v2081_v47 = vadd.f32 %v2080_v16, %v2019_v59  ;;  %v2021_v57 = vmul.f32 %v4222_v12, %v5409_v3 }
 0x5ca   :  { %v2175_v38 = vsel %vm1050_vm4, %v2160_v9, %v2174_v50  ;;  %v2126_v49 = vpack.c.bf16 %v2055_v26, %v2055_v26  ;;  %v2066_v39 = vrot.slane %v2065_v53, 1  ;;  %v2074_v41 = vrot.slane %v2018_v37, 4  ;;  %v4225_v55 = vpop.f32.mrb[40].mxu0 }
 0x5cb   :  { %v2163_v4 = vunpack.c.l.b16 %v2127_v22  ;;  %v2176_v63 = vsel %vm1052_vm5, %v2161_v62, %v2175_v38  ;;  %v2073_v58 = vadd.f32 %v2072_v48, %v2071_v7  ;;  %v2082_v44 = vrot.slane %v2081_v47, 2  ;;  %v1991_v15 = vpop.f32.mrb[41].mxu0 }
 0x5cc   :  { %v2162_v17 = vunpack.c.l.b16 %v2126_v49  ;;  %v2067_v30 = vadd.f32 %v2066_v39, %v2065_v53  ;;  %v2075_v46 = vadd.f32 %v2074_v41, %v2018_v37  ;;  %v2092_v8 = vrot.slane %v2021_v57, 4 }
 0x5cd   :  { %v2129_v18 = vpack.c.bf16 %v2073_v58, %v2073_v58  ;;  %v2083_v33 = vadd.f32 %v2082_v44, %v2081_v47  ;;  %v2020_v3 = vmul.f32 %v1981_v35, %v5403_v52  ;;  %v2023_v43 = vmul.f32 %v4225_v55, %v5422_v34 }
 0x5ce   :  { %v2177_v25 = vsel %vm1054_vm6, %v2162_v17, %v2176_v63  ;;  %v2128_v54 = vpack.c.bf16 %v2067_v30, %v2067_v30  ;;  %v2076_v45 = vrot.slane %v2075_v46, 2  ;;  %v2093_v10 = vadd.f32 %v2092_v8, %v2021_v57  ;;  %v4228_v56 = vpop.f32.mrb[42].mxu0 }
 0x5cf   :  { %v2165_v14 = vunpack.c.l.b16 %v2129_v18  ;;  %v2178_v20 = vsel %vm1056_vm7, %v2163_v4, %v2177_v25  ;;  %v2084_v24 = vrot.slane %v2083_v33, 1  ;;  %v2086_v40 = vrot.slane %v2020_v3, 4  ;;  %v2001_v23 = vpop.f32.mrb[43].mxu0 }
 0x5d0   :  { %v2164_v27 = vunpack.c.l.b16 %v2128_v54  ;;  %v2077_v59 = vadd.f32 %v2076_v45, %v2075_v46  ;;  %v2094_v50 = vrot.slane %v2093_v10, 2  ;;  %v2104_v60 = vrot.slane %v2023_v43, 4 }
 0x5d1   :  { %v2085_v2 = vadd.f32 %v2084_v24, %v2083_v33  ;;  %v2087_v52 = vadd.f32 %v2086_v40, %v2020_v3  ;;  %v2022_v34 = vmul.f32 %v1991_v15, %v5416_v31  ;;  %v2025_v32 = vmul.f32 %v4228_v56, %v5419_v5 }
 0x5d2   :  { %v2179_v12 = vsel %vm1058_vm8, %v2164_v27, %v2178_v20  ;;  %v2078_v62 = vrot.slane %v2077_v59, 1  ;;  %v2095_v1 = vadd.f32 %v2094_v50, %v2093_v10  ;;  %v2105_v7 = vadd.f32 %v2104_v60, %v2023_v43 }
 0x5d3   :  { %v2131_v16 = vpack.c.bf16 %v2085_v2, %v2085_v2  ;;  %v2088_v35 = vrot.slane %v2087_v52, 2  ;;  %v2098_v9 = vrot.slane %v2022_v34, 4  ;;  %v2116_v26 = vrot.slane %v2025_v32, 4 }
 0x5d4   :  { %v2079_v53 = vadd.f32 %v2078_v62, %v2077_v59  ;;  %v2096_v37 = vrot.slane %v2095_v1, 1  ;;  %v2106_v22 = vrot.slane %v2105_v7, 2  ;;  %v2024_v48 = vmul.f32 %v2001_v23, %v5413_v61 }
 0x5d5   :  { %v2167_v47 = vunpack.c.l.b16 %v2131_v16  ;;  %v2089_v57 = vadd.f32 %v2088_v35, %v2087_v52  ;;  %v2099_v38 = vadd.f32 %v2098_v9, %v2022_v34  ;;  %v2117_v31 = vadd.f32 %v2116_v26, %v2025_v32  ;;  %v4489_v9 = vld [vmem:[#allocation2 + $0x1e0] sm:$0xff]   ;;  %v4490_v26 = vld [vmem:[#allocation2 + $0x1e8] sm:$0xff]  }
 0x5d6   :  { %v2130_v49 = vpack.c.bf16 %v2079_v53, %v2079_v53  ;;  %v2097_v5 = vadd.f32 %v2096_v37, %v2095_v1  ;;  %v2107_v39 = vadd.f32 %v2106_v22, %v2105_v7  ;;  %v2110_v41 = vrot.slane %v2024_v48, 4  ;;  %4250 = vmatpush3.bf16.msra.mxu0 %v4489_v9  ;;  %v4491_v53 = vld [vmem:[#allocation2 + $0x1f0] sm:$0xff]   ;;  %v4492_v37 = vld [vmem:[#allocation2 + $0x1f8] sm:$0xff]   ;;  %v4493_v22 = vld [vmem:[#allocation2 + $0x200] sm:$0xff]  }
 0x5d7   :  { %v2090_v55 = vrot.slane %v2089_v57, 1  ;;  %v2100_v4 = vrot.slane %v2099_v38, 2  ;;  %v2118_v63 = vrot.slane %v2117_v31, 2  ;;  %v2180_v58 = vsel %vm1060_vm9, %v2165_v14, %v2179_v12  ;;  %4251 = vmatprep.subr.bf16.mxu0 %v4832_v0 }
 0x5d8   :  { %v2166_v44 = vunpack.c.l.b16 %v2130_v49  ;;  %v2108_v15 = vrot.slane %v2107_v39, 1  ;;  %v2111_v17 = vadd.f32 %v2110_v41, %v2024_v48  ;;  %v2133_v18 = vpack.c.bf16 %v2097_v5, %v2097_v5  ;;  %v4495_v48 = vld [vmem:[#allocation2 + $0x210] sm:$0xff]  }
 0x5d9   :  { %v2091_v30 = vadd.f32 %v2090_v55, %v2089_v57  ;;  %v2101_v46 = vadd.f32 %v2100_v4, %v2099_v38  ;;  %v2119_v8 = vadd.f32 %v2118_v63, %v2117_v31  ;;  %v4497_v57 = vld [vmem:[#allocation2 + $0x220] sm:$0xff]   ;;  %v4498_v38 = vld [vmem:[#allocation2 + $0x228] sm:$0xff]  }
 0x5da   :  { %v2181_v61 = vsel %vm1048_vm3, %v2167_v47, %v2166_v44  ;;  %v2109_v33 = vadd.f32 %v2108_v15, %v2107_v39  ;;  %v2112_v3 = vrot.slane %v2111_v17, 2  ;;  %v2169_v24 = vunpack.c.l.b16 %v2133_v18  ;;  %4252 = vmatpush3.bf16.msra.mxu0 %v4490_v26  ;;  %v4496_v47 = vld [vmem:[#allocation2 + $0x218] sm:$0xff]   ;;  %4269 = vmatprep.subr.bf16.mxu1 %v4497_v57 }
 0x5db   :  { %v2132_v43 = vpack.c.bf16 %v2091_v30, %v2091_v30  ;;  %v2102_v25 = vrot.slane %v2101_v46, 1  ;;  %v2120_v54 = vrot.slane %v2119_v8, 1  ;;  %4253 = vmatprep.subr.bf16.mxu0 %v4832_v0 }
 0x5dc   :  { %v2113_v45 = vadd.f32 %v2112_v3, %v2111_v17  ;;  %v2135_v14 = vpack.c.bf16 %v2109_v33, %v2109_v33 }
 0x5dd   :  { %v2168_v10 = vunpack.c.l.b16 %v2132_v43  ;;  %v2103_v56 = vadd.f32 %v2102_v25, %v2101_v46  ;;  %v2121_v20 = vadd.f32 %v2120_v54, %v2119_v8  ;;  %v4499_v25 = vld [vmem:[#allocation2 + $0x270] sm:$0xff]  }
 0x5de   :  { %v2114_v40 = vrot.slane %v2113_v45, 1  ;;  %v2171_v52 = vunpack.c.l.b16 %v2135_v14  ;;  %4254 = vmatpush3.bf16.msra.mxu0 %v4491_v53  ;;  %v4505_v14 = vld [vmem:[#allocation2 + $0x2a0] sm:$0xff]  }
 0x5df   :  { %v2182_v23 = vsel %vm1050_vm4, %v2168_v10, %v2181_v61  ;;  %v2134_v27 = vpack.c.bf16 %v2103_v56, %v2103_v56  ;;  %v2137_v2 = vpack.c.bf16 %v2121_v20, %v2121_v20  ;;  %4255 = vmatprep.subr.bf16.mxu0 %v4832_v0  ;;  %v4501_v10 = vld [vmem:[#allocation2 + $0x280] sm:$0xff]   ;;  %v4502_v56 = vld [vmem:[#allocation2 + $0x288] sm:$0xff]   ;;  %v4503_v20 = vld [vmem:[#allocation2 + $0x290] sm:$0xff]  }
 0x5e0   :  { %v2183_v59 = vsel %vm1052_vm5, %v2169_v24, %v2182_v23  ;;  %v2115_v50 = vadd.f32 %v2114_v40, %v2113_v45  ;;  %v4500_v45 = vld [vmem:[#allocation2 + $0x278] sm:$0xff]   ;;  %v4506_v40 = vld [vmem:[#allocation2 + $0x2a8] sm:$0xff]   ;;  %v4507_v23 = vld [vmem:[#allocation2 + $0x230] sm:$0xff]  }
 0x5e1   :  { %v2170_v60 = vunpack.c.l.b16 %v2134_v27  ;;  %v2173_v1 = vunpack.c.l.b16 %v2137_v2  ;;  %v4504_v24 = vld [vmem:[#allocation2 + $0x298] sm:$0xff]  }
 0x5e2   :  { %v2136_v34 = vpack.c.bf16 %v2115_v50, %v2115_v50  ;;  %4256 = vmatpush3.bf16.msra.mxu0 %v4492_v37  ;;  %v4508_v27 = vld [vmem:[#allocation2 + $0x238] sm:$0xff]   ;;  %v4510_v37 = vld [vmem:[#allocation2 + $0x248] sm:$0xff]  }
 0x5e3   :  { %v2184_v32 = vsel %vm1054_vm6, %v2170_v60, %v2183_v59  ;;  %4257 = vmatprep.subr.bf16.mxu0 %v4832_v0 }
 0x5e4   :  { %v2172_v12 = vunpack.c.l.b16 %v2136_v34  ;;  %v2185_v62 = vsel %vm1056_vm7, %v2171_v52, %v2184_v32 }
 0x5e6   :  { %v2186_v7 = vsel %vm1058_vm8, %v2172_v12, %v2185_v62  ;;  %4258 = vmatpush3.bf16.msra.mxu0 %v4493_v22  ;;  %v4509_v62 = vld [vmem:[#allocation2 + $0x240] sm:$0xff]  }
 0x5e7   :  { %v2187_v16 = vsel %vm1060_vm9, %v2173_v1, %v2186_v7  ;;  %4259 = vmatprep.subr.bf16.mxu0 %v4832_v0 }
 0x5e8   :  { %v2188_v35 = vpack.c.b16 %v2187_v16, %v2180_v58 }
 0x5ea   :  { %4246 = vmatmul.mubr.bf16.vlgmr.msra.gmra.mrb[68].mxu1 %v2188_v35 }
 0x5eb   :  { %4273 = vmatprep.mubr.msk.bf16.mxu1 %vm161_vm1, %v4891_v6  ;;  %v4494_v6 = vld [vmem:[#allocation2 + $0x208] sm:$0xff]   ;;  %4270 = vmatpush3.bf16.msra.mxu1 %v4497_v57 }
 0x5ec   :  { %4260 = vmatpush3.bf16.msra.mxu0 %v4494_v6  ;;  %4271 = vmatprep.subr.bf16.mxu1 %v4498_v38 }
 0x5ed   :  { %4261 = vmatprep.subr.bf16.mxu0 %v4832_v0 }
 0x5ef   :  { %4272 = vmatpush3.bf16.msra.mxu1 %v4498_v38 }
 0x5f0   :  { %4262 = vmatpush3.bf16.msra.mxu0 %v4495_v48  ;;  %4289 = vmatprep.subr.bf16.mxu1 %v4507_v23 }
 0x5f1   :  { %4263 = vmatprep.subr.bf16.mxu0 %v4832_v0 }
 0x5f2   :  { %4274 = vmatmul.mubr.msk.bf16.vlgmr.msra.gmra.mrb[72].mxu1 %vm161_vm1, %v4904_v11  ;;  %v3674_v11 = vld [vmem:[%s5750_s4 + $0x9] ss:$0 sm:$0xff] }
 0x5f3   :  { %4277 = vmatprep.mubr.msk.bf16.mxu1 %vm161_vm1, %v4907_v13  ;;  %4290 = vmatpush3.bf16.msra.mxu1 %v4507_v23  ;;  %v4514_v23 = vld [vmem:[#allocation2 + $0x268] sm:$0xff]  }
 0x5f4   :  { %4264 = vmatpush3.bf16.msra.mxu0 %v4496_v47  ;;  %4291 = vmatprep.subr.bf16.mxu1 %v4508_v27 }
 0x5f5   :  { %4321 = vmatprep.subr.bf16.mxu0 %v4832_v0 }
 0x5f7   :  { %4292 = vmatpush3.bf16.msra.mxu1 %v4508_v27 }
 0x5f8   :  { %4293 = vmatprep.subr.bf16.mxu1 %v4509_v62 }
 0x5fa   :  { %4278 = vmatmul.mubr.msk.bf16.gmra.mrb[76].mxu1 %vm161_vm1, %v4926_v19 }
 0x5fb   :  { %4281 = vmatprep.mubr.msk.bf16.mxu1 %vm161_vm1, %v4929_v21  ;;  %4294 = vmatpush3.bf16.msra.mxu1 %v4509_v62 }
 0x5fc   :  { %4295 = vmatprep.subr.bf16.mxu1 %v4510_v37 }
 0x5ff   :  { %4296 = vmatpush3.bf16.msra.mxu1 %v4510_v37 }
 0x602   :  { %4282 = vmatmul.mubr.msk.bf16.gmra.mrb[80].mxu1 %vm161_vm1, %v4948_v28 }
 0x603   :  { %4285 = vmatprep.mubr.msk.bf16.mxu1 %vm161_vm1, %v4951_v29 }
 0x60a   :  { %4286 = vmatmul.mubr.msk.bf16.gmra.mrb[84].mxu1 %vm161_vm1, %v4970_v36 }
 0x6bd   :  { %v2272_v13 = vpop.f32.mrb[68].mxu1 }
 0x6be   :  { %v2273_v31 = vadd.f32 %v3674_v11, %v2272_v13  ;;  %v4247_v49 = vpop.f32.mrb[69].mxu1 }
 0x6bf   :  { %v2275_v19 = vpop.f32.mrb[70].mxu1  ;;  %v4511_v49 = vld [vmem:[#allocation2 + $0x250] sm:$0xff]  }
 0x6c0   :  { %v2281_v5 = vand.u32 2147483647, %v2273_v31  ;;  %v2276_v39 = vadd.f32 %v3674_v11, %v2275_v19  ;;  %v4248_v21 = vpop.f32.mrb[71].mxu1  ;;  %v2279_v17 = vmax.f32 %v2273_v31, 0.0  ;;  %4297 = vmatprep.subr.bf16.mxu1 %v4511_v49 }
 0x6c1   :  { %4298 = vmatpush3.bf16.msra.mxu1 %v4511_v49 }
 0x6c2   :  { %v2283_v41 = vsub.f32 0.0, %v2281_v5  ;;  %v2282_v55 = vand.u32 2147483647, %v2276_v39  ;;  %v2280_v61 = vmax.f32 %v2276_v39, 0.0 }
 0x6c4   :  { %v2285_v28 = vmul.f32 1.442695, %v2283_v41  ;;  %v2284_v4 = vsub.f32 0.0, %v2282_v55 }
 0x6c5   :  { %v5481_v59 = vpop.f32.mrb[72].mxu1 }
 0x6c6   :  { %4667 = vpow2.f32 %v2285_v28  ;;  %v2287_v29 = vmul.f32 1.442695, %v2284_v4  ;;  %v2595_v50 = vand.u32 2147483647, %v5481_v59  ;;  %v5484_v60 = vpop.f32.mrb[73].mxu1  ;;  %v4512_v4 = vld [vmem:[#allocation2 + $0x258] sm:$0xff]  }
 0x6c7   :  { %v2593_v2 = vand.u32 2147483647, %v5484_v60  ;;  %v5487_v52 = vpop.f32.mrb[74].mxu1  ;;  %4299 = vmatprep.subr.bf16.mxu1 %v4512_v4 }
 0x6c8   :  { %4669 = vpow2.f32 %v2287_v29  ;;  %v2611_v34 = vsub.f32 0.0, %v2595_v50  ;;  %v2596_v32 = vand.u32 2147483647, %v5487_v52  ;;  %v5490_v12 = vpop.f32.mrb[75].mxu1  ;;  %4300 = vmatpush3.bf16.msra.mxu1 %v4512_v4 }
 0x6c9   :  { %v2609_v1 = vsub.f32 0.0, %v2593_v2  ;;  %v2594_v7 = vand.u32 2147483647, %v5490_v12 }
 0x6ca   :  { %v2629_v16 = vmul.f32 1.442695, %v2611_v34  ;;  %v2612_v35 = vsub.f32 0.0, %v2596_v32 }
 0x6cb   :  { %v2625_v9 = vmul.f32 1.442695, %v2609_v1  ;;  %v2610_v26 = vsub.f32 0.0, %v2594_v7  ;;  %v2579_v1 = vmax.f32 %v5481_v59, 0.0 }
 0x6cc   :  { %v2631_v53 = vmul.f32 1.442695, %v2612_v35 }
 0x6cd   :  { %v2627_v22 = vmul.f32 1.442695, %v2610_v26  ;;  %v5493_v6 = vpop.f32.mrb[76].mxu1 }
 0x6ce   :  { %v2599_v48 = vand.u32 2147483647, %v5493_v6  ;;  %v5496_v47 = vpop.f32.mrb[77].mxu1 }
 0x6cf   :  { %v2597_v57 = vand.u32 2147483647, %v5496_v47  ;;  %v5499_v38 = vpop.f32.mrb[78].mxu1 }
 0x6d0   :  { %v4668_v63 = vpop.eup %4667  ;;  %v2615_v11 = vsub.f32 0.0, %v2599_v48  ;;  %v2600_v13 = vand.u32 2147483647, %v5499_v38  ;;  %v5502_v31 = vpop.f32.mrb[79].mxu1 }
 0x6d1   :  { %v2289_v36 = vadd.f32 1.0, %v4668_v63  ;;  %v2613_v19 = vsub.f32 0.0, %v2597_v57  ;;  %v2598_v5 = vand.u32 2147483647, %v5502_v31 }
 0x6d2   :  { %v4670_v58 = vpop.eup %4669  ;;  %v2637_v39 = vmul.f32 1.442695, %v2615_v11  ;;  %v2616_v21 = vsub.f32 0.0, %v2600_v13 }
 0x6d3   :  { %4671 = vlog2.f32 %v2289_v36  ;;  %v2290_v44 = vadd.f32 1.0, %v4670_v58  ;;  %v2633_v41 = vmul.f32 1.442695, %v2613_v19  ;;  %v2614_v55 = vsub.f32 0.0, %v2598_v5 }
 0x6d4   :  { %v2639_v28 = vmul.f32 1.442695, %v2616_v21 }
 0x6d5   :  { %4673 = vlog2.f32 %v2290_v44  ;;  %v2635_v29 = vmul.f32 1.442695, %v2614_v55  ;;  %v5505_v63 = vpop.f32.mrb[80].mxu1 }
 0x6d6   :  { %4675 = vpow2.f32 %v2629_v16  ;;  %v2603_v58 = vand.u32 2147483647, %v5505_v63  ;;  %v5508_v44 = vpop.f32.mrb[81].mxu1 }
 0x6d7   :  { %4677 = vpow2.f32 %v2625_v9  ;;  %v2577_v9 = vmax.f32 %v5484_v60, 0.0  ;;  %v2580_v60 = vmax.f32 %v5487_v52, 0.0 }
 0x6d8   :  { %4679 = vpow2.f32 %v2631_v53 }
 0x6d9   :  { %4681 = vpow2.f32 %v2627_v22 }
 0x6da   :  { %4683 = vpow2.f32 %v2637_v39 }
 0x6db   :  { %4685 = vpow2.f32 %v2633_v41 }
 0x6dc   :  { %4687 = vpow2.f32 %v2639_v28  ;;  %v2578_v28 = vmax.f32 %v5490_v12, 0.0 }
 0x6dd   :  { %v4672_v15 = vpop.eup %4671  ;;  %4689 = vpow2.f32 %v2635_v29 }
 0x6de   :  { %v2292_v30 = vmul.f32 0.6931472, %v4672_v15 }
 0x6df   :  { %v4674_v46 = vpop.eup %4673 }
 0x6e0   :  { %v2295_v8 = vadd.f32 %v2292_v30, %v2279_v17  ;;  %v2294_v18 = vmul.f32 0.6931472, %v4674_v46  ;;  %v4676_v36 = vpop.eup %4675  ;;  %v2601_v30 = vand.u32 2147483647, %v5508_v44  ;;  %v5511_v46 = vpop.f32.mrb[82].mxu1 }
 0x6e1   :  { %v4678_v15 = vpop.eup %4677  ;;  %v2659_v17 = vadd.f32 1.0, %v4676_v36 }
 0x6e2   :  { %v2296_v33 = vadd.f32 %v2294_v18, %v2280_v61  ;;  %v3683_v3 = vadd.f32 -0.6931472, %v2295_v8  ;;  %v4680_v8 = vpop.eup %4679  ;;  %v2657_v61 = vadd.f32 1.0, %v4678_v15  ;;  %v2619_v18 = vsub.f32 0.0, %v2603_v58 }
 0x6e3   :  { %4691 = vlog2.f32 %v2659_v17 }
 0x6e4   :  { %v3684_v43 = vadd.f32 -0.6931472, %v2296_v33  ;;  %v2604_v33 = vand.u32 2147483647, %v5511_v46  ;;  %4693 = vlog2.f32 %v2657_v61 }
 0x6e6   :  { %v2299_v54 = vpack.c.bf16 %v3684_v43, %v3683_v3  ;;  %v5514_v3 = vpop.f32.mrb[83].mxu1  ;;  %v4513_v43 = vld [vmem:[#allocation2 + $0x260] sm:$0xff]  }
 0x6e7   :  { %4301 = vmatprep.subr.bf16.mxu1 %v4513_v43  ;;  %v5517_v50 = vpop.f32.mrb[84].mxu1 }
 0x6e8   :  { %4266 = vmatmul.mubr.bf16.vlgmr.msra.gmra.mrb[44].mxu0 %v2299_v54  ;;  %v2660_v54 = vadd.f32 1.0, %v4680_v8  ;;  %v2607_v34 = vand.u32 2147483647, %v5517_v50  ;;  %v5520_v32 = vpop.f32.mrb[85].mxu1  ;;  %4302 = vmatpush3.bf16.msra.mxu1 %v4513_v43 }
 0x6e9   :  { %4322 = vmatpush3.bf16.msra.mxu0 %v4499_v25  ;;  %4337 = vmatprep.mubr.msk.bf16.mxu0 %vm4833_vm0, %v4832_v0  ;;  %v4682_v25 = vpop.eup %4681  ;;  %v5523_v16 = vpop.f32.mrb[86].mxu1  ;;  %v2605_v37 = vand.u32 2147483647, %v5520_v32 }
 0x6ea   :  { %4323 = vmatprep.subr.bf16.mxu0 %v4832_v0  ;;  %4695 = vlog2.f32 %v2660_v54  ;;  %v4684_v2 = vpop.eup %4683  ;;  %v2623_v53 = vsub.f32 0.0, %v2607_v34  ;;  %v5527_v22 = vpop.f32.mrb[87].mxu1  ;;  %4303 = vmatprep.subr.bf16.mxu1 %v4514_v23  ;;  %v2608_v59 = vand.u32 2147483647, %v5523_v16 }
 0x6eb   :  { %v4686_v62 = vpop.eup %4685  ;;  %v2663_v7 = vadd.f32 1.0, %v4684_v2  ;;  %v2621_v19 = vsub.f32 0.0, %v2605_v37  ;;  %v2606_v21 = vand.u32 2147483647, %v5527_v22  ;;  %v2581_v2 = vmax.f32 %v5496_v47, 0.0 }
 0x6ec   :  { %v4688_v35 = vpop.eup %4687  ;;  %v2661_v26 = vadd.f32 1.0, %v4686_v62  ;;  %v2653_v49 = vmul.f32 1.442695, %v2623_v53  ;;  %v2624_v39 = vsub.f32 0.0, %v2608_v59  ;;  %4304 = vmatpush3.bf16.msra.mxu1 %v4514_v23 }
 0x6ed   :  { %4324 = vmatpush3.bf16.msra.mxu0 %v4500_v45  ;;  %v2617_v45 = vsub.f32 0.0, %v2601_v30  ;;  %v4690_v48 = vpop.eup %4689  ;;  %v2664_v57 = vadd.f32 1.0, %v4688_v35  ;;  %v2649_v4 = vmul.f32 1.442695, %v2621_v19  ;;  %4369 = vmatprep.subr.bf16.mxu1 %v4832_v0  ;;  %v2622_v15 = vsub.f32 0.0, %v2606_v21 }
 0x6ee   :  { %4325 = vmatprep.subr.bf16.mxu0 %v4832_v0  ;;  %v2662_v13 = vadd.f32 1.0, %v4690_v48  ;;  %v4692_v5 = vpop.eup %4691  ;;  %v2655_v58 = vmul.f32 1.442695, %v2624_v39 }
 0x6ef   :  { %v4694_v41 = vpop.eup %4693  ;;  %v2678_v55 = vmul.f32 0.6931472, %v4692_v5 }
 0x6f0   :  { %v2674_v36 = vmul.f32 0.6931472, %v4694_v41 }
 0x6f1   :  { %4326 = vmatpush3.bf16.msra.mxu0 %v4501_v10  ;;  %v2658_v10 = vadd.f32 1.0, %v4682_v25  ;;  %v2707_v52 = vadd.f32 %v2678_v55, %v2579_v1 }
 0x6f2   :  { %4327 = vmatprep.subr.bf16.mxu0 %v4832_v0  ;;  %v2705_v61 = vadd.f32 %v2674_v36, %v2577_v9 }
 0x6f3   :  { %4697 = vlog2.f32 %v2658_v10  ;;  %v3709_v12 = vadd.f32 -0.6931472, %v2707_v52 }
 0x6f4   :  { %v4696_v29 = vpop.eup %4695  ;;  %v3707_v10 = vadd.f32 -0.6931472, %v2705_v61 }
 0x6f5   :  { %4328 = vmatpush3.bf16.msra.mxu0 %v4502_v56  ;;  %v2645_v56 = vmul.f32 1.442695, %v2619_v18  ;;  %v2680_v30 = vmul.f32 0.6931472, %v4696_v29 }
 0x6f6   :  { %4329 = vmatprep.subr.bf16.mxu0 %v4832_v0 }
 0x6f7   :  { %4699 = vpow2.f32 %v2645_v56  ;;  %v2708_v25 = vadd.f32 %v2680_v30, %v2580_v60  ;;  %v2588_v30 = vmax.f32 %v5511_v46, 0.0  ;;  %v2591_v46 = vmax.f32 %v5517_v50, 0.0 }
 0x6f9   :  { %4330 = vmatpush3.bf16.msra.mxu0 %v4503_v20  ;;  %v2620_v20 = vsub.f32 0.0, %v2604_v33  ;;  %v2651_v33 = vmul.f32 1.442695, %v2622_v15 }
 0x6fa   :  { %4331 = vmatprep.subr.bf16.mxu0 %v4832_v0 }
 0x6fd   :  { %4332 = vmatpush3.bf16.msra.mxu0 %v4504_v24  ;;  %v2641_v24 = vmul.f32 1.442695, %v2617_v45  ;;  %v4698_v17 = vpop.eup %4697 }
 0x6fe   :  { %4333 = vmatprep.subr.bf16.mxu0 %v4832_v0  ;;  %v2676_v18 = vmul.f32 0.6931472, %v4698_v17 }
 0x6ff   :  { %4701 = vpow2.f32 %v2641_v24  ;;  %v3710_v24 = vadd.f32 -0.6931472, %v2708_v25 }
 0x700   :  { %v2706_v56 = vadd.f32 %v2676_v18, %v2578_v28 }
 0x701   :  { %4334 = vmatpush3.bf16.msra.mxu0 %v4505_v14  ;;  %v2602_v14 = vand.u32 2147483647, %v5514_v3  ;;  %v4700_v8 = vpop.eup %4699  ;;  %v2738_v62 = vpack.c.bf16 %v3710_v24, %v3709_v12 }
 0x702   :  { %4335 = vmatprep.subr.bf16.mxu0 %v4832_v0  ;;  %v2667_v54 = vadd.f32 1.0, %v4700_v8 }
 0x703   :  { %v2618_v27 = vsub.f32 0.0, %v2602_v14  ;;  %v2583_v14 = vmax.f32 %v5493_v6, 0.0 }
 0x705   :  { %4336 = vmatpush3.bf16.msra.mxu0 %v4506_v40  ;;  %v2647_v40 = vmul.f32 1.442695, %v2620_v20  ;;  %v2643_v11 = vmul.f32 1.442695, %v2618_v27  ;;  %v3708_v27 = vadd.f32 -0.6931472, %v2706_v56 }
 0x707   :  { %4703 = vpow2.f32 %v2647_v40  ;;  %v2737_v53 = vpack.c.bf16 %v3708_v27, %v3707_v10  ;;  %v2586_v10 = vmax.f32 %v5514_v3, 0.0  ;;  %v2592_v27 = vmax.f32 %v5523_v16, 0.0 }
 0x708   :  { %4705 = vlog2.f32 %v2663_v7  ;;  %v2584_v7 = vmax.f32 %v5499_v38, 0.0 }
 0x709   :  { %4707 = vlog2.f32 %v2661_v26  ;;  %v4702_v43 = vpop.eup %4701  ;;  %v2582_v26 = vmax.f32 %v5502_v31, 0.0  ;;  %4305 = vmatprep.mubr.bf16.mxu1 %v2737_v53 }
 0x70a   :  { %4709 = vlog2.f32 %v2664_v57  ;;  %v2665_v20 = vadd.f32 1.0, %v4702_v43  ;;  %4306 = vmatmul.mubr.bf16.vlgmr.msra.gmra.mrb[88].mxu1 %v2738_v62 }
 0x70b   :  { %4711 = vlog2.f32 %v2662_v13 }
 0x70c   :  { %4713 = vpow2.f32 %v2643_v11 }
 0x70d   :  { %4715 = vpow2.f32 %v2653_v49 }
 0x70e   :  { %4717 = vpow2.f32 %v2649_v4  ;;  %v2587_v4 = vmax.f32 %v5505_v63, 0.0 }
 0x70f   :  { %4719 = vpow2.f32 %v2655_v58 }
 0x710   :  { %4721 = vpow2.f32 %v2651_v33  ;;  %v2585_v33 = vmax.f32 %v5508_v44, 0.0 }
 0x711   :  { %v4704_v45 = vpop.eup %4703  ;;  %4723 = vlog2.f32 %v2667_v54 }
 0x712   :  { %v2668_v40 = vadd.f32 1.0, %v4704_v45  ;;  %v4706_v23 = vpop.eup %4705  ;;  %4725 = vlog2.f32 %v2665_v20 }
 0x713   :  { %v4708_v34 = vpop.eup %4707  ;;  %v2686_v1 = vmul.f32 0.6931472, %v4706_v23 }
 0x714   :  { %4727 = vlog2.f32 %v2668_v40  ;;  %v4710_v35 = vpop.eup %4709  ;;  %v2682_v9 = vmul.f32 0.6931472, %v4708_v34 }
 0x715   :  { %v4712_v37 = vpop.eup %4711  ;;  %v2711_v6 = vadd.f32 %v2686_v1, %v2583_v14  ;;  %v2688_v48 = vmul.f32 0.6931472, %v4710_v35  ;;  %v2589_v14 = vmax.f32 %v5520_v32, 0.0 }
 0x716   :  { %v4714_v57 = vpop.eup %4713  ;;  %v2709_v11 = vadd.f32 %v2682_v9, %v2581_v2  ;;  %v2684_v59 = vmul.f32 0.6931472, %v4712_v37 }
 0x717   :  { %v4716_v47 = vpop.eup %4715  ;;  %v3713_v13 = vadd.f32 -0.6931472, %v2711_v6  ;;  %v2712_v49 = vadd.f32 %v2688_v48, %v2584_v7  ;;  %v2666_v19 = vadd.f32 1.0, %v4714_v57  ;;  %v2590_v7 = vmax.f32 %v5527_v22, 0.0  ;;  %v3685_v22 = vld [vmem:[%s5750_s4 + $0xa] ss:$0 sm:$0xff] }
 0x718   :  { %v4718_v5 = vpop.eup %4717  ;;  %v3711_v38 = vadd.f32 -0.6931472, %v2709_v11  ;;  %v2710_v60 = vadd.f32 %v2684_v59, %v2582_v26  ;;  %v2671_v39 = vadd.f32 1.0, %v4716_v47 }
 0x719   :  { %v4720_v21 = vpop.eup %4719  ;;  %v3714_v41 = vadd.f32 -0.6931472, %v2712_v49  ;;  %4729 = vlog2.f32 %v2666_v19  ;;  %v2669_v31 = vadd.f32 1.0, %v4718_v5 }
 0x71a   :  { %v4722_v55 = vpop.eup %4721  ;;  %v3712_v28 = vadd.f32 -0.6931472, %v2710_v60  ;;  %4731 = vlog2.f32 %v2671_v39  ;;  %v2672_v29 = vadd.f32 1.0, %v4720_v21 }
 0x71b   :  { %v4724_v36 = vpop.eup %4723  ;;  %4733 = vlog2.f32 %v2669_v31  ;;  %v2670_v58 = vadd.f32 1.0, %v4722_v55  ;;  %v2740_v15 = vpack.c.bf16 %v3714_v41, %v3713_v13  ;;  %v4765_v31 = vld [vmem:[%s5748_s2] sm:$0xff] }
 0x71c   :  { %v4726_v17 = vpop.eup %4725  ;;  %v2694_v52 = vmul.f32 0.6931472, %v4724_v36  ;;  %4735 = vlog2.f32 %v2672_v29  ;;  %v2739_v8 = vpack.c.bf16 %v3712_v28, %v3711_v38 }
 0x71d   :  { %4737 = vlog2.f32 %v2670_v58  ;;  %v2690_v43 = vmul.f32 0.6931472, %v4726_v17 }
 0x71e   :  { %v4728_v61 = vpop.eup %4727  ;;  %v2715_v18 = vadd.f32 %v2694_v52, %v2587_v4  ;;  %4309 = vmatprep.mubr.bf16.mxu1 %v2739_v8 }
 0x71f   :  { %v2696_v12 = vmul.f32 0.6931472, %v4728_v61  ;;  %4310 = vmatmul.mubr.bf16.gmra.mrb[92].mxu1 %v2740_v15  ;;  %v2713_v54 = vadd.f32 %v2690_v43, %v2585_v33 }
 0x720   :  { %v3717_v63 = vadd.f32 -0.6931472, %v2715_v18 }
 0x721   :  { %v2716_v25 = vadd.f32 %v2696_v12, %v2588_v30  ;;  %v3715_v34 = vadd.f32 -0.6931472, %v2713_v54 }
 0x723   :  { %v3718_v45 = vadd.f32 -0.6931472, %v2716_v25  ;;  %v4730_v56 = vpop.eup %4729 }
 0x724   :  { %v4732_v20 = vpop.eup %4731  ;;  %v2692_v24 = vmul.f32 0.6931472, %v4730_v56  ;;  %v4768_v56 = vld [vmem:[%s5748_s2 + $0x18] sm:$0xff] }
 0x725   :  { %v2742_v40 = vpack.c.bf16 %v3718_v45, %v3717_v63  ;;  %v4734_v23 = vpop.eup %4733  ;;  %v2702_v44 = vmul.f32 0.6931472, %v4732_v20  ;;  %v4766_v45 = vld [vmem:[%s5748_s2 + $0x8] sm:$0xff] }
 0x726   :  { %v4736_v2 = vpop.eup %4735  ;;  %v2714_v62 = vadd.f32 %v2692_v24, %v2586_v10  ;;  %v2698_v1 = vmul.f32 0.6931472, %v4734_v23  ;;  %v4767_v10 = vld [vmem:[%s5748_s2 + $0x10] sm:$0xff]  ;;  %v4770_v20 = vld [vmem:[%s5748_s2 + $0x28] sm:$0xff] }
 0x727   :  { %v4738_v35 = vpop.eup %4737  ;;  %v2719_v3 = vadd.f32 %v2702_v44, %v2591_v46  ;;  %v2704_v9 = vmul.f32 0.6931472, %v4736_v2  ;;  %v4769_v46 = vld [vmem:[%s5748_s2 + $0x20] sm:$0xff]  ;;  %v4771_v24 = vld [vmem:[%s5748_s2 + $0x30] sm:$0xff]  ;;  %v4774_v23 = vld [vmem:[%s5748_s2 + $0x48] sm:$0xff] }
 0x728   :  { %v3716_v26 = vadd.f32 -0.6931472, %v2714_v62  ;;  %v2717_v50 = vadd.f32 %v2698_v1, %v2589_v14  ;;  %v2700_v53 = vmul.f32 0.6931472, %v4738_v35  ;;  %v4772_v14 = vld [vmem:[%s5748_s2 + $0x38] sm:$0xff]  ;;  %v4775_v44 = vld [vmem:[%s5748_s2 + $0x50] sm:$0xff] }
 0x729   :  { %v3721_v37 = vadd.f32 -0.6931472, %v2719_v3  ;;  %v2720_v6 = vadd.f32 %v2704_v9, %v2592_v27  ;;  %v4776_v27 = vld [vmem:[%s5748_s2 + $0x58] sm:$0xff]  ;;  %v4777_v2 = vld [vmem:[%s5748_s2 + $0x60] sm:$0xff]  ;;  %v4779_v62 = vld [vmem:[%s5748_s2 + $0x70] sm:$0xff] }
 0x72a   :  { %v3719_v32 = vadd.f32 -0.6931472, %v2717_v50  ;;  %v2718_v48 = vadd.f32 %v2700_v53, %v2590_v7  ;;  %v2741_v57 = vpack.c.bf16 %v3716_v26, %v3715_v34  ;;  %v4778_v34 = vld [vmem:[%s5748_s2 + $0x68] sm:$0xff]  ;;  %v4780_v1 = vld [vmem:[%s5748_s2 + $0x78] sm:$0xff]  ;;  %v4515_v7 = vld [vmem:[#allocation2 + $0x2b0] sm:$0xff]  }
 0x72b   :  { %v3722_v11 = vadd.f32 -0.6931472, %v2720_v6  ;;  %4370 = vmatpush3.bf16.msra.mxu1 %v4515_v7  ;;  %v4516_v35 = vld [vmem:[#allocation2 + $0x2b8] sm:$0xff]   ;;  %v4517_v3 = vld [vmem:[#allocation2 + $0x2c0] sm:$0xff]   ;;  %v4518_v9 = vld [vmem:[#allocation2 + $0x2c8] sm:$0xff]  }
 0x72c   :  { %v3720_v59 = vadd.f32 -0.6931472, %v2718_v48  ;;  %4313 = vmatprep.mubr.bf16.mxu1 %v2741_v57  ;;  %4371 = vmatprep.subr.bf16.mxu1 %v4832_v0  ;;  %v4519_v26 = vld [vmem:[#allocation2 + $0x2d0] sm:$0xff]   ;;  %v4520_v50 = vld [vmem:[#allocation2 + $0x2d8] sm:$0xff]   ;;  %v4521_v53 = vld [vmem:[#allocation2 + $0x2e0] sm:$0xff]  }
 0x72d   :  { %4314 = vmatmul.mubr.bf16.gmra.mrb[96].mxu1 %v2742_v40  ;;  %v2744_v16 = vpack.c.bf16 %v3722_v11, %v3721_v37  ;;  %v4773_v40 = vld [vmem:[%s5748_s2 + $0x40] sm:$0xff]  ;;  %v4522_v37 = vld [vmem:[#allocation2 + $0x2e8] sm:$0xff]   ;;  %v3723_v6 = vld [vmem:[%s5750_s4 + $0x10] ss:$0 sm:$0xff] }
 0x72e   :  { %v2743_v47 = vpack.c.bf16 %v3720_v59, %v3719_v32 }
 0x72f   :  { %4372 = vmatpush3.bf16.msra.mxu1 %v4516_v35 }
 0x730   :  { %4317 = vmatprep.mubr.bf16.mxu1 %v2743_v47  ;;  %4373 = vmatprep.subr.bf16.mxu1 %v4832_v0 }
 0x733   :  { %4374 = vmatpush3.bf16.msra.mxu1 %v4517_v3 }
 0x734   :  { %4375 = vmatprep.subr.bf16.mxu1 %v4832_v0 }
 0x735   :  { %4318 = vmatmul.mubr.bf16.gmra.mrb[100].mxu1 %v2744_v16 }
 0x736   :  { %4385 = vmatprep.mubr.msk.bf16.mxu1 %vm4833_vm0, %v4832_v0 }
 0x737   :  { %4376 = vmatpush3.bf16.msra.mxu1 %v4518_v9 }
 0x738   :  { %4377 = vmatprep.subr.bf16.mxu1 %v4832_v0 }
 0x73b   :  { %4378 = vmatpush3.bf16.msra.mxu1 %v4519_v26 }
 0x73c   :  { %4379 = vmatprep.subr.bf16.mxu1 %v4832_v0 }
 0x73f   :  { %4380 = vmatpush3.bf16.msra.mxu1 %v4520_v50 }
 0x740   :  { %4381 = vmatprep.subr.bf16.mxu1 %v4832_v0 }
 0x743   :  { %4382 = vmatpush3.bf16.msra.mxu1 %v4521_v53 }
 0x744   :  { %4383 = vmatprep.subr.bf16.mxu1 %v4832_v0 }
 0x747   :  { %4384 = vmatpush3.bf16.msra.mxu1 %v4522_v37 }
 0x7bb   :  { %v2386_v13 = vpop.f32.mrb[44].mxu0 }
 0x7bc   :  { %v2387_v49 = vadd.f32 %v3685_v22, %v2386_v13  ;;  %v4267_v19 = vpop.f32.mrb[45].mxu0 }
 0x7bd   :  { %v2389_v5 = vpop.f32.mrb[46].mxu0 }
 0x7be   :  { %v2390_v38 = vadd.f32 %v3685_v22, %v2389_v5  ;;  %v4268_v60 = vpop.f32.mrb[47].mxu0  ;;  %v5552_v39 = vadd.f32 %v2387_v49, %v5276_v51 }
 0x7c0   :  { %v5555_v21 = vadd.f32 %v2390_v38, %v5281_v42 }
 0x7c2   :  { %v2894_v41 = vpack.c.bf16 %v5555_v21, %v5552_v39 }
 0x7c4   :  { %4338 = vmatmul.mubr.bf16.vlgmr.msra.gmra.mrb[48].mxu0 %v2894_v41 }
 0x7c5   :  { %4345 = vmatprep.mubr.msk.f32.mxu0 %vm690_vm2, %v4765_v31 }
 0x7dd   :  { %v5563_v55 = vpop.f32.mrb[88].mxu1 }
 0x7de   :  { %v5565_v28 = vpop.f32.mrb[89].mxu1  ;;  %v2840_v13 = vadd.f32 %v5563_v55, %v3723_v6 }
 0x7df   :  { %v5567_v4 = vpop.f32.mrb[90].mxu1  ;;  %v2832_v48 = vadd.f32 %v3723_v6, %v5565_v28 }
 0x7e0   :  { %v5569_v51 = vpop.f32.mrb[91].mxu1  ;;  %v2843_v47 = vadd.f32 %v5567_v4, %v3723_v6 }
 0x7e1   :  { %v2835_v32 = vadd.f32 %v3723_v6, %v5569_v51 }
 0x7f2   :  { %v5571_v42 = vpop.f32.mrb[92].mxu1 }
 0x7f3   :  { %v5573_v29 = vpop.f32.mrb[93].mxu1  ;;  %v2856_v5 = vadd.f32 %v5571_v42, %v3723_v6 }
 0x7f4   :  { %v5575_v36 = vpop.f32.mrb[94].mxu1  ;;  %v2848_v38 = vadd.f32 %v3723_v6, %v5573_v29 }
 0x7f5   :  { %v5577_v58 = vpop.f32.mrb[95].mxu1  ;;  %v2859_v28 = vadd.f32 %v5575_v36, %v3723_v6 }
 0x7f6   :  { %v2851_v51 = vadd.f32 %v3723_v6, %v5577_v58 }
 0x800   :  { %v5579_v15 = vpop.f32.mrb[96].mxu1 }
 0x801   :  { %v5581_v17 = vpop.f32.mrb[97].mxu1  ;;  %v5677_v4 = vadd.f32 %v5579_v15, %v3723_v6 }
 0x802   :  { %v5583_v52 = vpop.f32.mrb[98].mxu1  ;;  %v5680_v55 = vadd.f32 %v3723_v6, %v5581_v17 }
 0x803   :  { %v5585_v30 = vpop.f32.mrb[99].mxu1  ;;  %v5683_v42 = vadd.f32 %v5583_v52, %v3723_v6 }
 0x804   :  { %v2867_v29 = vadd.f32 %v3723_v6, %v5585_v30 }
 0x808   :  { %v5587_v8 = vpop.f32.mrb[100].mxu1 }
 0x809   :  { %v5589_v61 = vpop.f32.mrb[101].mxu1  ;;  %v5687_v58 = vadd.f32 %v5587_v8, %v3723_v6 }
 0x80a   :  { %v5591_v18 = vpop.f32.mrb[102].mxu1  ;;  %v5690_v17 = vadd.f32 %v3723_v6, %v5589_v61 }
 0x80b   :  { %v5593_v33 = vpop.f32.mrb[103].mxu1  ;;  %v5693_v52 = vadd.f32 %v5591_v18, %v3723_v6 }
 0x897   :  { %v2977_v43 = vpop.f32.mrb[48].mxu0 }
 0x898   :  { %v4339_v12 = vpop.f32.mrb[49].mxu0 }
 0x899   :  { %v2980_v63 = vpop.f32.mrb[50].mxu0 }
 0x89a   :  { %v4417_v25 = vpack.c.bf16 %v2980_v63, %v2977_v43  ;;  %v4340_v54 = vpop.f32.mrb[51].mxu0 }
 0x89c   :  { %4418 = vmatprep.subr.bf16.mxu0 %v4417_v25 }
 0x89d   :  { %4420 = vmatpush3.bf16.msra.mxu0 %v4417_v25 }
 0x89e   :  { %4389 = vmatprep.subr.bf16.mxu0 %v4832_v0 }
 0x8a0   :  { %4346 = vmatmul.mubr.msk.f32.vlgmr.msra.gmra.mrb[52].mxu0 %vm690_vm2, %v4766_v45 }
 0x8a1   :  { %4348 = vmatprep.mubr.msk.f32.mxu0 %vm690_vm2, %v4767_v10 }
 0x8a4   :  { %4349 = vmatmul.mubr.msk.f32.gmra.mrb[54].mxu0 %vm690_vm2, %v4768_v56 }
 0x8a5   :  { %4351 = vmatprep.mubr.msk.f32.mxu0 %vm690_vm2, %v4769_v46 }
 0x8a8   :  { %4352 = vmatmul.mubr.msk.f32.gmra.mrb[56].mxu0 %vm690_vm2, %v4770_v20 }
 0x8a9   :  { %4354 = vmatprep.mubr.msk.f32.mxu0 %vm690_vm2, %v4771_v24 }
 0x8ac   :  { %4355 = vmatmul.mubr.msk.f32.gmra.mrb[58].mxu0 %vm690_vm2, %v4772_v14 }
 0x8ad   :  { %4357 = vmatprep.mubr.msk.f32.mxu0 %vm690_vm2, %v4773_v40 }
 0x8b0   :  { %4358 = vmatmul.mubr.msk.f32.gmra.mrb[60].mxu0 %vm690_vm2, %v4774_v23 }
 0x8b1   :  { %4360 = vmatprep.mubr.msk.f32.mxu0 %vm690_vm2, %v4775_v44  ;;  %v5696_v44 = vadd.f32 %v3723_v6, %v5593_v33 }
 0x8b4   :  { %4361 = vmatmul.mubr.msk.f32.gmra.mrb[62].mxu0 %vm690_vm2, %v4776_v27 }
 0x8b5   :  { %4363 = vmatprep.mubr.msk.f32.mxu0 %vm690_vm2, %v4777_v2 }
 0x8b8   :  { %4364 = vmatmul.mubr.msk.f32.gmra.mrb[64].mxu0 %vm690_vm2, %v4778_v34 }
 0x8b9   :  { %4366 = vmatprep.mubr.msk.f32.mxu0 %vm690_vm2, %v4779_v62 }
 0x8bc   :  { %4367 = vmatmul.mubr.msk.f32.gmra.mrb[66].mxu0 %vm690_vm2, %v4780_v1 }
 0x8bd   :  { %4405 = vmatprep.mubr.msk.bf16.mxu0 %vm4833_vm0, %v4832_v0 }
 0x973   :  { %v4347_v57 = vpop.f32.mrb[52].mxu0 }
 0x974   :  { %v3130_v11 = vmul.f32 %v4347_v57, %v2835_v32  ;;  %v3050_v59 = vpop.f32.mrb[53].mxu0 }
 0x975   :  { %v3129_v16 = vmul.f32 %v3050_v59, %v2832_v48 }
 0x976   :  { %v3151_v22 = vrot.slane %v3130_v11, 4 }
 0x977   :  { %v3145_v49 = vrot.slane %v3129_v16, 4  ;;  %v4350_v19 = vpop.f32.mrb[54].mxu0 }
 0x978   :  { %v3152_v60 = vadd.f32 %v3151_v22, %v3130_v11  ;;  %v3132_v41 = vmul.f32 %v4350_v19, %v2843_v47  ;;  %v3060_v31 = vpop.f32.mrb[55].mxu0 }
 0x979   :  { %v3146_v43 = vadd.f32 %v3145_v49, %v3129_v16  ;;  %v3131_v12 = vmul.f32 %v3060_v31, %v2840_v13 }
 0x97a   :  { %v3153_v63 = vrot.slane %v3152_v60, 2  ;;  %v3163_v25 = vrot.slane %v3132_v41, 4 }
 0x97b   :  { %v3147_v54 = vrot.slane %v3146_v43, 2  ;;  %v3157_v45 = vrot.slane %v3131_v12, 4  ;;  %v4353_v36 = vpop.f32.mrb[56].mxu0 }
 0x97c   :  { %v3154_v10 = vadd.f32 %v3153_v63, %v3152_v60  ;;  %v3164_v56 = vadd.f32 %v3163_v25, %v3132_v41  ;;  %v3134_v15 = vmul.f32 %v4353_v36, %v2851_v51  ;;  %v3070_v46 = vpop.f32.mrb[57].mxu0 }
 0x97d   :  { %v3148_v20 = vadd.f32 %v3147_v54, %v3146_v43  ;;  %v3158_v24 = vadd.f32 %v3157_v45, %v3131_v12  ;;  %v3133_v14 = vmul.f32 %v3070_v46, %v2848_v38 }
 0x97e   :  { %v3155_v30 = vrot.slane %v3154_v10, 1  ;;  %v3165_v40 = vrot.slane %v3164_v56, 2  ;;  %v3175_v23 = vrot.slane %v3134_v15, 4 }
 0x97f   :  { %v3149_v8 = vrot.slane %v3148_v20, 1  ;;  %v3159_v27 = vrot.slane %v3158_v24, 2  ;;  %v3169_v2 = vrot.slane %v3133_v14, 4  ;;  %v4356_v34 = vpop.f32.mrb[58].mxu0 }
 0x980   :  { %v3156_v62 = vadd.f32 %v3155_v30, %v3154_v10  ;;  %v3166_v1 = vadd.f32 %v3165_v40, %v3164_v56  ;;  %v3176_v61 = vadd.f32 %v3175_v23, %v3134_v15  ;;  %v3136_v7 = vmul.f32 %v4356_v34, %v2859_v28  ;;  %v3080_v35 = vpop.f32.mrb[59].mxu0 }
 0x981   :  { %v3150_v3 = vadd.f32 %v3149_v8, %v3148_v20  ;;  %v3160_v9 = vadd.f32 %v3159_v27, %v3158_v24  ;;  %v3170_v26 = vadd.f32 %v3169_v2, %v3133_v14  ;;  %v3135_v18 = vmul.f32 %v3080_v35, %v2856_v5 }
 0x982   :  { %v3242_v50 = vpack.c.bf16 %v3156_v62, %v3156_v62  ;;  %v3167_v53 = vrot.slane %v3166_v1, 1  ;;  %v3177_v37 = vrot.slane %v3176_v61, 2  ;;  %v3187_v32 = vrot.slane %v3136_v7, 4 }
 0x983   :  { %v3241_v48 = vpack.c.bf16 %v3150_v3, %v3150_v3  ;;  %v3161_v33 = vrot.slane %v3160_v9, 1  ;;  %v3171_v6 = vrot.slane %v3170_v26, 2  ;;  %v3181_v57 = vrot.slane %v3135_v18, 4  ;;  %v4359_v11 = vpop.f32.mrb[60].mxu0 }
 0x984   :  { %v3278_v59 = vunpack.c.l.b16 %v3242_v50  ;;  %v3168_v16 = vadd.f32 %v3167_v53, %v3166_v1  ;;  %v3178_v47 = vadd.f32 %v3177_v37, %v3176_v61  ;;  %v3188_v22 = vadd.f32 %v3187_v32, %v3136_v7  ;;  %v3090_v13 = vpop.f32.mrb[61].mxu0 }
 0x985   :  { %v3277_v49 = vunpack.c.l.b16 %v3241_v48  ;;  %v3162_v19 = vadd.f32 %v3161_v33, %v3160_v9  ;;  %v3172_v38 = vadd.f32 %v3171_v6, %v3170_v26  ;;  %v3182_v60 = vadd.f32 %v3181_v57, %v3135_v18 }
 0x986   :  { %v3244_v41 = vpack.c.bf16 %v3168_v16, %v3168_v16  ;;  %v3179_v5 = vrot.slane %v3178_v47, 1  ;;  %v3189_v31 = vrot.slane %v3188_v22, 2  ;;  %v3138_v28 = vmul.f32 %v4359_v11, %v2867_v29 }
 0x987   :  { %v3293_v51 = vsel %vm1048_vm3, %v3278_v59, %v3277_v49  ;;  %v3243_v43 = vpack.c.bf16 %v3162_v19, %v3162_v19  ;;  %v3173_v12 = vrot.slane %v3172_v38, 1  ;;  %v3183_v63 = vrot.slane %v3182_v60, 2  ;;  %v4362_v25 = vpop.f32.mrb[62].mxu0 }
 0x988   :  { %v3280_v54 = vunpack.c.l.b16 %v3244_v41  ;;  %v3180_v45 = vadd.f32 %v3179_v5, %v3178_v47  ;;  %v3190_v36 = vadd.f32 %v3189_v31, %v3188_v22  ;;  %v3199_v10 = vrot.slane %v3138_v28, 4  ;;  %v3100_v56 = vpop.f32.mrb[63].mxu0 }
 0x989   :  { %v3279_v15 = vunpack.c.l.b16 %v3243_v43  ;;  %v3174_v46 = vadd.f32 %v3173_v12, %v3172_v38  ;;  %v3184_v20 = vadd.f32 %v3183_v63, %v3182_v60  ;;  %v3137_v24 = vmul.f32 %v3090_v13, %v5680_v55 }
 0x98a   :  { %v3246_v14 = vpack.c.bf16 %v3180_v45, %v3180_v45  ;;  %v3191_v30 = vrot.slane %v3190_v36, 1  ;;  %v3200_v40 = vadd.f32 %v3199_v10, %v3138_v28  ;;  %v3140_v29 = vmul.f32 %v4362_v25, %v5683_v42 }
 0x98b   :  { %v3294_v23 = vsel %vm1050_vm4, %v3279_v15, %v3293_v51  ;;  %v3245_v8 = vpack.c.bf16 %v3174_v46, %v3174_v46  ;;  %v3185_v27 = vrot.slane %v3184_v20, 1  ;;  %v3193_v2 = vrot.slane %v3137_v24, 4  ;;  %v4365_v34 = vpop.f32.mrb[64].mxu0 }
 0x98c   :  { %v3282_v62 = vunpack.c.l.b16 %v3246_v14  ;;  %v3295_v1 = vsel %vm1052_vm5, %v3280_v54, %v3294_v23  ;;  %v3192_v61 = vadd.f32 %v3191_v30, %v3190_v36  ;;  %v3201_v7 = vrot.slane %v3200_v40, 2  ;;  %v3110_v35 = vpop.f32.mrb[65].mxu0 }
 0x98d   :  { %v3281_v3 = vunpack.c.l.b16 %v3245_v8  ;;  %v3186_v9 = vadd.f32 %v3185_v27, %v3184_v20  ;;  %v3194_v55 = vadd.f32 %v3193_v2, %v3137_v24  ;;  %v3211_v26 = vrot.slane %v3140_v29, 4 }
 0x98e   :  { %v3248_v18 = vpack.c.bf16 %v3192_v61, %v3192_v61  ;;  %v3202_v50 = vadd.f32 %v3201_v7, %v3200_v40  ;;  %v3139_v42 = vmul.f32 %v3100_v56, %v5677_v4  ;;  %v3142_v53 = vmul.f32 %v4365_v34, %v5696_v44 }
 0x98f   :  { %v3296_v37 = vsel %vm1054_vm6, %v3281_v3, %v3295_v1  ;;  %v3247_v32 = vpack.c.bf16 %v3186_v9, %v3186_v9  ;;  %v3195_v48 = vrot.slane %v3194_v55, 2  ;;  %v3212_v33 = vadd.f32 %v3211_v26, %v3140_v29  ;;  %v4368_v6 = vpop.f32.mrb[66].mxu0 }
 0x990   :  { %v3284_v57 = vunpack.c.l.b16 %v3248_v18  ;;  %v3297_v11 = vsel %vm1056_vm7, %v3282_v62, %v3296_v37  ;;  %v3203_v59 = vrot.slane %v3202_v50, 1  ;;  %v3205_v16 = vrot.slane %v3139_v42, 4  ;;  %v3120_v47 = vpop.f32.mrb[67].mxu0 }
 0x991   :  { %v3283_v22 = vunpack.c.l.b16 %v3247_v32  ;;  %v3196_v13 = vadd.f32 %v3195_v48, %v3194_v55  ;;  %v3213_v49 = vrot.slane %v3212_v33, 2  ;;  %v3223_v19 = vrot.slane %v3142_v53, 4 }
 0x992   :  { %v3204_v38 = vadd.f32 %v3203_v59, %v3202_v50  ;;  %v3206_v4 = vadd.f32 %v3205_v16, %v3139_v42  ;;  %v3141_v44 = vmul.f32 %v3110_v35, %v5690_v17  ;;  %v3144_v60 = vmul.f32 %v4368_v6, %v5693_v52 }
 0x993   :  { %v3298_v41 = vsel %vm1058_vm8, %v3283_v22, %v3297_v11  ;;  %v3197_v5 = vrot.slane %v3196_v13, 1  ;;  %v3214_v31 = vadd.f32 %v3213_v49, %v3212_v33  ;;  %v3224_v28 = vadd.f32 %v3223_v19, %v3142_v53 }
 0x994   :  { %v3250_v51 = vpack.c.bf16 %v3204_v38, %v3204_v38  ;;  %v3207_v43 = vrot.slane %v3206_v4, 2  ;;  %v3217_v12 = vrot.slane %v3141_v44, 4  ;;  %v3235_v63 = vrot.slane %v3144_v60, 4 }
 0x995   :  { %v3198_v25 = vadd.f32 %v3197_v5, %v3196_v13  ;;  %v3215_v54 = vrot.slane %v3214_v31, 1  ;;  %v3225_v45 = vrot.slane %v3224_v28, 2  ;;  %v3143_v36 = vmul.f32 %v3120_v47, %v5687_v58  ;;  %v4526_v5 = vld [vmem:[#allocation2 + $0x308] sm:$0xff]  }
 0x996   :  { %v3286_v10 = vunpack.c.l.b16 %v3250_v51  ;;  %v3208_v56 = vadd.f32 %v3207_v43, %v3206_v4  ;;  %v3218_v15 = vadd.f32 %v3217_v12, %v3141_v44  ;;  %v3236_v17 = vadd.f32 %v3235_v63, %v3144_v60  ;;  %v4523_v44 = vld [vmem:[#allocation2 + $0x2f0] sm:$0xff]   ;;  %v4524_v60 = vld [vmem:[#allocation2 + $0x2f8] sm:$0xff]   ;;  %v4529_v51 = vld [vmem:[#allocation2 + $0x320] sm:$0xff]  }
 0x997   :  { %v3249_v46 = vpack.c.bf16 %v3198_v25, %v3198_v25  ;;  %v3216_v52 = vadd.f32 %v3215_v54, %v3214_v31  ;;  %v3226_v20 = vadd.f32 %v3225_v45, %v3224_v28  ;;  %v3229_v24 = vrot.slane %v3143_v36, 4  ;;  %4390 = vmatpush3.bf16.msra.mxu0 %v4523_v44  ;;  %v4527_v31 = vld [vmem:[#allocation2 + $0x310] sm:$0xff]   ;;  %v4528_v28 = vld [vmem:[#allocation2 + $0x318] sm:$0xff]   ;;  %v4530_v43 = vld [vmem:[#allocation2 + $0x328] sm:$0xff]  }
 0x998   :  { %v3209_v14 = vrot.slane %v3208_v56, 1  ;;  %v3219_v30 = vrot.slane %v3218_v15, 2  ;;  %v3237_v40 = vrot.slane %v3236_v17, 2  ;;  %v3299_v29 = vsel %vm1060_vm9, %v3284_v57, %v3298_v41  ;;  %4391 = vmatprep.subr.bf16.mxu0 %v4832_v0  ;;  %v4525_v41 = vld [vmem:[#allocation2 + $0x300] sm:$0xff]   ;;  %v3756_v12 = vld [vmem:[%s5750_s4 + $0x11] ss:$0 sm:$0xff] }
 0x999   :  { %v3285_v23 = vunpack.c.l.b16 %v3249_v46  ;;  %v3227_v8 = vrot.slane %v3226_v20, 1  ;;  %v3230_v27 = vadd.f32 %v3229_v24, %v3143_v36  ;;  %v3252_v1 = vpack.c.bf16 %v3216_v52, %v3216_v52 }
 0x99a   :  { %v3210_v2 = vadd.f32 %v3209_v14, %v3208_v56  ;;  %v3220_v34 = vadd.f32 %v3219_v30, %v3218_v15  ;;  %v3238_v62 = vadd.f32 %v3237_v40, %v3236_v17 }
 0x99b   :  { %v3300_v58 = vsel %vm1048_vm3, %v3286_v10, %v3285_v23  ;;  %v3228_v61 = vadd.f32 %v3227_v8, %v3226_v20  ;;  %v3231_v7 = vrot.slane %v3230_v27, 2  ;;  %v3288_v42 = vunpack.c.l.b16 %v3252_v1  ;;  %4392 = vmatpush3.bf16.msra.mxu0 %v4524_v60 }
 0x99c   :  { %v3251_v35 = vpack.c.bf16 %v3210_v2, %v3210_v2  ;;  %v3221_v3 = vrot.slane %v3220_v34, 1  ;;  %v3239_v9 = vrot.slane %v3238_v62, 1  ;;  %4393 = vmatprep.subr.bf16.mxu0 %v4832_v0 }
 0x99d   :  { %v3232_v55 = vadd.f32 %v3231_v7, %v3230_v27  ;;  %v3254_v53 = vpack.c.bf16 %v3228_v61, %v3228_v61  ;;  %v3767_v7 = vld [vmem:[%s5750_s4 + $0x12] ss:$0 sm:$0xff] }
 0x99e   :  { %v3287_v26 = vunpack.c.l.b16 %v3251_v35  ;;  %v3222_v18 = vadd.f32 %v3221_v3, %v3220_v34  ;;  %v3240_v50 = vadd.f32 %v3239_v9, %v3238_v62 }
 0x99f   :  { %v3233_v37 = vrot.slane %v3232_v55, 1  ;;  %v3290_v59 = vunpack.c.l.b16 %v3254_v53  ;;  %4394 = vmatpush3.bf16.msra.mxu0 %v4525_v41 }
 0x9a0   :  { %v3301_v32 = vsel %vm1050_vm4, %v3287_v26, %v3300_v58  ;;  %v3253_v48 = vpack.c.bf16 %v3222_v18, %v3222_v18  ;;  %v3256_v11 = vpack.c.bf16 %v3240_v50, %v3240_v50  ;;  %4395 = vmatprep.subr.bf16.mxu0 %v4832_v0 }
 0x9a1   :  { %v3302_v33 = vsel %vm1052_vm5, %v3288_v42, %v3301_v32  ;;  %v3234_v6 = vadd.f32 %v3233_v37, %v3232_v55 }
 0x9a2   :  { %v3289_v57 = vunpack.c.l.b16 %v3253_v48  ;;  %v3292_v49 = vunpack.c.l.b16 %v3256_v11 }
 0x9a3   :  { %v3255_v16 = vpack.c.bf16 %v3234_v6, %v3234_v6  ;;  %4396 = vmatpush3.bf16.msra.mxu0 %v4526_v5 }
 0x9a4   :  { %v3303_v47 = vsel %vm1054_vm6, %v3289_v57, %v3302_v33  ;;  %4397 = vmatprep.subr.bf16.mxu0 %v4832_v0 }
 0x9a5   :  { %v3291_v22 = vunpack.c.l.b16 %v3255_v16  ;;  %v3304_v13 = vsel %vm1056_vm7, %v3290_v59, %v3303_v47 }
 0x9a7   :  { %v3305_v19 = vsel %vm1058_vm8, %v3291_v22, %v3304_v13  ;;  %4398 = vmatpush3.bf16.msra.mxu0 %v4527_v31 }
 0x9a8   :  { %v3306_v38 = vsel %vm1060_vm9, %v3292_v49, %v3305_v19  ;;  %4399 = vmatprep.subr.bf16.mxu0 %v4832_v0 }
 0x9a9   :  { %v3307_v4 = vpack.c.b16 %v3306_v38, %v3299_v29 }
 0x9ab   :  { %4386 = vmatmul.mubr.bf16.vlgmr.msra.gmra.mrb[104].mxu1 %v3307_v4  ;;  %4400 = vmatpush3.bf16.msra.mxu0 %v4528_v28 }
 0x9ac   :  { %4401 = vmatprep.subr.bf16.mxu0 %v4832_v0 }
 0x9af   :  { %4402 = vmatpush3.bf16.msra.mxu0 %v4529_v51 }
 0x9b0   :  { %4403 = vmatprep.subr.bf16.mxu0 %v4832_v0 }
 0x9b3   :  { %4404 = vmatpush3.bf16.msra.mxu0 %v4530_v43 }
 0xa7e   :  { %v3391_v63 = vpop.f32.mrb[104].mxu1 }
 0xa7f   :  { %v3392_v25 = vadd.f32 %v3756_v12, %v3391_v63  ;;  %v4387_v54 = vpop.f32.mrb[105].mxu1 }
 0xa80   :  { %v3394_v45 = vpop.f32.mrb[106].mxu1 }
 0xa81   :  { %v3400_v36 = vand.u32 2147483647, %v3392_v25  ;;  %v3395_v10 = vadd.f32 %v3756_v12, %v3394_v45  ;;  %v4388_v56 = vpop.f32.mrb[107].mxu1  ;;  %v3398_v29 = vmax.f32 %v3392_v25, 0.0 }
 0xa83   :  { %v3402_v15 = vsub.f32 0.0, %v3400_v36  ;;  %v3401_v17 = vand.u32 2147483647, %v3395_v10  ;;  %v3399_v2 = vmax.f32 %v3395_v10, 0.0 }
 0xa85   :  { %v3404_v46 = vmul.f32 1.442695, %v3402_v15  ;;  %v3403_v52 = vsub.f32 0.0, %v3401_v17 }
 0xa87   :  { %4739 = vpow2.f32 %v3404_v46  ;;  %v3406_v20 = vmul.f32 1.442695, %v3403_v52 }
 0xa89   :  { %4741 = vpow2.f32 %v3406_v20 }
 0xa91   :  { %v4740_v0 = vpop.eup %4739 }
 0xa92   :  { %v3408_v24 = vadd.f32 1.0, %v4740_v0 }
 0xa93   :  { %v4742_v14 = vpop.eup %4741 }
 0xa94   :  { %4743 = vlog2.f32 %v3408_v24  ;;  %v3409_v30 = vadd.f32 1.0, %v4742_v14 }
 0xa96   :  { %4745 = vlog2.f32 %v3409_v30 }
 0xa9e   :  { %v4744_v40 = vpop.eup %4743 }
 0xa9f   :  { %v3411_v23 = vmul.f32 0.6931472, %v4744_v40 }
 0xaa0   :  { %v4746_v8 = vpop.eup %4745 }
 0xaa1   :  { %v3414_v27 = vadd.f32 %v3411_v23, %v3398_v29  ;;  %v3413_v34 = vmul.f32 0.6931472, %v4746_v8 }
 0xaa3   :  { %v3415_v62 = vadd.f32 %v3413_v34, %v3399_v2  ;;  %v3765_v58 = vadd.f32 -0.6931472, %v3414_v27 }
 0xaa5   :  { %v3766_v1 = vadd.f32 -0.6931472, %v3415_v62 }
 0xaa7   :  { %v3418_v61 = vpack.c.bf16 %v3766_v1, %v3765_v58 }
 0xaa9   :  { %4406 = vmatmul.mubr.bf16.vlgmr.msra.gmra.mrb[68].mxu0 %v3418_v61 }
 0xb7c   :  { %v3505_v35 = vpop.f32.mrb[68].mxu0 }
 0xb7d   :  { %v3506_v3 = vadd.f32 %v3767_v7, %v3505_v35  ;;  %v4407_v9 = vpop.f32.mrb[69].mxu0 }
 0xb7e   :  { %v3508_v55 = vpop.f32.mrb[70].mxu0 }
 0xb7f   :  { %v3512_v26 = vadd.f32 %v3506_v3, %v5552_v39  ;;  %v3509_v18 = vadd.f32 %v3767_v7, %v3508_v55  ;;  %v4408_v50 = vpop.f32.mrb[71].mxu0 }
 0xb81   :  { %3514 = vst [vmem:[#allocation5] sm:$0xff] %v3512_v26  ;;  %v3513_v42 = vadd.f32 %v3509_v18, %v5555_v21 }
 0xb83   :  { %3515 = vst [vmem:[#allocation5 + $0x8] sm:$0xff] %v3513_v42 }
 0xb84   :  { %4814 = shalt.err (!%p4811_p12)
}
 0xb85   :  { %s4815_s25 = scalar_lea.hbm %s5751_s5, 256 }
 0xb86   :  { %p4816_p13 = scmp.ne.s32.totalorder %s5751_s5, %s4815_s25  ;;  %p4819_p0 = scmp.lt.u32.totalorder %s4815_s25, %s5751_s5 }
 0xb88   :  { %p4821_p1 = pnand %p4819_p0, %p4816_p13 }
 0xb8a   :  { %4824 = shalt.err (!%p4821_p1)
}
 0xb8b   :  { %s4835_s30 = smov 128   ;;  %s4836_s6 = smov 8  }
 0xb8c   :  { %3527 = dma.vmem_to_hbm [thread:$0]  %s3522_s22, 256, %s5751_s5, [#allocation4], %s4835_s30, %s4835_s30, %s4836_s6  }
 0xb8d   :  { %4827 = dma.done.wait [#allocation4], 256  }
 0xb8e   :  { %4828 = vsyncadd [#allocation4], 4294967040 }
 0xb8f   :  { %3531 = vsyncpa [#allocation3], 1 }
 0xb90   :  { %3532 = vsyncpa [#allocation4], 1 }

</bundles_post_ra>
